<compile_context>
chip_gen: v5e
topology: v5e:2x2
jax: 0.10.0
libtpu: 0.0.40
codegen_flags: <defaults>
</compile_context>

<pallas_src>
import functools

import numpy as np
import jax
import jax.numpy as jnp
from jax import lax
from jax.experimental import pallas as pl
from jax.experimental.pallas import tpu as pltpu

EPS = 1e-5  # nn.BatchNorm2d default eps


def _residual_block_kernel(xe_ref, w1p_ref, w2_ref, par1_ref, par2_ref, vm_ref,
                           o_ref, p1_ref, hm_ref, p2_ref, *, wpad, inv_count):
    """ResidualBlock forward on the flattened, channel-in-sublane layout.

    xe_ref  : (Cin, P + 2*margin)  flattened zero-padded input (+ lane margin)
    w1p_ref : (2*Cout, 9*Cin)      fused conv1 ++ projection tap weights
    w2_ref  : (Cout, 9*Cout)       conv2 tap weights
    par*_ref: (rows, 3)            columns = [conv bias, BN gamma, BN beta]
    vm_ref  : (1, P)               1.0 at valid (interior) positions, else 0
    o_ref   : (Cout, P)            output on the padded grid (wrapper crops)
    p1/p2   : VMEM im2col patch scratch;  hm : h with lane margin for conv2
    """
    cin = xe_ref.shape[0]
    cout = w2_ref.shape[0]
    p = o_ref.shape[1]
    margin = wpad + 1

    vm = vm_ref[...]                                    # (1, P)

    # ---- stage 1: fused im2col, conv1 and projection share the patch -------
    for t in range(9):
        ky, kx = divmod(t, 3)
        start = margin + (ky - 1) * wpad + (kx - 1)      # static lane window
        p1_ref[t * cin:(t + 1) * cin, :] = xe_ref[:, start:start + p]

    acc1 = jnp.dot(w1p_ref[...], p1_ref[...],
                   preferred_element_type=jnp.float32)   # (2*Cout, P)
    acc1 = acc1 + par1_ref[:, 0:1]                       # conv biases

    # one-pass, mask-weighted BN stats for conv1 and projection simultaneously
    mean1 = jnp.sum(acc1 * vm, axis=1, keepdims=True) * inv_count
    var1 = jnp.sum(acc1 * acc1 * vm, axis=1, keepdims=True) * inv_count - mean1 * mean1
    y1 = (acc1 - mean1) * (par1_ref[:, 1:2] * lax.rsqrt(var1 + EPS)) + par1_ref[:, 2:3]

    h = jnp.maximum(y1[:cout, :], 0.0) * vm              # zeros at pad positions
    proj = y1[cout:, :]                                  # projection branch

    # ---- stage 2: conv2 over h (padding carried by the mask + margins) -----
    hm_ref[:, 0:margin] = jnp.zeros((cout, margin), jnp.float32)
    hm_ref[:, margin + p:margin + p + margin] = jnp.zeros((cout, margin), jnp.float32)
    hm_ref[:, margin:margin + p] = h

    for t in range(9):
        ky, kx = divmod(t, 3)
        start = margin + (ky - 1) * wpad + (kx - 1)
        p2_ref[t * cout:(t + 1) * cout, :] = hm_ref[:, start:start + p]

    acc2 = jnp.dot(w2_ref[...], p2_ref[...],
                   preferred_element_type=jnp.float32)   # (Cout, P)
    acc2 = acc2 + par2_ref[:, 0:1]

    mean2 = jnp.sum(acc2 * vm, axis=1, keepdims=True) * inv_count
    var2 = jnp.sum(acc2 * acc2 * vm, axis=1, keepdims=True) * inv_count - mean2 * mean2
    y2 = (acc2 - mean2) * (par2_ref[:, 1:2] * lax.rsqrt(var2 + EPS)) + par2_ref[:, 2:3]

    # residual add + final ReLU; lane-dense full-width store
    o_ref[...] = jnp.maximum(y2 + proj, 0.0)
    # TODO(synk): BatchNorm running-stat (momentum) buffer updates are a
    # training-time side effect not represented; they do not affect the output.


# ----------------------------- wrapper helpers -----------------------------
def _linear_interp_matrix(n_out, n_in):
    """(n_out, n_in) bilinear interpolation matrix, align_corners=True."""
    if n_in == 1:
        return jnp.ones((n_out, 1), jnp.float32)
    src = jnp.arange(n_out, dtype=jnp.float32) * ((n_in - 1) / (n_out - 1))
    lo = jnp.clip(jnp.floor(src).astype(jnp.int32), 0, n_in - 2)
    frac = src - lo.astype(jnp.float32)
    rows = jnp.arange(n_out)
    m = jnp.zeros((n_out, n_in), jnp.float32)
    m = m.at[rows, lo].add(1.0 - frac)
    m = m.at[rows, lo + 1].add(frac)
    return m


def _bilinear_upsample_x2(x_nchw):
    """nn.Upsample(scale_factor=2, mode='bilinear', align_corners=True)."""
    n, c, h, w = x_nchw.shape
    ah = _linear_interp_matrix(2 * h, h)
    aw = _linear_interp_matrix(2 * w, w)
    x = jnp.einsum('oh,nchw->ncow', ah, x_nchw)
    x = jnp.einsum('pw,ncow->ncop', aw, x)
    return x
    # TODO(synk): the bilinear upsample is a linear resampling done in plain
    # JAX here rather than inside the Pallas kernel.


def _taps_rowmajor(w):
    """(O, I, 3, 3) PyTorch conv weight -> (O, 9*I), column = (ky*3+kx)*I + i."""
    o, i = w.shape[0], w.shape[1]
    return jnp.transpose(w, (0, 2, 3, 1)).reshape(o, 9 * i)


def _full_spec(shape):
    return pl.BlockSpec(shape, lambda i, _n=len(shape): (0,) * _n)


def up_forward(x_nchw, p):
    """Up forward. x_nchw: (N, Cin, H, W) float32 -> (N, Cout, 2H, 2W)."""
    n, cin, hin, win = x_nchw.shape
    cout = p["w1"].shape[0]

    xu = _bilinear_upsample_x2(x_nchw)                  # (N, Cin, H, W)
    h, w = 2 * hin, 2 * win
    hp, wp = h + 2, w + 2
    pp = n * hp * wp
    margin = wp + 1
    pe = pp + 2 * margin

    # flatten to (Cin, N*Hp*Wp) with zero spatial padding and a lane margin
    xpad = jnp.pad(xu, ((0, 0), (0, 0), (1, 1), (1, 1)))
    xflat = jnp.transpose(xpad, (1, 0, 2, 3)).reshape(cin, pp)
    xe = jnp.pad(xflat, ((0, 0), (margin, margin)))

    # validity mask over the padded grid (same for every image in the batch)
    yv = (jnp.arange(hp) >= 1) & (jnp.arange(hp) <= h)
    xv = (jnp.arange(wp) >= 1) & (jnp.arange(wp) <= w)
    valid = (yv[:, None] & xv[None, :]).astype(jnp.float32).reshape(1, hp * wp)
    vmask = jnp.tile(valid, (1, n))                     # (1, P)

    # fused weights / per-branch BN parameter tables (few, small DMAs)
    w1p = jnp.concatenate([_taps_rowmajor(p["w1"]), _taps_rowmajor(p["wp"])], axis=0)
    w2 = _taps_rowmajor(p["w2"])
    par1 = jnp.stack([jnp.concatenate([p["b1"], p["bp"]]),
                      jnp.concatenate([p["g1"], p["gp"]]),
                      jnp.concatenate([p["be1"], p["bep"]])], axis=1)   # (2*Cout, 3)
    par2 = jnp.stack([p["b2"], p["g2"], p["be2"]], axis=1)              # (Cout, 3)

    args = (xe, w1p, w2, par1, par2, vmask)
    kernel = functools.partial(_residual_block_kernel, wpad=wp,
                               inv_count=1.0 / float(n * h * w))

    out = pl.pallas_call(
        kernel,
        out_shape=jax.ShapeDtypeStruct((cout, pp), jnp.float32),
        grid=(1,),
        in_specs=[_full_spec(a.shape) for a in args],
        out_specs=_full_spec((cout, pp)),
        scratch_shapes=[pltpu.VMEM((9 * cin, pp), jnp.float32),   # im2col, stage 1
                        pltpu.VMEM((cout, pe), jnp.float32),      # h with lane margin
                        pltpu.VMEM((9 * cout, pp), jnp.float32)], # im2col, stage 2
        compiler_params=pltpu.CompilerParams(dimension_semantics=("arbitrary",)),
    )(*args)

    out4 = out.reshape(cout, n, hp, wp)[:, :, 1:h + 1, 1:w + 1]
    return jnp.transpose(out4, (1, 0, 2, 3))


# ------------------------- pure-JAX reference -------------------------
def _conv_ref(x, w, b):
    y = lax.conv_general_dilated(x, w, (1, 1), "SAME",
                                 dimension_numbers=("NCHW", "OIHW", "NCHW"))
    return y + b[None, :, None, None]


def _bn_ref(x, g, be):
    mean = jnp.mean(x, axis=(0, 2, 3), keepdims=True)
    var = jnp.mean((x - mean) ** 2, axis=(0, 2, 3), keepdims=True)
    return (x - mean) * g[None, :, None, None] / jnp.sqrt(var + EPS) + be[None, :, None, None]


def up_reference(x, p):
    xu = _bilinear_upsample_x2(x)
    hh = jax.nn.relu(_bn_ref(_conv_ref(xu, p["w1"], p["b1"]), p["g1"], p["be1"]))
    y = _bn_ref(_conv_ref(hh, p["w2"], p["b2"]), p["g2"], p["be2"])
    y = y + _bn_ref(_conv_ref(xu, p["wp"], p["bp"]), p["gp"], p["bep"])
    return jax.nn.relu(y)


# ----------------------------------------------------------------------
if __name__ == "__main__":
    in_ch, out_ch = 4, 8
    N, H, W = 2, 16, 16

    key = jax.random.PRNGKey(0)
    ks = jax.random.split(key, 13)
    f32 = jnp.float32
    params = {
        "w1": 0.1 * jax.random.normal(ks[0], (out_ch, in_ch, 3, 3), f32),
        "b1": 0.1 * jax.random.normal(ks[1], (out_ch,), f32),
        "g1": 1.0 + 0.1 * jax.random.normal(ks[2], (out_ch,), f32),
        "be1": 0.1 * jax.random.normal(ks[3], (out_ch,), f32),
        "w2": 0.1 * jax.random.normal(ks[4], (out_ch, out_ch, 3, 3), f32),
        "b2": 0.1 * jax.random.normal(ks[5], (out_ch,), f32),
        "g2": 1.0 + 0.1 * jax.random.normal(ks[6], (out_ch,), f32),
        "be2": 0.1 * jax.random.normal(ks[7], (out_ch,), f32),
        "wp": 0.1 * jax.random.normal(ks[8], (out_ch, in_ch, 3, 3), f32),
        "bp": 0.1 * jax.random.normal(ks[9], (out_ch,), f32),
        "gp": 1.0 + 0.1 * jax.random.normal(ks[10], (out_ch,), f32),
        "bep": 0.1 * jax.random.normal(ks[11], (out_ch,), f32),
    }
    x = jax.random.normal(ks[12], (N, in_ch, H, W), f32)

    out = jax.block_until_ready(up_forward(x, params))
    ref = jax.block_until_ready(up_reference(x, params))

    assert out.shape == (N, out_ch, 2 * H, 2 * W), out.shape
    max_err = float(np.max(np.abs(np.asarray(out) - np.asarray(ref))))
    assert np.allclose(np.asarray(out), np.asarray(ref), atol=3e-4, rtol=3e-4), max_err
    print("KERNEL_OK")
</pallas_src>

<mosaic_0001>
module attributes {stable_mosaic.version = 11 : i64} {
  func.func @_residual_block_kernel(%arg0: i32, %arg1: memref<4x2382xf32, #tpu.memory_space<vmem>>, %arg2: memref<16x36xf32, #tpu.memory_space<vmem>>, %arg3: memref<8x72xf32, #tpu.memory_space<vmem>>, %arg4: memref<16x3xf32, #tpu.memory_space<vmem>>, %arg5: memref<8x3xf32, #tpu.memory_space<vmem>>, %arg6: memref<1x2312xf32, #tpu.memory_space<vmem>>, %arg7: memref<8x2312xf32, #tpu.memory_space<vmem>>, %arg8: memref<36x2312xf32, #tpu.memory_space<vmem>>, %arg9: memref<8x2382xf32, #tpu.memory_space<vmem>>, %arg10: memref<72x2312xf32, #tpu.memory_space<vmem>>) attributes {dimension_semantics = [#tpu.dimension_semantics<arbitrary>], iteration_bounds = array<i64: 1>, scalar_prefetch = 0 : i64, scratch_operands = 3 : i64, tpu.core_type = #tpu.core_type<tc>, window_params = [{pipeline_mode = #tpu.pipeline_mode<synchronous>, transform_indices = @transform_0, window_bounds = array<i64: 4, 2382>}, {pipeline_mode = #tpu.pipeline_mode<synchronous>, transform_indices = @transform_1, window_bounds = array<i64: 16, 36>}, {pipeline_mode = #tpu.pipeline_mode<synchronous>, transform_indices = @transform_2, window_bounds = array<i64: 8, 72>}, {pipeline_mode = #tpu.pipeline_mode<synchronous>, transform_indices = @transform_3, window_bounds = array<i64: 16, 3>}, {pipeline_mode = #tpu.pipeline_mode<synchronous>, transform_indices = @transform_4, window_bounds = array<i64: 8, 3>}, {pipeline_mode = #tpu.pipeline_mode<synchronous>, transform_indices = @transform_5, window_bounds = array<i64: 1, 2312>}, {pipeline_mode = #tpu.pipeline_mode<synchronous>, transform_indices = @transform_6, window_bounds = array<i64: 8, 2312>}]} {
    %c0 = arith.constant 0 : index
    %c0_0 = arith.constant 0 : index
    %0 = vector.load %arg6[%c0, %c0_0] : memref<1x2312xf32, #tpu.memory_space<vmem>>, vector<1x2312xf32>
    %c0_1 = arith.constant 0 : index
    %c0_2 = arith.constant 0 : index
    %1 = vector.load %arg1[%c0_1, %c0_2] : memref<4x2382xf32, #tpu.memory_space<vmem>>, vector<4x2312xf32>
    %c0_3 = arith.constant 0 : index
    %c0_4 = arith.constant 0 : index
    %2 = vector.load %arg8[%c0_3, %c0_4] : memref<36x2312xf32, #tpu.memory_space<vmem>>, vector<4x2312xf32>
    tpu.vector_store %arg8[%c0_3, %c0_4], %1 {strides = array<i32>} : memref<36x2312xf32, #tpu.memory_space<vmem>>, vector<4x2312xf32>,
    %c0_5 = arith.constant 0 : index
    %c1 = arith.constant 1 : index
    %3 = vector.load %arg1[%c0_5, %c1] : memref<4x2382xf32, #tpu.memory_space<vmem>>, vector<4x2312xf32>
    %c4 = arith.constant 4 : index
    %c0_6 = arith.constant 0 : index
    %4 = vector.load %arg8[%c4, %c0_6] : memref<36x2312xf32, #tpu.memory_space<vmem>>, vector<4x2312xf32>
    tpu.vector_store %arg8[%c4, %c0_6], %3 {strides = array<i32>} : memref<36x2312xf32, #tpu.memory_space<vmem>>, vector<4x2312xf32>,
    %c0_7 = arith.constant 0 : index
    %c2 = arith.constant 2 : index
    %5 = vector.load %arg1[%c0_7, %c2] : memref<4x2382xf32, #tpu.memory_space<vmem>>, vector<4x2312xf32>
    %c8 = arith.constant 8 : index
    %c0_8 = arith.constant 0 : index
    %6 = vector.load %arg8[%c8, %c0_8] : memref<36x2312xf32, #tpu.memory_space<vmem>>, vector<4x2312xf32>
    tpu.vector_store %arg8[%c8, %c0_8], %5 {strides = array<i32>} : memref<36x2312xf32, #tpu.memory_space<vmem>>, vector<4x2312xf32>,
    %c0_9 = arith.constant 0 : index
    %c34 = arith.constant 34 : index
    %7 = vector.load %arg1[%c0_9, %c34] : memref<4x2382xf32, #tpu.memory_space<vmem>>, vector<4x2312xf32>
    %c12 = arith.constant 12 : index
    %c0_10 = arith.constant 0 : index
    %8 = vector.load %arg8[%c12, %c0_10] : memref<36x2312xf32, #tpu.memory_space<vmem>>, vector<4x2312xf32>
    tpu.vector_store %arg8[%c12, %c0_10], %7 {strides = array<i32>} : memref<36x2312xf32, #tpu.memory_space<vmem>>, vector<4x2312xf32>,
    %c0_11 = arith.constant 0 : index
    %c35 = arith.constant 35 : index
    %9 = vector.load %arg1[%c0_11, %c35] : memref<4x2382xf32, #tpu.memory_space<vmem>>, vector<4x2312xf32>
    %c16 = arith.constant 16 : index
    %c0_12 = arith.constant 0 : index
    %10 = vector.load %arg8[%c16, %c0_12] : memref<36x2312xf32, #tpu.memory_space<vmem>>, vector<4x2312xf32>
    tpu.vector_store %arg8[%c16, %c0_12], %9 {strides = array<i32>} : memref<36x2312xf32, #tpu.memory_space<vmem>>, vector<4x2312xf32>,
    %c0_13 = arith.constant 0 : index
    %c36 = arith.constant 36 : index
    %11 = vector.load %arg1[%c0_13, %c36] : memref<4x2382xf32, #tpu.memory_space<vmem>>, vector<4x2312xf32>
    %c20 = arith.constant 20 : index
    %c0_14 = arith.constant 0 : index
    %12 = vector.load %arg8[%c20, %c0_14] : memref<36x2312xf32, #tpu.memory_space<vmem>>, vector<4x2312xf32>
    tpu.vector_store %arg8[%c20, %c0_14], %11 {strides = array<i32>} : memref<36x2312xf32, #tpu.memory_space<vmem>>, vector<4x2312xf32>,
    %c0_15 = arith.constant 0 : index
    %c68 = arith.constant 68 : index
    %13 = vector.load %arg1[%c0_15, %c68] : memref<4x2382xf32, #tpu.memory_space<vmem>>, vector<4x2312xf32>
    %c24 = arith.constant 24 : index
    %c0_16 = arith.constant 0 : index
    %14 = vector.load %arg8[%c24, %c0_16] : memref<36x2312xf32, #tpu.memory_space<vmem>>, vector<4x2312xf32>
    tpu.vector_store %arg8[%c24, %c0_16], %13 {strides = array<i32>} : memref<36x2312xf32, #tpu.memory_space<vmem>>, vector<4x2312xf32>,
    %c0_17 = arith.constant 0 : index
    %c69 = arith.constant 69 : index
    %15 = vector.load %arg1[%c0_17, %c69] : memref<4x2382xf32, #tpu.memory_space<vmem>>, vector<4x2312xf32>
    %c28 = arith.constant 28 : index
    %c0_18 = arith.constant 0 : index
    %16 = vector.load %arg8[%c28, %c0_18] : memref<36x2312xf32, #tpu.memory_space<vmem>>, vector<4x2312xf32>
    tpu.vector_store %arg8[%c28, %c0_18], %15 {strides = array<i32>} : memref<36x2312xf32, #tpu.memory_space<vmem>>, vector<4x2312xf32>,
    %c0_19 = arith.constant 0 : index
    %c70 = arith.constant 70 : index
    %17 = vector.load %arg1[%c0_19, %c70] : memref<4x2382xf32, #tpu.memory_space<vmem>>, vector<4x2312xf32>
    %c32 = arith.constant 32 : index
    %c0_20 = arith.constant 0 : index
    %18 = vector.load %arg8[%c32, %c0_20] : memref<36x2312xf32, #tpu.memory_space<vmem>>, vector<4x2312xf32>
    tpu.vector_store %arg8[%c32, %c0_20], %17 {strides = array<i32>} : memref<36x2312xf32, #tpu.memory_space<vmem>>, vector<4x2312xf32>,
    %c0_21 = arith.constant 0 : index
    %c0_22 = arith.constant 0 : index
    %19 = vector.load %arg2[%c0_21, %c0_22] : memref<16x36xf32, #tpu.memory_space<vmem>>, vector<16x36xf32>
    %c0_23 = arith.constant 0 : index
    %c0_24 = arith.constant 0 : index
    %20 = vector.load %arg8[%c0_23, %c0_24] : memref<36x2312xf32, #tpu.memory_space<vmem>>, vector<36x2312xf32>
    %cst = arith.constant dense<0.000000e+00> : vector<16x2312xf32>
    %21 = tpu.matmul %19, %20, %cst {dimension_numbers = #tpu.dot_dimension_numbers<[1], [0], [0], [1], [0, 0, 1, 1], [], []>} : vector<16x36xf32>, vector<36x2312xf32>, vector<16x2312xf32> -> vector<16x2312xf32>
    %c0_25 = arith.constant 0 : index
    %c0_26 = arith.constant 0 : index
    %22 = vector.load %arg4[%c0_25, %c0_26] : memref<16x3xf32, #tpu.memory_space<vmem>>, vector<16x1xf32>
    %23 = vector.broadcast %22 : vector<16x1xf32> to vector<16x2312xf32>
    %24 = arith.addf %21, %23 : vector<16x2312xf32>
    %25 = vector.broadcast %0 : vector<1x2312xf32> to vector<16x2312xf32>
    %26 = arith.mulf %24, %25 : vector<16x2312xf32>
    %cst_27 = arith.constant dense<0.000000e+00> : vector<16xf32>
    %27 = vector.multi_reduction <add>, %26, %cst_27 [1] : vector<16x2312xf32> to vector<16xf32>
    %28 = vector.shape_cast %27 : vector<16xf32> to vector<16x1xf32>
    %cst_28 = arith.constant 4.8828125E-4 : f32
    %29 = vector.broadcast %cst_28 : f32 to vector<16x1xf32>
    %30 = arith.mulf %28, %29 : vector<16x1xf32>
    %31 = arith.mulf %24, %24 : vector<16x2312xf32>
    %32 = vector.broadcast %0 : vector<1x2312xf32> to vector<16x2312xf32>
    %33 = arith.mulf %31, %32 : vector<16x2312xf32>
    %cst_29 = arith.constant dense<0.000000e+00> : vector<16xf32>
    %34 = vector.multi_reduction <add>, %33, %cst_29 [1] : vector<16x2312xf32> to vector<16xf32>
    %35 = vector.shape_cast %34 : vector<16xf32> to vector<16x1xf32>
    %cst_30 = arith.constant 4.8828125E-4 : f32
    %36 = vector.broadcast %cst_30 : f32 to vector<16x1xf32>
    %37 = arith.mulf %35, %36 : vector<16x1xf32>
    %38 = arith.mulf %30, %30 : vector<16x1xf32>
    %39 = arith.subf %37, %38 : vector<16x1xf32>
    %40 = vector.broadcast %30 : vector<16x1xf32> to vector<16x2312xf32>
    %41 = arith.subf %24, %40 : vector<16x2312xf32>
    %c0_31 = arith.constant 0 : index
    %c1_32 = arith.constant 1 : index
    %42 = vector.load %arg4[%c0_31, %c1_32] : memref<16x3xf32, #tpu.memory_space<vmem>>, vector<16x1xf32>
    %cst_33 = arith.constant 9.99999974E-6 : f32
    %43 = vector.broadcast %cst_33 : f32 to vector<16x1xf32>
    %44 = arith.addf %39, %43 : vector<16x1xf32>
    %45 = math.rsqrt %44 : vector<16x1xf32>
    %46 = arith.mulf %42, %45 : vector<16x1xf32>
    %47 = vector.broadcast %46 : vector<16x1xf32> to vector<16x2312xf32>
    %48 = arith.mulf %41, %47 : vector<16x2312xf32>
    %c0_34 = arith.constant 0 : index
    %c2_35 = arith.constant 2 : index
    %49 = vector.load %arg4[%c0_34, %c2_35] : memref<16x3xf32, #tpu.memory_space<vmem>>, vector<16x1xf32>
    %50 = vector.broadcast %49 : vector<16x1xf32> to vector<16x2312xf32>
    %51 = arith.addf %48, %50 : vector<16x2312xf32>
    %52 = vector.extract_strided_slice %51 {offsets = [0, 0], sizes = [8, 2312], strides = [1, 1]} : vector<16x2312xf32> to vector<8x2312xf32>
    %cst_36 = arith.constant 0.000000e+00 : f32
    %53 = vector.broadcast %cst_36 : f32 to vector<8x2312xf32>
    %54 = arith.maximumf %52, %53 : vector<8x2312xf32>
    %55 = vector.broadcast %0 : vector<1x2312xf32> to vector<8x2312xf32>
    %56 = arith.mulf %54, %55 : vector<8x2312xf32>
    %57 = vector.extract_strided_slice %51 {offsets = [8, 0], sizes = [8, 2312], strides = [1, 1]} : vector<16x2312xf32> to vector<8x2312xf32>
    %cst_37 = arith.constant 0.000000e+00 : f32
    %58 = vector.broadcast %cst_37 : f32 to vector<8x35xf32>
    %c0_38 = arith.constant 0 : index
    %c0_39 = arith.constant 0 : index
    %59 = vector.load %arg9[%c0_38, %c0_39] : memref<8x2382xf32, #tpu.memory_space<vmem>>, vector<8x35xf32>
    tpu.vector_store %arg9[%c0_38, %c0_39], %58 {strides = array<i32>} : memref<8x2382xf32, #tpu.memory_space<vmem>>, vector<8x35xf32>,
    %cst_40 = arith.constant 0.000000e+00 : f32
    %60 = vector.broadcast %cst_40 : f32 to vector<8x35xf32>
    %c0_41 = arith.constant 0 : index
    %c2347 = arith.constant 2347 : index
    %61 = vector.load %arg9[%c0_41, %c2347] : memref<8x2382xf32, #tpu.memory_space<vmem>>, vector<8x35xf32>
    tpu.vector_store %arg9[%c0_41, %c2347], %60 {strides = array<i32>} : memref<8x2382xf32, #tpu.memory_space<vmem>>, vector<8x35xf32>,
    %c0_42 = arith.constant 0 : index
    %c35_43 = arith.constant 35 : index
    %62 = vector.load %arg9[%c0_42, %c35_43] : memref<8x2382xf32, #tpu.memory_space<vmem>>, vector<8x2312xf32>
    tpu.vector_store %arg9[%c0_42, %c35_43], %56 {strides = array<i32>} : memref<8x2382xf32, #tpu.memory_space<vmem>>, vector<8x2312xf32>,
    %c0_44 = arith.constant 0 : index
    %c0_45 = arith.constant 0 : index
    %63 = vector.load %arg9[%c0_44, %c0_45] : memref<8x2382xf32, #tpu.memory_space<vmem>>, vector<8x2312xf32>
    %c0_46 = arith.constant 0 : index
    %c0_47 = arith.constant 0 : index
    %64 = vector.load %arg10[%c0_46, %c0_47] : memref<72x2312xf32, #tpu.memory_space<vmem>>, vector<8x2312xf32>
    tpu.vector_store %arg10[%c0_46, %c0_47], %63 {strides = array<i32>} : memref<72x2312xf32, #tpu.memory_space<vmem>>, vector<8x2312xf32>,
    %c0_48 = arith.constant 0 : index
    %c1_49 = arith.constant 1 : index
    %65 = vector.load %arg9[%c0_48, %c1_49] : memref<8x2382xf32, #tpu.memory_space<vmem>>, vector<8x2312xf32>
    %c8_50 = arith.constant 8 : index
    %c0_51 = arith.constant 0 : index
    %66 = vector.load %arg10[%c8_50, %c0_51] : memref<72x2312xf32, #tpu.memory_space<vmem>>, vector<8x2312xf32>
    tpu.vector_store %arg10[%c8_50, %c0_51], %65 {strides = array<i32>} : memref<72x2312xf32, #tpu.memory_space<vmem>>, vector<8x2312xf32>,
    %c0_52 = arith.constant 0 : index
    %c2_53 = arith.constant 2 : index
    %67 = vector.load %arg9[%c0_52, %c2_53] : memref<8x2382xf32, #tpu.memory_space<vmem>>, vector<8x2312xf32>
    %c16_54 = arith.constant 16 : index
    %c0_55 = arith.constant 0 : index
    %68 = vector.load %arg10[%c16_54, %c0_55] : memref<72x2312xf32, #tpu.memory_space<vmem>>, vector<8x2312xf32>
    tpu.vector_store %arg10[%c16_54, %c0_55], %67 {strides = array<i32>} : memref<72x2312xf32, #tpu.memory_space<vmem>>, vector<8x2312xf32>,
    %c0_56 = arith.constant 0 : index
    %c34_57 = arith.constant 34 : index
    %69 = vector.load %arg9[%c0_56, %c34_57] : memref<8x2382xf32, #tpu.memory_space<vmem>>, vector<8x2312xf32>
    %c24_58 = arith.constant 24 : index
    %c0_59 = arith.constant 0 : index
    %70 = vector.load %arg10[%c24_58, %c0_59] : memref<72x2312xf32, #tpu.memory_space<vmem>>, vector<8x2312xf32>
    tpu.vector_store %arg10[%c24_58, %c0_59], %69 {strides = array<i32>} : memref<72x2312xf32, #tpu.memory_space<vmem>>, vector<8x2312xf32>,
    %c0_60 = arith.constant 0 : index
    %c35_61 = arith.constant 35 : index
    %71 = vector.load %arg9[%c0_60, %c35_61] : memref<8x2382xf32, #tpu.memory_space<vmem>>, vector<8x2312xf32>
    %c32_62 = arith.constant 32 : index
    %c0_63 = arith.constant 0 : index
    %72 = vector.load %arg10[%c32_62, %c0_63] : memref<72x2312xf32, #tpu.memory_space<vmem>>, vector<8x2312xf32>
    tpu.vector_store %arg10[%c32_62, %c0_63], %71 {strides = array<i32>} : memref<72x2312xf32, #tpu.memory_space<vmem>>, vector<8x2312xf32>,
    %c0_64 = arith.constant 0 : index
    %c36_65 = arith.constant 36 : index
    %73 = vector.load %arg9[%c0_64, %c36_65] : memref<8x2382xf32, #tpu.memory_space<vmem>>, vector<8x2312xf32>
    %c40 = arith.constant 40 : index
    %c0_66 = arith.constant 0 : index
    %74 = vector.load %arg10[%c40, %c0_66] : memref<72x2312xf32, #tpu.memory_space<vmem>>, vector<8x2312xf32>
    tpu.vector_store %arg10[%c40, %c0_66], %73 {strides = array<i32>} : memref<72x2312xf32, #tpu.memory_space<vmem>>, vector<8x2312xf32>,
    %c0_67 = arith.constant 0 : index
    %c68_68 = arith.constant 68 : index
    %75 = vector.load %arg9[%c0_67, %c68_68] : memref<8x2382xf32, #tpu.memory_space<vmem>>, vector<8x2312xf32>
    %c48 = arith.constant 48 : index
    %c0_69 = arith.constant 0 : index
    %76 = vector.load %arg10[%c48, %c0_69] : memref<72x2312xf32, #tpu.memory_space<vmem>>, vector<8x2312xf32>
    tpu.vector_store %arg10[%c48, %c0_69], %75 {strides = array<i32>} : memref<72x2312xf32, #tpu.memory_space<vmem>>, vector<8x2312xf32>,
    %c0_70 = arith.constant 0 : index
    %c69_71 = arith.constant 69 : index
    %77 = vector.load %arg9[%c0_70, %c69_71] : memref<8x2382xf32, #tpu.memory_space<vmem>>, vector<8x2312xf32>
    %c56 = arith.constant 56 : index
    %c0_72 = arith.constant 0 : index
    %78 = vector.load %arg10[%c56, %c0_72] : memref<72x2312xf32, #tpu.memory_space<vmem>>, vector<8x2312xf32>
    tpu.vector_store %arg10[%c56, %c0_72], %77 {strides = array<i32>} : memref<72x2312xf32, #tpu.memory_space<vmem>>, vector<8x2312xf32>,
    %c0_73 = arith.constant 0 : index
    %c70_74 = arith.constant 70 : index
    %79 = vector.load %arg9[%c0_73, %c70_74] : memref<8x2382xf32, #tpu.memory_space<vmem>>, vector<8x2312xf32>
    %c64 = arith.constant 64 : index
    %c0_75 = arith.constant 0 : index
    %80 = vector.load %arg10[%c64, %c0_75] : memref<72x2312xf32, #tpu.memory_space<vmem>>, vector<8x2312xf32>
    tpu.vector_store %arg10[%c64, %c0_75], %79 {strides = array<i32>} : memref<72x2312xf32, #tpu.memory_space<vmem>>, vector<8x2312xf32>,
    %c0_76 = arith.constant 0 : index
    %c0_77 = arith.constant 0 : index
    %81 = vector.load %arg3[%c0_76, %c0_77] : memref<8x72xf32, #tpu.memory_space<vmem>>, vector<8x72xf32>
    %c0_78 = arith.constant 0 : index
    %c0_79 = arith.constant 0 : index
    %82 = vector.load %arg10[%c0_78, %c0_79] : memref<72x2312xf32, #tpu.memory_space<vmem>>, vector<72x2312xf32>
    %cst_80 = arith.constant dense<0.000000e+00> : vector<8x2312xf32>
    %83 = tpu.matmul %81, %82, %cst_80 {dimension_numbers = #tpu.dot_dimension_numbers<[1], [0], [0], [1], [0, 0, 1, 1], [], []>} : vector<8x72xf32>, vector<72x2312xf32>, vector<8x2312xf32> -> vector<8x2312xf32>
    %c0_81 = arith.constant 0 : index
    %c0_82 = arith.constant 0 : index
    %84 = vector.load %arg5[%c0_81, %c0_82] : memref<8x3xf32, #tpu.memory_space<vmem>>, vector<8x1xf32>
    %85 = vector.broadcast %84 : vector<8x1xf32> to vector<8x2312xf32>
    %86 = arith.addf %83, %85 : vector<8x2312xf32>
    %87 = vector.broadcast %0 : vector<1x2312xf32> to vector<8x2312xf32>
    %88 = arith.mulf %86, %87 : vector<8x2312xf32>
    %cst_83 = arith.constant dense<0.000000e+00> : vector<8xf32>
    %89 = vector.multi_reduction <add>, %88, %cst_83 [1] : vector<8x2312xf32> to vector<8xf32>
    %90 = vector.shape_cast %89 : vector<8xf32> to vector<8x1xf32>
    %cst_84 = arith.constant 4.8828125E-4 : f32
    %91 = vector.broadcast %cst_84 : f32 to vector<8x1xf32>
    %92 = arith.mulf %90, %91 : vector<8x1xf32>
    %93 = arith.mulf %86, %86 : vector<8x2312xf32>
    %94 = vector.broadcast %0 : vector<1x2312xf32> to vector<8x2312xf32>
    %95 = arith.mulf %93, %94 : vector<8x2312xf32>
    %cst_85 = arith.constant dense<0.000000e+00> : vector<8xf32>
    %96 = vector.multi_reduction <add>, %95, %cst_85 [1] : vector<8x2312xf32> to vector<8xf32>
    %97 = vector.shape_cast %96 : vector<8xf32> to vector<8x1xf32>
    %cst_86 = arith.constant 4.8828125E-4 : f32
    %98 = vector.broadcast %cst_86 : f32 to vector<8x1xf32>
    %99 = arith.mulf %97, %98 : vector<8x1xf32>
    %100 = arith.mulf %92, %92 : vector<8x1xf32>
    %101 = arith.subf %99, %100 : vector<8x1xf32>
    %102 = vector.broadcast %92 : vector<8x1xf32> to vector<8x2312xf32>
    %103 = arith.subf %86, %102 : vector<8x2312xf32>
    %c0_87 = arith.constant 0 : index
    %c1_88 = arith.constant 1 : index
    %104 = vector.load %arg5[%c0_87, %c1_88] : memref<8x3xf32, #tpu.memory_space<vmem>>, vector<8x1xf32>
    %cst_89 = arith.constant 9.99999974E-6 : f32
    %105 = vector.broadcast %cst_89 : f32 to vector<8x1xf32>
    %106 = arith.addf %101, %105 : vector<8x1xf32>
    %107 = math.rsqrt %106 : vector<8x1xf32>
    %108 = arith.mulf %104, %107 : vector<8x1xf32>
    %109 = vector.broadcast %108 : vector<8x1xf32> to vector<8x2312xf32>
    %110 = arith.mulf %103, %109 : vector<8x2312xf32>
    %c0_90 = arith.constant 0 : index
    %c2_91 = arith.constant 2 : index
    %111 = vector.load %arg5[%c0_90, %c2_91] : memref<8x3xf32, #tpu.memory_space<vmem>>, vector<8x1xf32>
    %112 = vector.broadcast %111 : vector<8x1xf32> to vector<8x2312xf32>
    %113 = arith.addf %110, %112 : vector<8x2312xf32>
    %114 = arith.addf %113, %57 : vector<8x2312xf32>
    %cst_92 = arith.constant 0.000000e+00 : f32
    %115 = vector.broadcast %cst_92 : f32 to vector<8x2312xf32>
    %116 = arith.maximumf %114, %115 : vector<8x2312xf32>
    %c0_93 = arith.constant 0 : index
    %c0_94 = arith.constant 0 : index
    %117 = vector.load %arg7[%c0_93, %c0_94] : memref<8x2312xf32, #tpu.memory_space<vmem>>, vector<8x2312xf32>
    tpu.vector_store %arg7[%c0_93, %c0_94], %116 {strides = array<i32>} : memref<8x2312xf32, #tpu.memory_space<vmem>>, vector<8x2312xf32>,
    return
  }
  func.func @transform_0(%arg0: i32) -> (i32, i32) {
    %c0_i32 = arith.constant 0 : i32
    %c0_i32_0 = arith.constant 0 : i32
    %c0_i32_1 = arith.constant 0 : i32
    return %c0_i32, %c0_i32_0 : i32, i32
  }
  func.func @transform_1(%arg0: i32) -> (i32, i32) {
    %c0_i32 = arith.constant 0 : i32
    %c0_i32_0 = arith.constant 0 : i32
    %c0_i32_1 = arith.constant 0 : i32
    return %c0_i32, %c0_i32_0 : i32, i32
  }
  func.func @transform_2(%arg0: i32) -> (i32, i32) {
    %c0_i32 = arith.constant 0 : i32
    %c0_i32_0 = arith.constant 0 : i32
    %c0_i32_1 = arith.constant 0 : i32
    return %c0_i32, %c0_i32_0 : i32, i32
  }
  func.func @transform_3(%arg0: i32) -> (i32, i32) {
    %c0_i32 = arith.constant 0 : i32
    %c0_i32_0 = arith.constant 0 : i32
    %c0_i32_1 = arith.constant 0 : i32
    return %c0_i32, %c0_i32_0 : i32, i32
  }
  func.func @transform_4(%arg0: i32) -> (i32, i32) {
    %c0_i32 = arith.constant 0 : i32
    %c0_i32_0 = arith.constant 0 : i32
    %c0_i32_1 = arith.constant 0 : i32
    return %c0_i32, %c0_i32_0 : i32, i32
  }
  func.func @transform_5(%arg0: i32) -> (i32, i32) {
    %c0_i32 = arith.constant 0 : i32
    %c0_i32_0 = arith.constant 0 : i32
    %c0_i32_1 = arith.constant 0 : i32
    return %c0_i32, %c0_i32_0 : i32, i32
  }
  func.func @transform_6(%arg0: i32) -> (i32, i32) {
    %c0_i32 = arith.constant 0 : i32
    %c0_i32_0 = arith.constant 0 : i32
    %c0_i32_1 = arith.constant 0 : i32
    return %c0_i32, %c0_i32_0 : i32, i32
  }
}

</mosaic_0001>

<bundles_post_ra>
// kernel: tpu_custom_call.1
= control target key start
LH: loop header
LB: loop body
LE: loop exit
PB: predicated region body
PF: predicated region fallthrough
CT: control target
= control target key end

     0   :  { %11 = vsyncpa [#allocation6], 0  ;;  %s7272_s0 = inlined_call_operand.hbm [shape: f32[4,2382], index: 0, kind: input, shape index: {}]   ;;  %s7273_s1 = inlined_call_operand.hbm [shape: f32[16,36], index: 1, kind: input, shape index: {}]   ;;  %s7274_s2 = inlined_call_operand.vmem [shape: f32[8,72], index: 2, kind: input, shape index: {}]   ;;  %s7275_s3 = inlined_call_operand.vmem [shape: f32[16,3], index: 3, kind: input, shape index: {}]   ;;  %s7276_s4 = inlined_call_operand.vmem [shape: f32[8,3], index: 4, kind: input, shape index: {}]   ;;  %s7277_s5 = inlined_call_operand.vmem [shape: f32[1,2312], index: 5, kind: input, shape index: {}]   ;;  %s7278_s6 = inlined_call_operand.hbm [shape: f32[8,2312], index: 6, kind: output, shape index: {}]  }
   0x1   :  { %12 = vsyncpa [#allocation9], 0 }
   0x2   :  { %13 = vsyncpa [#allocation7], 0  ;;  %s19_s23 = sshll.u32 %s7272_s0, 4  ;;  %s4615_s24 = smov [#allocation5]   ;;  %s20_s23 = int_to_ptr.hbm [resolvable:$true] %s19_s23 }
   0x3   :  { %s21_s25 = sshll.u32 %s4615_s24, 4  ;;  %s29_s28 = sshll.u32 %s7273_s1, 4  ;;  %s22_s25 = int_to_ptr.vmem [resolvable:$true] %s21_s25  ;;  %s30_s28 = int_to_ptr.hbm [resolvable:$true] %s29_s28 }
   0x4   :  { %24 = dma.hbm_to_vmem [thread:$0]  %s20_s23, 1216, %s22_s25, [#allocation6]  }
   0x5   :  { %s4616_s29 = smov [#allocation8]   ;;  %s4617_s7 = smov 128  }
   0x6   :  { %s31_s30 = sshll.u32 %s4616_s29, 4  ;;  %s4618_s8 = smov 8   ;;  %s32_s30 = int_to_ptr.vmem [resolvable:$true] %s31_s30 }
   0x7   :  { %37 = dma.hbm_to_vmem [thread:$0]  %s30_s28, 256, %s32_s30, [#allocation9], %s4617_s7, %s4617_s7, %s4618_s8  }
   0x8   :  { %4609 = dma.done.wait [#allocation6], 1216  }
   0x9   :  { %4610 = vsyncadd [#allocation6], 4294966080 }
   0xa   :  { %4611 = dma.done.wait [#allocation9], 256  }
   0xb   :  { %4612 = vsyncadd [#allocation9], 4294967040  ;;  %v4674_v0 = vld [vmem:[#allocation5 + $0x18] sm:$0xff]  ;;  %v4676_v1 = vld [vmem:[#allocation5 + $0x10] sm:$0xff]  ;;  %s4619_s0 = smov 127   ;;  %s4620_s1 = smov 126  }
   0xc   :  { %83 = vst [vmem:[#allocation1 + $0x30] ss:$2 sm:$0xff] %v4674_v0  ;;  %v4679_v2 = vld [vmem:[#allocation5 + $0x8] sm:$0xff]  ;;  %v4682_v3 = vld [vmem:[#allocation5] sm:$0xff]  ;;  %v4686_v4 = vld [vmem:[#allocation5 + $0x38] sm:$0xff]  ;;  %vm239_vm0 = vcmask 1039360  }
   0xd   :  { %81 = vst [vmem:[#allocation1 + $0x20] ss:$2 sm:$0xff] %v4676_v1  ;;  %v4689_v7 = vld [vmem:[#allocation5 + $0x30] sm:$0xff]  ;;  %v4692_v11 = vld [vmem:[#allocation5 + $0x28] sm:$0xff]  ;;  %v4699_v23 = vld [vmem:[#allocation5 + $0x20] sm:$0xff]  ;;  %s4621_s9 = smov 94  }
   0xe   :  { %79 = vst [vmem:[#allocation1 + $0x10] ss:$2 sm:$0xff] %v4679_v2  ;;  %v66_v17 = vld [vmem:[#allocation5 + $0x48] sm:$0xf]  ;;  %v4707_v28 = vld [vmem:[#allocation5 + $0x40] sm:$0xff]  ;;  %s4622_s10 = smov 93  }
   0xf   :  { %77 = vst [vmem:[#allocation1] ss:$2 sm:$0xff] %v4682_v3  ;;  %v157_v49 = vld [vmem:[#allocation5 + $0x48] sm:$0xf]  ;;  %vm387_vm1 = vcmask 1031168   ;;  %vm146_vm2 = vcmask 60416  }
  0x10   :  { %vm295_vm3 = vcmask 64516   ;;  %s4623_s11 = smov 92   ;;  %vm535_vm4 = vcmask 769024   ;;  %s4624_s12 = smov 58   ;;  %vm682_vm5 = vcmask 760832   ;;  %vm830_vm6 = vcmask 752640  }
  0x11   :  { %s4625_s13 = smov 59   ;;  %s4626_s14 = smov 60   ;;  %vm1272_vm7 = vcmask 474112   ;;  %vm977_vm8 = vcmask 490496   ;;  %vm1445_vm9 = vcmask 1043456   ;;  %vm1125_vm10 = vcmask 482304  }
  0x12   :  { %vm1438_vm11 = vcmask 293888   ;;  %vm2036_vm12 = vcmask 64512  }
  0x13   :  { %v90_v5 = vld.sshfl [vmem:[#allocation1 + $0x30] sm:$0xff pattern:$0x75316420]  ;;  %v91_v6 = vld.sshfl [vmem:[#allocation1 + $0x38] sm:$0xff pattern:$0x75316420] }
  0x14   :  { %95 = vst [vmem:[#allocation1 + $0x30] ss:$2 sm:$0xff] %v4686_v4  ;;  %v88_v8 = vld.sshfl [vmem:[#allocation1 + $0x20] sm:$0xff pattern:$0x75316420] }
  0x15   :  { %134 = vst [vmem:[#allocation2 + $0x30] sm:$0xf] %v90_v5  ;;  %v89_v9 = vld.sshfl [vmem:[#allocation1 + $0x28] sm:$0xff pattern:$0x75316420] }
  0x16   :  { %135 = vst [vmem:[#allocation2 + $0x38] sm:$0xf] %v91_v6  ;;  %v86_v10 = vld.sshfl [vmem:[#allocation1 + $0x10] sm:$0xff pattern:$0x75316420] }
  0x17   :  { %94 = vst [vmem:[#allocation1 + $0x20] ss:$2 sm:$0xff] %v4689_v7  ;;  %v87_v12 = vld.sshfl [vmem:[#allocation1 + $0x18] sm:$0xff pattern:$0x75316420] }
  0x18   :  { %132 = vst [vmem:[#allocation2 + $0x20] sm:$0xf] %v88_v8  ;;  %v84_v22 = vld.sshfl [vmem:[#allocation1] sm:$0xff pattern:$0x75316420] }
  0x19   :  { %133 = vst [vmem:[#allocation2 + $0x28] sm:$0xf] %v89_v9  ;;  %v85_v24 = vld.sshfl [vmem:[#allocation1 + $0x8] sm:$0xff pattern:$0x75316420] }
  0x1a   :  { %93 = vst [vmem:[#allocation1 + $0x10] ss:$2 sm:$0xff] %v4692_v11  ;;  %v306_v8 = vld [vmem:[#allocation5 + $0x48] sm:$0xf] }
  0x1b   :  { %v102_v13 = vld.sshfl [vmem:[#allocation1 + $0x30] sm:$0xff pattern:$0x75316420]  ;;  %v103_v14 = vld.sshfl [vmem:[#allocation1 + $0x38] sm:$0xff pattern:$0x75316420] }
  0x1c   :  { %175 = vst [vmem:[#allocation1 + $0x31] ss:$2 sm:$0xff] %v4674_v0 }
  0x1d   :  { %142 = vst [vmem:[#allocation2 + $0x70] sm:$0xf] %v102_v13 }
  0x1e   :  { %143 = vst [vmem:[#allocation2 + $0x78] sm:$0xf] %v103_v14  ;;  %v100_v15 = vld.sshfl [vmem:[#allocation1 + $0x20] sm:$0xff pattern:$0x75316420] }
  0x1f   :  { %v101_v16 = vld.sshfl [vmem:[#allocation1 + $0x28] sm:$0xff pattern:$0x75316420]  ;;  %140 = vst [vmem:[#allocation2 + $0x60] sm:$0xf] %v100_v15 }
  0x20   :  { %173 = vst [vmem:[#allocation1 + $0x21] ss:$2 sm:$0xff] %v4676_v1 }
  0x21   :  { %141 = vst [vmem:[#allocation2 + $0x68] sm:$0xf] %v101_v16  ;;  %v98_v18 = vld.sshfl [vmem:[#allocation1 + $0x10] sm:$0xff pattern:$0x75316420] }
  0x22   :  { %v99_v19 = vld.sshfl [vmem:[#allocation1 + $0x18] sm:$0xff pattern:$0x75316420]  ;;  %130 = vst [vmem:[#allocation2 + $0x10] sm:$0xf] %v86_v10 }
  0x23   :  { %v183_v20 = vld.sshfl [vmem:[#allocation1 + $0x38] sm:$0xff pattern:$0x75316420]  ;;  %v182_v21 = vld.sshfl [vmem:[#allocation1 + $0x30] sm:$0xff pattern:$0x75316420] }
  0x24   :  { %215 = vrot.lane.b32.xlu1 %v183_v20, %s4619_s0  ;;  %213 = vrot.lane.b32.xlu0 %v182_v21, %s4619_s0  ;;  %105 = vst [vmem:[#allocation1 + $0x10] ss:$2 sm:$0xff] %v66_v17 }
  0x25   :  { %131 = vst [vmem:[#allocation2 + $0x18] sm:$0xf] %v87_v12 }
  0x26   :  { %138 = vst [vmem:[#allocation2 + $0x50] sm:$0xf] %v98_v18 }
  0x27   :  { %v180_v25 = vld.sshfl [vmem:[#allocation1 + $0x20] sm:$0xff pattern:$0x75316420]  ;;  %139 = vst [vmem:[#allocation2 + $0x58] sm:$0xf] %v99_v19 }
  0x28   :  { %209 = vrot.lane.b32.xlu2 %v180_v25, %s4619_s0  ;;  %92 = vst [vmem:[#allocation1] ss:$2 sm:$0xff] %v4699_v23  ;;  %v181_v27 = vld.sshfl [vmem:[#allocation1 + $0x28] sm:$0xff pattern:$0x75316420] }
  0x29   :  { %128 = vst [vmem:[#allocation2] sm:$0xf] %v84_v22 }
  0x2a   :  { %129 = vst [vmem:[#allocation2 + $0x8] sm:$0xf] %v85_v24 }
  0x2b   :  { %v4703_v26 = vld.sshfl [vmem:[#allocation1 + $0x10] sm:$0xff pattern:$0x75316420]  ;;  %187 = vst [vmem:[#allocation1 + $0x31] ss:$2 sm:$0xff] %v4686_v4 }
  0x2c   :  { %171 = vst [vmem:[#allocation1 + $0x11] ss:$2 sm:$0xff] %v4679_v2 }
  0x2d   :  { %186 = vst [vmem:[#allocation1 + $0x21] ss:$2 sm:$0xff] %v4689_v7 }
  0x2e   :  { %147 = vst.msk [vmem:[#allocation2 + $0x90] sm:$0xf] %vm146_vm2, %v4703_v26 }
  0x2f   :  { %v96_v29 = vld.sshfl [vmem:[#allocation1] sm:$0xff pattern:$0x75316420]  ;;  %v97_v30 = vld.sshfl [vmem:[#allocation1 + $0x8] sm:$0xff pattern:$0x75316420] }
  0x30   :  { %211 = vrot.lane.b32.xlu2 %v181_v27, %s4619_s0  ;;  %104 = vst [vmem:[#allocation1] ss:$2 sm:$0xff] %v4707_v28 }
  0x31   :  { %136 = vst [vmem:[#allocation2 + $0x40] sm:$0xf] %v96_v29 }
  0x32   :  { %137 = vst [vmem:[#allocation2 + $0x48] sm:$0xf] %v97_v30  ;;  %v194_v32 = vld.sshfl [vmem:[#allocation1 + $0x30] sm:$0xff pattern:$0x75316420] }
  0x33   :  { %v178_v31 = vld.sshfl [vmem:[#allocation1 + $0x10] sm:$0xff pattern:$0x75316420]  ;;  %v179_v33 = vld.sshfl [vmem:[#allocation1 + $0x18] sm:$0xff pattern:$0x75316420] }
  0x34   :  { %205 = vrot.lane.b32.xlu1 %v178_v31, %s4619_s0  ;;  %185 = vst [vmem:[#allocation1 + $0x11] ss:$2 sm:$0xff] %v4692_v11  ;;  %v195_v34 = vld.sshfl [vmem:[#allocation1 + $0x38] sm:$0xff pattern:$0x75316420] }
  0x35   :  { %323 = vst [vmem:[#allocation1 + $0x30] ss:$2 sm:$0xff] %v4674_v0  ;;  %v193_v37 = vld.sshfl [vmem:[#allocation1 + $0x28] sm:$0xff pattern:$0x75316420] }
  0x36   :  { %v192_v38 = vld.sshfl [vmem:[#allocation1 + $0x20] sm:$0xff pattern:$0x75316420] }
  0x37   :  { %v106_v35 = vld.sshfl [vmem:[#allocation1] sm:$0xff pattern:$0x75316420]  ;;  %v107_v36 = vld.sshfl [vmem:[#allocation1 + $0x8] sm:$0xff pattern:$0x75316420] }
  0x38   :  { %229 = vrot.lane.b32.xlu2 %v194_v32, %s4619_s0  ;;  %169 = vst [vmem:[#allocation1 + $0x1] ss:$2 sm:$0xff] %v4682_v3 }
  0x39   :  { %144 = vst [vmem:[#allocation2 + $0x80] sm:$0xf] %v106_v35 }
  0x3a   :  { %145 = vst [vmem:[#allocation2 + $0x88] sm:$0xf] %v107_v36 }
  0x3b   :  { %321 = vst [vmem:[#allocation1 + $0x20] ss:$2 sm:$0xff] %v4676_v1  ;;  %v190_v43 = vld.sshfl [vmem:[#allocation1 + $0x10] sm:$0xff pattern:$0x75316420] }
  0x3c   :  { %207 = vrot.lane.b32.xlu1 %v179_v33, %s4619_s0  ;;  %v330_v44 = vld.sshfl [vmem:[#allocation1 + $0x30] sm:$0xff pattern:$0x75316420]  ;;  %v191_v46 = vld.sshfl [vmem:[#allocation1 + $0x18] sm:$0xff pattern:$0x75316420] }
  0x3d   :  { %v331_v48 = vld.sshfl [vmem:[#allocation1 + $0x38] sm:$0xff pattern:$0x75316420]  ;;  %197 = vst [vmem:[#allocation1 + $0x11] ss:$2 sm:$0xff] %v157_v49 }
  0x3e   :  { %335 = vst [vmem:[#allocation1 + $0x30] ss:$2 sm:$0xff] %v4686_v4 }
  0x3f   :  { %v176_v39 = vld.sshfl [vmem:[#allocation1] sm:$0xff pattern:$0x75316420]  ;;  %v177_v40 = vld.sshfl [vmem:[#allocation1 + $0x8] sm:$0xff pattern:$0x75316420] }
  0x40   :  { %201 = vrot.lane.b32.xlu0 %v176_v39, %s4619_s0  ;;  %184 = vst [vmem:[#allocation1 + $0x1] ss:$2 sm:$0xff] %v4699_v23  ;;  %v453_v39 = vld [vmem:[#allocation5 + $0x48] sm:$0xf] }
  0x42   :  { %v328_v41 = vld.sshfl [vmem:[#allocation1 + $0x20] sm:$0xff pattern:$0x75316420]  ;;  %v329_v42 = vld.sshfl [vmem:[#allocation1 + $0x28] sm:$0xff pattern:$0x75316420] }
  0x43   :  { %334 = vst [vmem:[#allocation1 + $0x20] ss:$2 sm:$0xff] %v4689_v7 }
  0x44   :  { %227 = vrot.lane.b32.xlu1 %v193_v37, %s4619_s0  ;;  %v200_v52 = vld.sshfl [vmem:[#allocation1 + $0x10] sm:$0xff pattern:$0x75316420] }
  0x45   :  { %319 = vst [vmem:[#allocation1 + $0x10] ss:$2 sm:$0xff] %v4679_v2  ;;  %v343_v61 = vld.sshfl [vmem:[#allocation1 + $0x38] sm:$0xff pattern:$0x75316420] }
  0x46   :  { %v342_v62 = vld.sshfl [vmem:[#allocation1 + $0x30] sm:$0xff pattern:$0x75316420] }
  0x47   :  { %v188_v45 = vld.sshfl [vmem:[#allocation1] sm:$0xff pattern:$0x75316420]  ;;  %v189_v47 = vld.sshfl [vmem:[#allocation1 + $0x8] sm:$0xff pattern:$0x75316420] }
  0x48   :  { %203 = vrot.lane.b32.xlu0 %v177_v40, %s4619_s0  ;;  %217 = vrot.lane.b32.xlu2 %v188_v45, %s4619_s0  ;;  %196 = vst [vmem:[#allocation1 + $0x1] ss:$2 sm:$0xff] %v4707_v28 }
  0x49   :  { %471 = vst [vmem:[#allocation1 + $0x31] ss:$2 sm:$0xff] %v4674_v0 }
  0x4a   :  { %v341_v59 = vld.sshfl [vmem:[#allocation1 + $0x28] sm:$0xff pattern:$0x75316420]  ;;  %v340_v60 = vld.sshfl [vmem:[#allocation1 + $0x20] sm:$0xff pattern:$0x75316420] }
  0x4b   :  { %469 = vst [vmem:[#allocation1 + $0x21] ss:$2 sm:$0xff] %v4676_v1 }
  0x4c   :  { %221 = vrot.lane.b32.xlu1 %v190_v43, %s4619_s0  ;;  %v326_v55 = vld.sshfl [vmem:[#allocation1 + $0x10] sm:$0xff pattern:$0x75316420]  ;;  %v327_v56 = vld.sshfl [vmem:[#allocation1 + $0x18] sm:$0xff pattern:$0x75316420] }
  0x4d   :  { %333 = vst [vmem:[#allocation1 + $0x10] ss:$2 sm:$0xff] %v4692_v11 }
  0x4f   :  { %v198_v50 = vld.sshfl [vmem:[#allocation1] sm:$0xff pattern:$0x75316420]  ;;  %v199_v51 = vld.sshfl [vmem:[#allocation1 + $0x8] sm:$0xff pattern:$0x75316420] }
  0x50   :  { %225 = vrot.lane.b32.xlu0 %v192_v38, %s4619_s0  ;;  %223 = vrot.lane.b32.xlu2 %v191_v46, %s4619_s0  ;;  %317 = vst [vmem:[#allocation1] ss:$2 sm:$0xff] %v4682_v3  ;;  %v478_v19 = vld.sshfl [vmem:[#allocation1 + $0x30] sm:$0xff pattern:$0x75316420] }
  0x51   :  { %v479_v20 = vld.sshfl [vmem:[#allocation1 + $0x38] sm:$0xff pattern:$0x75316420] }
  0x52   :  { %v477_v16 = vld.sshfl [vmem:[#allocation1 + $0x28] sm:$0xff pattern:$0x75316420]  ;;  %v476_v18 = vld.sshfl [vmem:[#allocation1 + $0x20] sm:$0xff pattern:$0x75316420] }
  0x53   :  { %482 = vst [vmem:[#allocation1 + $0x21] ss:$2 sm:$0xff] %v4689_v7 }
  0x54   :  { %361 = vrot.lane.b32.xlu1 %v330_v44, %s4620_s1  ;;  %v338_v63 = vld.sshfl [vmem:[#allocation1 + $0x10] sm:$0xff pattern:$0x75316420]  ;;  %v339_v5 = vld.sshfl [vmem:[#allocation1 + $0x18] sm:$0xff pattern:$0x75316420] }
  0x55   :  { %345 = vst [vmem:[#allocation1 + $0x10] ss:$2 sm:$0xff] %v306_v8 }
  0x56   :  { %483 = vst [vmem:[#allocation1 + $0x31] ss:$2 sm:$0xff] %v4686_v4 }
  0x57   :  { %v324_v53 = vld.sshfl [vmem:[#allocation1] sm:$0xff pattern:$0x75316420]  ;;  %v325_v54 = vld.sshfl [vmem:[#allocation1 + $0x8] sm:$0xff pattern:$0x75316420] }
  0x58   :  { %231 = vrot.lane.b32.xlu0 %v195_v34, %s4619_s0  ;;  %357 = vrot.lane.b32.xlu2 %v328_v41, %s4620_s1  ;;  %332 = vst [vmem:[#allocation1] ss:$2 sm:$0xff] %v4699_v23 }
  0x5a   :  { %v488_v33 = vld.sshfl [vmem:[#allocation1 + $0x20] sm:$0xff pattern:$0x75316420]  ;;  %v4780_v34 = vld.sshfl [vmem:[#allocation1 + $0x28] sm:$0xff pattern:$0x75316420] }
  0x5b   :  { %616 = vst [vmem:[#allocation1 + $0x20] ss:$2 sm:$0xff] %v4676_v1 }
  0x5c   :  { %233 = vrot.lane.b32.xlu1 %v198_v50, %s4619_s0  ;;  %v348_v10 = vld.sshfl [vmem:[#allocation1 + $0x10] sm:$0xff pattern:$0x75316420] }
  0x5d   :  { %467 = vst [vmem:[#allocation1 + $0x11] ss:$2 sm:$0xff] %v4679_v2  ;;  %v491_v37 = vld.sshfl [vmem:[#allocation1 + $0x38] sm:$0xff pattern:$0x75316420] }
  0x5e   :  { %v490_v38 = vld.sshfl [vmem:[#allocation1 + $0x30] sm:$0xff pattern:$0x75316420] }
  0x5f   :  { %v337_v57 = vld.sshfl [vmem:[#allocation1 + $0x8] sm:$0xff pattern:$0x75316420]  ;;  %v336_v58 = vld.sshfl [vmem:[#allocation1] sm:$0xff pattern:$0x75316420] }
  0x60   :  { %219 = vrot.lane.b32.xlu0 %v189_v47, %s4619_s0  ;;  %363 = vrot.lane.b32.xlu2 %v331_v48, %s4620_s1  ;;  %344 = vst [vmem:[#allocation1] ss:$2 sm:$0xff] %v4707_v28 }
  0x61   :  { %618 = vst [vmem:[#allocation1 + $0x30] ss:$2 sm:$0xff] %v4674_v0 }
  0x64   :  { %349 = vrot.lane.b32.xlu1 %v324_v53, %s4620_s1  ;;  %v474_v14 = vld.sshfl [vmem:[#allocation1 + $0x10] sm:$0xff pattern:$0x75316420]  ;;  %v475_v15 = vld.sshfl [vmem:[#allocation1 + $0x18] sm:$0xff pattern:$0x75316420] }
  0x65   :  { %481 = vst [vmem:[#allocation1 + $0x11] ss:$2 sm:$0xff] %v4692_v11 }
  0x67   :  { %v346_v6 = vld.sshfl [vmem:[#allocation1] sm:$0xff pattern:$0x75316420]  ;;  %v347_v9 = vld.sshfl [vmem:[#allocation1 + $0x8] sm:$0xff pattern:$0x75316420] }
  0x68   :  { %359 = vrot.lane.b32.xlu0 %v329_v42, %s4620_s1  ;;  %235 = vrot.lane.b32.xlu2 %v199_v51, %s4619_s0  ;;  %465 = vst [vmem:[#allocation1 + $0x1] ss:$2 sm:$0xff] %v4682_v3 }
  0x6c   :  { %355 = vrot.lane.b32.xlu1 %v327_v56, %s4620_s1  ;;  %v486_v35 = vld.sshfl [vmem:[#allocation1 + $0x10] sm:$0xff pattern:$0x75316420]  ;;  %v487_v36 = vld.sshfl [vmem:[#allocation1 + $0x18] sm:$0xff pattern:$0x75316420] }
  0x6d   :  { %493 = vst [vmem:[#allocation1 + $0x11] ss:$2 sm:$0xff] %v453_v39  ;;  %v623_v56 = vld.sshfl [vmem:[#allocation1 + $0x20] sm:$0xff pattern:$0x75316420] }
  0x6f   :  { %v472_v12 = vld.sshfl [vmem:[#allocation1] sm:$0xff pattern:$0x75316420]  ;;  %v473_v13 = vld.sshfl [vmem:[#allocation1 + $0x8] sm:$0xff pattern:$0x75316420] }
  0x70   :  { %237 = vrot.lane.b32.xlu0 %v200_v52, %s4619_s0  ;;  %351 = vrot.lane.b32.xlu2 %v325_v54, %s4620_s1  ;;  %480 = vst [vmem:[#allocation1 + $0x1] ss:$2 sm:$0xff] %v4699_v23 }
  0x74   :  { %367 = vrot.lane.b32.xlu1 %v337_v57, %s4620_s1  ;;  %v496_v45 = vld.sshfl [vmem:[#allocation1 + $0x10] sm:$0xff pattern:$0x75316420] }
  0x75   :  { %614 = vst [vmem:[#allocation1 + $0x10] ss:$2 sm:$0xff] %v4679_v2 }
  0x77   :  { %v485_v24 = vld.sshfl [vmem:[#allocation1 + $0x8] sm:$0xff pattern:$0x75316420]  ;;  %v484_v25 = vld.sshfl [vmem:[#allocation1] sm:$0xff pattern:$0x75316420] }
  0x78   :  { %353 = vrot.lane.b32.xlu0 %v326_v55, %s4620_s1  ;;  %369 = vrot.lane.b32.xlu2 %v338_v63, %s4620_s1  ;;  %492 = vst [vmem:[#allocation1 + $0x1] ss:$2 sm:$0xff] %v4707_v28  ;;  %v4809_v55 = vld.sshfl [vmem:[#allocation1 + $0x28] sm:$0xff pattern:$0x75316420] }
  0x79   :  { %629 = vst [vmem:[#allocation1 + $0x20] ss:$2 sm:$0xff] %v4689_v7 }
  0x7c   :  { %373 = vrot.lane.b32.xlu1 %v340_v60, %s4620_s1 }
  0x7f   :  { %v495_v43 = vld.sshfl [vmem:[#allocation1 + $0x8] sm:$0xff pattern:$0x75316420]  ;;  %v4791_v44 = vld.sshfl [vmem:[#allocation1] sm:$0xff pattern:$0x75316420] }
  0x80   :  { %365 = vrot.lane.b32.xlu0 %v336_v58, %s4620_s1  ;;  %375 = vrot.lane.b32.xlu2 %v341_v59, %s4620_s1  ;;  %612 = vst [vmem:[#allocation1] ss:$2 sm:$0xff] %v4682_v3  ;;  %v621_v58 = vld.sshfl [vmem:[#allocation1 + $0x10] sm:$0xff pattern:$0x75316420] }
  0x81   :  { %v4814_v59 = vld.sshfl [vmem:[#allocation1 + $0x18] sm:$0xff pattern:$0x75316420] }
  0x82   :  { %v4758_v17 = vpop.permute.xlu2 %209  ;;  %628 = vst [vmem:[#allocation1 + $0x10] ss:$2 sm:$0xff] %v4692_v11 }
  0x84   :  { %379 = vrot.lane.b32.xlu1 %v343_v61, %s4620_s1 }
  0x87   :  { %v620_v48 = vld.sshfl [vmem:[#allocation1 + $0x8] sm:$0xff pattern:$0x75316420]  ;;  %v4798_v49 = vld.sshfl [vmem:[#allocation1] sm:$0xff pattern:$0x75316420] }
  0x88   :  { %371 = vrot.lane.b32.xlu0 %v339_v5, %s4620_s1  ;;  %381 = vrot.lane.b32.xlu2 %v346_v6, %s4620_s1  ;;  %627 = vst [vmem:[#allocation1] ss:$2 sm:$0xff] %v4699_v23 }
  0x8a   :  { %v212_v21 = vpop.permute.xlu2 %211 }
  0x8b   :  { %v244_v22 = vsel %vm239_vm0, %v4758_v17, %v212_v21 }
  0x8c   :  { %385 = vrot.lane.b32.xlu1 %v348_v10, %s4620_s1  ;;  %281 = vst [vmem:[#allocation2 + $0x20] sm:$0xf0] %v244_v22  ;;  %v626_v10 = vld.sshfl [vmem:[#allocation1 + $0x38] sm:$0xff pattern:$0x75316420] }
  0x8d   :  { %v634_v22 = vld.sshfl [vmem:[#allocation1 + $0x18] sm:$0xff pattern:$0x75316420] }
  0x8f   :  { %v4818_v60 = vld.sshfl [vmem:[#allocation1] sm:$0xff pattern:$0x75316420]  ;;  %v4821_v61 = vld.sshfl [vmem:[#allocation1 + $0x8] sm:$0xff pattern:$0x75316420] }
  0x90   :  { %377 = vrot.lane.b32.xlu0 %v342_v62, %s4620_s1  ;;  %497 = vrot.lane.b32.xlu2 %v472_v12, %s4621_s9  ;;  %639 = vst [vmem:[#allocation1] ss:$2 sm:$0xff] %v4707_v28  ;;  %v4830_v12 = vld.sshfl [vmem:[#allocation1 + $0x30] sm:$0xff pattern:$0x75316420] }
  0x91   :  { %630 = vst [vmem:[#allocation1 + $0x30] ss:$2 sm:$0xff] %v4686_v4 }
  0x92   :  { %v4777_v32 = vpop.permute.xlu2 %229 }
  0x94   :  { %501 = vrot.lane.b32.xlu1 %v474_v14, %s4621_s9 }
  0x96   :  { %v216_v27 = vpop.permute.xlu1 %215  ;;  %v214_v29 = vpop.permute.xlu0 %213 }
  0x97   :  { %v245_v30 = vsel %vm239_vm0, %v212_v21, %v214_v29  ;;  %v246_v31 = vsel %vm239_vm0, %v214_v29, %v216_v27  ;;  %v4838_v14 = vld.sshfl [vmem:[#allocation1] sm:$0xff pattern:$0x75316420]  ;;  %v633_v21 = vld.sshfl [vmem:[#allocation1 + $0x10] sm:$0xff pattern:$0x75316420] }
  0x98   :  { %282 = vst [vmem:[#allocation2 + $0x28] sm:$0xf0] %v245_v30  ;;  %383 = vrot.lane.b32.xlu0 %v347_v9, %s4620_s1  ;;  %503 = vrot.lane.b32.xlu2 %v475_v15, %s4621_s9 }
  0x99   :  { %283 = vst [vmem:[#allocation2 + $0x30] sm:$0xf0] %v246_v31 }
  0x9c   :  { %507 = vrot.lane.b32.xlu1 %v477_v16, %s4621_s9 }
  0xa0   :  { %499 = vrot.lane.b32.xlu0 %v473_v13, %s4621_s9  ;;  %509 = vrot.lane.b32.xlu2 %v478_v19, %s4621_s9  ;;  %v4836_v13 = vld.sshfl [vmem:[#allocation1 + $0x8] sm:$0xff pattern:$0x75316420] }
  0xa1   :  { %760 = vst [vmem:[#allocation1 + $0x1] ss:$2 sm:$0xff] %v4682_v3 }
  0xa2   :  { %v4786_v40 = vpop.permute.xlu2 %217 }
  0xa3   :  { %v247_v41 = vsel %vm239_vm0, %v216_v27, %v4786_v40 }
  0xa4   :  { %513 = vrot.lane.b32.xlu1 %v484_v25, %s4621_s9  ;;  %284 = vst [vmem:[#allocation2 + $0x38] sm:$0xf0] %v247_v41 }
  0xa6   :  { %v206_v42 = vpop.permute.xlu1 %205 }
  0xa8   :  { %505 = vrot.lane.b32.xlu0 %v476_v18, %s4621_s9  ;;  %515 = vrot.lane.b32.xlu2 %v485_v24, %s4621_s9  ;;  %v601_v24 = vld [vmem:[#allocation5 + $0x48] sm:$0xf]  ;;  %v4853_v25 = vld.sshfl [vmem:[#allocation1 + $0x8] sm:$0xff pattern:$0x75316420] }
  0xa9   :  { %640 = vst [vmem:[#allocation1 + $0x10] ss:$2 sm:$0xff] %v601_v24  ;;  %v4857_v30 = vld.sshfl [vmem:[#allocation1] sm:$0xff pattern:$0x75316420] }
  0xaa   :  { %v224_v46 = vpop.permute.xlu2 %223  ;;  %775 = vst [vmem:[#allocation1 + $0x1] ss:$2 sm:$0xff] %v4699_v23 }
  0xac   :  { %519 = vrot.lane.b32.xlu1 %v487_v36, %s4621_s9 }
  0xae   :  { %v208_v47 = vpop.permute.xlu1 %207 }
  0xaf   :  { %v242_v50 = vsel %vm239_vm0, %v206_v42, %v208_v47  ;;  %v243_v51 = vsel %vm239_vm0, %v208_v47, %v4758_v17 }
  0xb0   :  { %279 = vst [vmem:[#allocation2 + $0x10] sm:$0xf0] %v242_v50  ;;  %511 = vrot.lane.b32.xlu0 %v479_v20, %s4621_s9  ;;  %521 = vrot.lane.b32.xlu2 %v488_v33, %s4621_s9  ;;  %v636_v33 = vld.sshfl [vmem:[#allocation1 + $0x28] sm:$0xff pattern:$0x75316420] }
  0xb1   :  { %280 = vst [vmem:[#allocation2 + $0x18] sm:$0xf0] %v243_v51 }
  0xb2   :  { %v202_v52 = vpop.permute.xlu0 %201  ;;  %v4806_v53 = vpop.permute.xlu2 %357 }
  0xb4   :  { %525 = vrot.lane.b32.xlu1 %v490_v38, %s4621_s9 }
  0xb6   :  { %v228_v54 = vpop.permute.xlu1 %227 }
  0xb7   :  { %v253_v57 = vsel %vm239_vm0, %v228_v54, %v4777_v32 }
  0xb8   :  { %290 = vst [vmem:[#allocation2 + $0x68] sm:$0xf0] %v253_v57  ;;  %517 = vrot.lane.b32.xlu0 %v486_v35, %s4621_s9  ;;  %527 = vrot.lane.b32.xlu2 %v491_v37, %s4621_s9 }
  0xba   :  { %v204_v62 = vpop.permute.xlu0 %203  ;;  %v4823_v63 = vpop.permute.xlu2 %363 }
  0xbb   :  { %v240_v5 = vsel %vm239_vm0, %v202_v52, %v204_v62  ;;  %v241_v6 = vsel %vm239_vm0, %v204_v62, %v206_v42  ;;  %v637_v42 = vld.sshfl [vmem:[#allocation1 + $0x30] sm:$0xff pattern:$0x75316420] }
  0xbc   :  { %531 = vrot.lane.b32.xlu1 %v495_v43, %s4621_s9  ;;  %277 = vst [vmem:[#allocation2] sm:$0xf0] %v240_v5  ;;  %v4882_v43 = vld.sshfl [vmem:[#allocation1 + $0x8] sm:$0xff pattern:$0x75316420] }
  0xbd   :  { %278 = vst [vmem:[#allocation2 + $0x8] sm:$0xf0] %v241_v6 }
  0xbe   :  { %v222_v8 = vpop.permute.xlu1 %221 }
  0xbf   :  { %v250_v9 = vsel %vm239_vm0, %v222_v8, %v224_v46 }
  0xc0   :  { %287 = vst [vmem:[#allocation2 + $0x50] sm:$0xf0] %v250_v9  ;;  %523 = vrot.lane.b32.xlu0 %v4780_v34, %s4621_s9  ;;  %533 = vrot.lane.b32.xlu2 %v496_v45, %s4621_s9  ;;  %v4863_v34 = vld.sshfl [vmem:[#allocation1 + $0x20] sm:$0xff pattern:$0x75316420] }
  0xc1   :  { %764 = vst [vmem:[#allocation1 + $0x21] ss:$2 sm:$0xff] %v4676_v1 }
  0xc2   :  { %v226_v15 = vpop.permute.xlu0 %225  ;;  %v4840_v16 = vpop.permute.xlu2 %235 }
  0xc3   :  { %v251_v17 = vsel %vm239_vm0, %v224_v46, %v226_v15  ;;  %v252_v18 = vsel %vm239_vm0, %v226_v15, %v228_v54  ;;  %v4886_v46 = vld.sshfl [vmem:[#allocation1 + $0x38] sm:$0xff pattern:$0x75316420] }
  0xc4   :  { %646 = vrot.lane.b32.xlu1 %v620_v48, %s4622_s10  ;;  %288 = vst [vmem:[#allocation2 + $0x58] sm:$0xf0] %v251_v17 }
  0xc5   :  { %289 = vst [vmem:[#allocation2 + $0x60] sm:$0xf0] %v252_v18 }
  0xc6   :  { %v362_v19 = vpop.permute.xlu1 %361  ;;  %766 = vst [vmem:[#allocation1 + $0x31] ss:$2 sm:$0xff] %v4674_v0 }
  0xc7   :  { %v394_v20 = vsel %vm387_vm1, %v362_v19, %v4823_v63 }
  0xc8   :  { %431 = vst [vmem:[#allocation2 + $0xc8] sm:$0xf] %v394_v20  ;;  %529 = vrot.lane.b32.xlu0 %v4791_v44, %s4621_s9  ;;  %648 = vrot.lane.b32.xlu2 %v621_v58, %s4622_s10  ;;  %v4884_v44 = vld.sshfl [vmem:[#allocation1] sm:$0xff pattern:$0x75316420] }
  0xc9   :  { %787 = vst [vmem:[#allocation1 + $0x1] ss:$2 sm:$0xff] %v4707_v28  ;;  %v4942_v17 = vld.sshfl [vmem:[#allocation1 + $0x28] sm:$0xff pattern:$0x75316420] }
  0xca   :  { %v232_v27 = vpop.permute.xlu0 %231  ;;  %v4855_v29 = vpop.permute.xlu2 %351 }
  0xcb   :  { %v254_v31 = vsel %vm239_vm0, %v4777_v32, %v232_v27  ;;  %v4873_v32 = vld.sshfl [vmem:[#allocation1 + $0x10] sm:$0xff pattern:$0x75316420] }
  0xcc   :  { %652 = vrot.lane.b32.xlu1 %v623_v56, %s4622_s10  ;;  %291 = vst [vmem:[#allocation2 + $0x70] sm:$0xf0] %v254_v31 }
  0xcd   :  { %762 = vst [vmem:[#allocation1 + $0x11] ss:$2 sm:$0xff] %v4679_v2 }
  0xce   :  { %v234_v26 = vpop.permute.xlu1 %233 }
  0xcf   :  { %v255_v35 = vsel %vm239_vm0, %v232_v27, %v234_v26  ;;  %v256_v36 = vsel %vm239_vm0, %v234_v26, %v4840_v16 }
  0xd0   :  { %292 = vst [vmem:[#allocation2 + $0x78] sm:$0xf0] %v255_v35  ;;  %644 = vrot.lane.b32.xlu0 %v4798_v49, %s4622_s10  ;;  %654 = vrot.lane.b32.xlu2 %v4809_v55, %s4622_s10  ;;  %v748_v55 = vld [vmem:[#allocation5 + $0x48] sm:$0xf] }
  0xd1   :  { %293 = vst [vmem:[#allocation2 + $0x80] sm:$0xf0] %v256_v36  ;;  %v4912_v56 = vld.sshfl [vmem:[#allocation1] sm:$0xff pattern:$0x75316420] }
  0xd2   :  { %v220_v37 = vpop.permute.xlu0 %219  ;;  %v4875_v38 = vpop.permute.xlu2 %369  ;;  %v4920_v62 = vld.sshfl [vmem:[#allocation1 + $0x8] sm:$0xff pattern:$0x75316420] }
  0xd3   :  { %v248_v39 = vsel %vm239_vm0, %v4786_v40, %v220_v37  ;;  %v249_v41 = vsel %vm239_vm0, %v220_v37, %v222_v8  ;;  %907 = vst [vmem:[#allocation1] ss:$2 sm:$0xff] %v4682_v3 }
  0xd4   :  { %658 = vrot.lane.b32.xlu1 %v626_v10, %s4622_s10  ;;  %285 = vst [vmem:[#allocation2 + $0x40] sm:$0xf0] %v248_v39  ;;  %v4896_v40 = vld.sshfl [vmem:[#allocation1 + $0x10] sm:$0xff pattern:$0x75316420] }
  0xd5   :  { %286 = vst [vmem:[#allocation2 + $0x48] sm:$0xf0] %v249_v41  ;;  %v4898_v48 = vld.sshfl [vmem:[#allocation1 + $0x18] sm:$0xff pattern:$0x75316420] }
  0xd6   :  { %v350_v45 = vpop.permute.xlu1 %349  ;;  %776 = vst [vmem:[#allocation1 + $0x11] ss:$2 sm:$0xff] %v4692_v11 }
  0xd7   :  { %v388_v47 = vsel %vm387_vm1, %v350_v45, %v4855_v29 }
  0xd8   :  { %425 = vst [vmem:[#allocation2 + $0x98] sm:$0xf] %v388_v47  ;;  %650 = vrot.lane.b32.xlu0 %v4814_v59, %s4622_s10  ;;  %660 = vrot.lane.b32.xlu2 %v4818_v60, %s4622_s10 }
  0xda   :  { %v360_v49 = vpop.permute.xlu0 %359  ;;  %v4900_v50 = vpop.permute.xlu2 %375  ;;  %v4949_v20 = vld.sshfl [vmem:[#allocation1 + $0x8] sm:$0xff pattern:$0x75316420] }
  0xdb   :  { %v392_v0 = vsel %vm387_vm1, %v4806_v53, %v360_v49  ;;  %v393_v51 = vsel %vm387_vm1, %v360_v49, %v362_v19  ;;  %v4947_v19 = vld.sshfl [vmem:[#allocation1] sm:$0xff pattern:$0x75316420] }
  0xdc   :  { %664 = vrot.lane.b32.xlu1 %v633_v21, %s4622_s10  ;;  %429 = vst [vmem:[#allocation2 + $0xb8] sm:$0xf] %v392_v0  ;;  %v773_v21 = vld.sshfl [vmem:[#allocation1 + $0x30] sm:$0xff pattern:$0x75316420] }
  0xdd   :  { %430 = vst [vmem:[#allocation2 + $0xc0] sm:$0xf] %v393_v51  ;;  %v4914_v57 = vld.sshfl [vmem:[#allocation1 + $0x10] sm:$0xff pattern:$0x75316420] }
  0xde   :  { %v356_v52 = vpop.permute.xlu1 %355  ;;  %v4916_v58 = vld.sshfl [vmem:[#allocation1 + $0x18] sm:$0xff pattern:$0x75316420]  ;;  %922 = vst [vmem:[#allocation1] ss:$2 sm:$0xff] %v4699_v23 }
  0xdf   :  { %v391_v54 = vsel %vm387_vm1, %v356_v52, %v4806_v53  ;;  %788 = vst [vmem:[#allocation1 + $0x11] ss:$2 sm:$0xff] %v748_v55 }
  0xe0   :  { %428 = vst [vmem:[#allocation2 + $0xb0] sm:$0xf] %v391_v54  ;;  %656 = vrot.lane.b32.xlu0 %v4830_v12, %s4622_s10  ;;  %666 = vrot.lane.b32.xlu2 %v634_v22, %s4622_s10 }
  0xe2   :  { %v238_v59 = vpop.permute.xlu0 %237  ;;  %v4918_v60 = vpop.permute.xlu2 %381 }
  0xe3   :  { %v257_v53 = vsel %vm239_vm0, %v4840_v16, %v238_v59  ;;  %296 = vst.msk [vmem:[#allocation2 + $0x90] sm:$0xf0] %vm295_vm3, %v238_v59  ;;  %v771_v16 = vld.sshfl [vmem:[#allocation1 + $0x20] sm:$0xff pattern:$0x75316420] }
  0xe4   :  { %670 = vrot.lane.b32.xlu1 %v636_v33, %s4622_s10  ;;  %294 = vst [vmem:[#allocation2 + $0x88] sm:$0xf0] %v257_v53 }
  0xe5   :  { %777 = vst [vmem:[#allocation1 + $0x21] ss:$2 sm:$0xff] %v4689_v7  ;;  %v4986_v37 = vld.sshfl [vmem:[#allocation1] sm:$0xff pattern:$0x75316420] }
  0xe6   :  { %v368_v5 = vpop.permute.xlu1 %367  ;;  %v4932_v8 = vld.sshfl [vmem:[#allocation1 + $0x10] sm:$0xff pattern:$0x75316420] }
  0xe7   :  { %v397_v6 = vsel %vm387_vm1, %v368_v5, %v4875_v38  ;;  %909 = vst [vmem:[#allocation1 + $0x10] ss:$2 sm:$0xff] %v4679_v2 }
  0xe8   :  { %434 = vst [vmem:[#allocation2 + $0xe0] sm:$0xf] %v397_v6  ;;  %662 = vrot.lane.b32.xlu0 %v4821_v61, %s4622_s10  ;;  %672 = vrot.lane.b32.xlu2 %v637_v42, %s4622_s10 }
  0xea   :  { %v354_v9 = vpop.permute.xlu0 %353  ;;  %v4934_v10 = vpop.permute.xlu2 %497 }
  0xeb   :  { %v389_v12 = vsel %vm387_vm1, %v4855_v29, %v354_v9  ;;  %v390_v15 = vsel %vm387_vm1, %v354_v9, %v356_v52  ;;  %v5036_v9 = vld [vmem:[#allocation5 + $0x38] sm:$0xff] }
  0xec   :  { %676 = vrot.lane.b32.xlu1 %v4838_v14, %s4622_s10  ;;  %426 = vst [vmem:[#allocation2 + $0xa0] sm:$0xf] %v389_v12  ;;  %v774_v14 = vld.sshfl [vmem:[#allocation1 + $0x38] sm:$0xff pattern:$0x75316420] }
  0xed   :  { %427 = vst [vmem:[#allocation2 + $0xa8] sm:$0xf] %v390_v15  ;;  %v4990_v41 = vld.sshfl [vmem:[#allocation1 + $0x28] sm:$0xff pattern:$0x75316420] }
  0xee   :  { %v374_v61 = vpop.permute.xlu1 %373  ;;  %v4955_v22 = vld.sshfl [vmem:[#allocation1 + $0x10] sm:$0xff pattern:$0x75316420]  ;;  %778 = vst [vmem:[#allocation1 + $0x31] ss:$2 sm:$0xff] %v4686_v4 }
  0xef   :  { %v400_v18 = vsel %vm387_vm1, %v374_v61, %v4900_v50  ;;  %v4960_v7 = vld.sshfl [vmem:[#allocation1 + $0x18] sm:$0xff pattern:$0x75316420]  ;;  %v783_v42 = vld.sshfl [vmem:[#allocation1 + $0x20] sm:$0xff pattern:$0x75316420] }
  0xf0   :  { %437 = vst [vmem:[#allocation2 + $0xf8] sm:$0xf] %v400_v18  ;;  %668 = vrot.lane.b32.xlu0 %v4863_v34, %s4622_s10  ;;  %678 = vrot.lane.b32.xlu2 %v4836_v13, %s4622_s10 }
  0xf1   :  { %923 = vst [vmem:[#allocation1 + $0x10] ss:$2 sm:$0xff] %v4692_v11 }
  0xf2   :  { %v366_v24 = vpop.permute.xlu0 %365  ;;  %v4958_v27 = vpop.permute.xlu2 %503  ;;  %911 = vst [vmem:[#allocation1 + $0x20] ss:$2 sm:$0xff] %v4676_v1 }
  0xf3   :  { %v395_v29 = vsel %vm387_vm1, %v4823_v63, %v366_v24  ;;  %v396_v31 = vsel %vm387_vm1, %v366_v24, %v368_v5  ;;  %v896_v63 = vld [vmem:[#allocation5 + $0x48] sm:$0xf] }
  0xf4   :  { %792 = vrot.lane.b32.xlu1 %v4857_v30, %s4623_s11  ;;  %432 = vst [vmem:[#allocation2 + $0xd0] sm:$0xf] %v395_v29  ;;  %v5066_v29 = vld [vmem:[#allocation5 + $0x30] sm:$0xff] }
  0xf5   :  { %433 = vst [vmem:[#allocation2 + $0xd8] sm:$0xf] %v396_v31  ;;  %v786_v0 = vld.sshfl [vmem:[#allocation1 + $0x38] sm:$0xff pattern:$0x75316420] }
  0xf6   :  { %v380_v4 = vpop.permute.xlu1 %379  ;;  %v5011_v51 = vld.sshfl [vmem:[#allocation1 + $0x30] sm:$0xff pattern:$0x75316420] }
  0xf7   :  { %v403_v13 = vsel %vm387_vm1, %v380_v4, %v4918_v60 }
  0xf8   :  { %440 = vst [vmem:[#allocation2 + $0x110] sm:$0xf] %v403_v13  ;;  %674 = vrot.lane.b32.xlu0 %v4886_v46, %s4622_s10  ;;  %794 = vrot.lane.b32.xlu2 %v4853_v25, %s4623_s11  ;;  %v4977_v30 = vld.sshfl [vmem:[#allocation1 + $0x10] sm:$0xff pattern:$0x75316420] }
  0xf9   :  { %v4979_v34 = vld.sshfl [vmem:[#allocation1 + $0x18] sm:$0xff pattern:$0x75316420]  ;;  %v4988_v25 = vld.sshfl [vmem:[#allocation1 + $0x8] sm:$0xff pattern:$0x75316420] }
  0xfa   :  { %v372_v26 = vpop.permute.xlu0 %371  ;;  %v4975_v33 = vpop.permute.xlu2 %509  ;;  %935 = vst [vmem:[#allocation1 + $0x10] ss:$2 sm:$0xff] %v896_v63  ;;  %v5062_v24 = vld.sshfl [vmem:[#allocation1 + $0x28] sm:$0xff pattern:$0x75316420] }
  0xfb   :  { %v398_v35 = vsel %vm387_vm1, %v4875_v38, %v372_v26  ;;  %v399_v36 = vsel %vm387_vm1, %v372_v26, %v374_v61  ;;  %934 = vst [vmem:[#allocation1] ss:$2 sm:$0xff] %v4707_v28  ;;  %v1043_v61 = vld [vmem:[#allocation5 + $0x48] sm:$0xf] }
  0xfc   :  { %798 = vrot.lane.b32.xlu1 %v4898_v48, %s4623_s11  ;;  %435 = vst [vmem:[#allocation2 + $0xe8] sm:$0xf] %v398_v35 }
  0xfd   :  { %436 = vst [vmem:[#allocation2 + $0xf0] sm:$0xf] %v399_v36 }
  0xfe   :  { %v386_v39 = vpop.permute.xlu1 %385 }
  0xff   :  { %443 = vst.msk [vmem:[#allocation2 + $0x128] sm:$0xf] %vm146_vm2, %v386_v39 }
 0x100   :  { %680 = vrot.lane.b32.xlu0 %v4873_v32, %s4622_s10  ;;  %800 = vrot.lane.b32.xlu2 %v771_v16, %s4623_s11  ;;  %v5007_v32 = vld [vmem:[#allocation5 + $0x18] sm:$0xff] }
 0x101   :  { %v5000_v46 = vld.sshfl [vmem:[#allocation1 + $0x10] sm:$0xff pattern:$0x75316420]  ;;  %913 = vst [vmem:[#allocation1 + $0x30] ss:$2 sm:$0xff] %v5007_v32 }
 0x102   :  { %v378_v38 = vpop.permute.xlu0 %377  ;;  %v4998_v45 = vpop.permute.xlu2 %515  ;;  %1057 = vst [vmem:[#allocation1 + $0x11] ss:$2 sm:$0xff] %v4679_v2  ;;  %v5019_v2 = vld.sshfl [vmem:[#allocation1 + $0x8] sm:$0xff pattern:$0x75316420] }
 0x103   :  { %v401_v47 = vsel %vm387_vm1, %v4900_v50, %v378_v38  ;;  %v402_v48 = vsel %vm387_vm1, %v378_v38, %v380_v4  ;;  %v5013_v50 = vld.sshfl [vmem:[#allocation1] sm:$0xff pattern:$0x75316420] }
 0x104   :  { %804 = vrot.lane.b32.xlu1 %v773_v21, %s4623_s11  ;;  %438 = vst [vmem:[#allocation2 + $0x100] sm:$0xf] %v401_v47 }
 0x105   :  { %439 = vst [vmem:[#allocation2 + $0x108] sm:$0xf] %v402_v48 }
 0x106   :  { %v502_v1 = vpop.permute.xlu1 %501  ;;  %1055 = vst [vmem:[#allocation1 + $0x1] ss:$2 sm:$0xff] %v4682_v3 }
 0x107   :  { %v538_v49 = vsel %vm535_vm4, %v502_v1, %v4958_v27 }
 0x108   :  { %575 = vst [vmem:[#allocation2 + $0xa8] sm:$0xf0] %v538_v49  ;;  %796 = vrot.lane.b32.xlu0 %v4896_v40, %s4623_s11  ;;  %806 = vrot.lane.b32.xlu2 %v774_v14, %s4623_s11  ;;  %v5038_v12 = vld.sshfl [vmem:[#allocation1 + $0x30] sm:$0xff pattern:$0x75316420] }
 0x109   :  { %v5024_v55 = vld.sshfl [vmem:[#allocation1 + $0x10] sm:$0xff pattern:$0x75316420]  ;;  %v5026_v59 = vld.sshfl [vmem:[#allocation1 + $0x18] sm:$0xff pattern:$0x75316420] }
 0x10a   :  { %v384_v52 = vpop.permute.xlu0 %383  ;;  %v5022_v54 = vpop.permute.xlu2 %521  ;;  %1071 = vst [vmem:[#allocation1 + $0x11] ss:$2 sm:$0xff] %v4692_v11 }
 0x10b   :  { %v404_v53 = vsel %vm387_vm1, %v4918_v60, %v384_v52  ;;  %v405_v40 = vsel %vm387_vm1, %v384_v52, %v386_v39 }
 0x10c   :  { %810 = vrot.lane.b32.xlu1 %v4882_v43, %s4623_s11  ;;  %441 = vst [vmem:[#allocation2 + $0x118] sm:$0xf] %v404_v53  ;;  %v5044_v43 = vld.sshfl [vmem:[#allocation1 + $0x38] sm:$0xff pattern:$0x75316420] }
 0x10d   :  { %442 = vst [vmem:[#allocation2 + $0x120] sm:$0xf] %v405_v40  ;;  %v5046_v11 = vld.sshfl [vmem:[#allocation1] sm:$0xff pattern:$0x75316420] }
 0x10e   :  { %v508_v5 = vpop.permute.xlu1 %507  ;;  %925 = vst [vmem:[#allocation1 + $0x30] ss:$2 sm:$0xff] %v5036_v9  ;;  %v5049_v60 = vld.sshfl [vmem:[#allocation1 + $0x8] sm:$0xff pattern:$0x75316420] }
 0x10f   :  { %v541_v6 = vsel %vm535_vm4, %v508_v5, %v4975_v33  ;;  %1070 = vst [vmem:[#allocation1 + $0x1] ss:$2 sm:$0xff] %v4699_v23 }
 0x110   :  { %578 = vst [vmem:[#allocation2 + $0xc0] sm:$0xf0] %v541_v6  ;;  %802 = vrot.lane.b32.xlu0 %v4942_v17, %s4623_s11  ;;  %812 = vrot.lane.b32.xlu2 %v4914_v57, %s4623_s11 }
 0x111   :  { %v5058_v57 = vld.sshfl [vmem:[#allocation1 + $0x10] sm:$0xff pattern:$0x75316420]  ;;  %v5060_v14 = vld.sshfl [vmem:[#allocation1 + $0x18] sm:$0xff pattern:$0x75316420] }
 0x112   :  { %v500_v15 = vpop.permute.xlu0 %499  ;;  %v5051_v16 = vpop.permute.xlu2 %527  ;;  %1083 = vst [vmem:[#allocation1 + $0x11] ss:$2 sm:$0xff] %v1043_v61 }
 0x113   :  { %v536_v17 = vsel %vm535_vm4, %v4934_v10, %v500_v15  ;;  %v537_v18 = vsel %vm535_vm4, %v500_v15, %v502_v1  ;;  %v5068_v10 = vld.sshfl [vmem:[#allocation1 + $0x20] sm:$0xff pattern:$0x75316420] }
 0x114   :  { %816 = vrot.lane.b32.xlu1 %v783_v42, %s4623_s11  ;;  %573 = vst [vmem:[#allocation2 + $0x98] sm:$0xf0] %v536_v17  ;;  %v1183_v42 = vld [vmem:[#allocation5 + $0x8] sm:$0xff] }
 0x115   :  { %574 = vst [vmem:[#allocation2 + $0xa0] sm:$0xf0] %v537_v18  ;;  %v5074_v31 = vld.sshfl [vmem:[#allocation1 + $0x30] sm:$0xff pattern:$0x75316420] }
 0x116   :  { %v514_v21 = vpop.permute.xlu1 %513  ;;  %v5076_v4 = vld.sshfl [vmem:[#allocation1 + $0x38] sm:$0xff pattern:$0x75316420]  ;;  %v5079_v26 = vld.sshfl [vmem:[#allocation1] sm:$0xff pattern:$0x75316420] }
 0x117   :  { %v544_v23 = vsel %vm535_vm4, %v514_v21, %v4998_v45  ;;  %1061 = vst [vmem:[#allocation1 + $0x31] ss:$2 sm:$0xff] %v5007_v32  ;;  %v5087_v36 = vld.sshfl [vmem:[#allocation1 + $0x8] sm:$0xff pattern:$0x75316420] }
 0x118   :  { %581 = vst [vmem:[#allocation2 + $0xd8] sm:$0xf0] %v544_v23  ;;  %808 = vrot.lane.b32.xlu0 %v4884_v44, %s4623_s11  ;;  %818 = vrot.lane.b32.xlu2 %v4990_v41, %s4623_s11 }
 0x119   :  { %924 = vst [vmem:[#allocation1 + $0x20] ss:$2 sm:$0xff] %v5066_v29  ;;  %v5089_v41 = vld.sshfl [vmem:[#allocation1 + $0x10] sm:$0xff pattern:$0x75316420] }
 0x11a   :  { %v506_v13 = vpop.permute.xlu0 %505  ;;  %v534_v63 = vpop.permute.xlu2 %533  ;;  %1082 = vst [vmem:[#allocation1 + $0x1] ss:$2 sm:$0xff] %v4707_v28 }
 0x11b   :  { %v539_v35 = vsel %vm535_vm4, %v4958_v27, %v506_v13  ;;  %v540_v44 = vsel %vm535_vm4, %v506_v13, %v508_v5  ;;  %591 = vst.msk [vmem:[#allocation2 + $0x128] sm:$0xf0] %vm295_vm3, %v534_v63  ;;  %v1036_v27 = vld [vmem:[#allocation5 + $0x10] sm:$0xff] }
 0x11c   :  { %822 = vrot.lane.b32.xlu1 %v786_v0, %s4623_s11  ;;  %576 = vst [vmem:[#allocation2 + $0xb0] sm:$0xf0] %v539_v35 }
 0x11d   :  { %577 = vst [vmem:[#allocation2 + $0xb8] sm:$0xf0] %v540_v44 }
 0x11e   :  { %v520_v39 = vpop.permute.xlu1 %519  ;;  %1204 = vst [vmem:[#allocation1 + $0x10] ss:$2 sm:$0xff] %v1183_v42  ;;  %v5128_v17 = vld.sshfl [vmem:[#allocation1 + $0x38] sm:$0xff pattern:$0x75316420] }
 0x11f   :  { %v547_v38 = vsel %vm535_vm4, %v520_v39, %v5022_v54 }
 0x120   :  { %584 = vst [vmem:[#allocation2 + $0xf0] sm:$0xf0] %v547_v38  ;;  %814 = vrot.lane.b32.xlu0 %v4916_v58, %s4623_s11  ;;  %824 = vrot.lane.b32.xlu2 %v4912_v56, %s4623_s11  ;;  %v5098_v47 = vld.sshfl [vmem:[#allocation1 + $0x20] sm:$0xff pattern:$0x75316420] }
 0x121   :  { %v5100_v48 = vld.sshfl [vmem:[#allocation1 + $0x28] sm:$0xff pattern:$0x75316420]  ;;  %v5107_v58 = vld.sshfl [vmem:[#allocation1] sm:$0xff pattern:$0x75316420] }
 0x122   :  { %v512_v1 = vpop.permute.xlu0 %511  ;;  %v5102_v49 = vpop.permute.xlu2 %648  ;;  %1059 = vst [vmem:[#allocation1 + $0x21] ss:$2 sm:$0xff] %v1036_v27  ;;  %v5109_v56 = vld.sshfl [vmem:[#allocation1 + $0x8] sm:$0xff pattern:$0x75316420] }
 0x123   :  { %v542_v28 = vsel %vm535_vm4, %v4975_v33, %v512_v1  ;;  %v543_v0 = vsel %vm535_vm4, %v512_v1, %v514_v21  ;;  %1202 = vst [vmem:[#allocation1] ss:$2 sm:$0xff] %v4682_v3  ;;  %v5126_v3 = vld.sshfl [vmem:[#allocation1 + $0x30] sm:$0xff pattern:$0x75316420] }
 0x124   :  { %579 = vst [vmem:[#allocation2 + $0xc8] sm:$0xf0] %v542_v28 }
 0x125   :  { %580 = vst [vmem:[#allocation2 + $0xd0] sm:$0xf0] %v543_v0  ;;  %v1212_v0 = vld.sshfl [vmem:[#allocation1 + $0x18] sm:$0xff pattern:$0x75316420] }
 0x126   :  { %v526_v52 = vpop.permute.xlu1 %525  ;;  %1073 = vst [vmem:[#allocation1 + $0x31] ss:$2 sm:$0xff] %v5036_v9 }
 0x127   :  { %v550_v53 = vsel %vm535_vm4, %v526_v52, %v5051_v16 }
 0x128   :  { %820 = vrot.lane.b32.xlu0 %v5011_v51, %s4623_s11  ;;  %587 = vst [vmem:[#allocation2 + $0x108] sm:$0xf0] %v550_v53 }
 0x129   :  { %v5116_v40 = vld.sshfl [vmem:[#allocation1 + $0x20] sm:$0xff pattern:$0x75316420]  ;;  %v5118_v33 = vld.sshfl [vmem:[#allocation1 + $0x28] sm:$0xff pattern:$0x75316420] }
 0x12a   :  { %v518_v5 = vpop.permute.xlu0 %517  ;;  %v5120_v6 = vpop.permute.xlu2 %654  ;;  %1072 = vst [vmem:[#allocation1 + $0x21] ss:$2 sm:$0xff] %v5066_v29  ;;  %v1210_v18 = vld.sshfl [vmem:[#allocation1 + $0x8] sm:$0xff pattern:$0x75316420] }
 0x12b   :  { %v545_v15 = vsel %vm535_vm4, %v4998_v45, %v518_v5  ;;  %v546_v61 = vsel %vm535_vm4, %v518_v5, %v520_v39  ;;  %v1209_v21 = vld.sshfl [vmem:[#allocation1] sm:$0xff pattern:$0x75316420]  ;;  %1236 = vrot.lane.b32.xlu2 %v1210_v18, %s4624_s12 }
 0x12c   :  { %582 = vst [vmem:[#allocation2 + $0xe0] sm:$0xf0] %v545_v15  ;;  %1234 = vrot.lane.b32.xlu1 %v1209_v21, %s4624_s12 }
 0x12d   :  { %583 = vst [vmem:[#allocation2 + $0xe8] sm:$0xf0] %v546_v61  ;;  %v5151_v38 = vld.sshfl [vmem:[#allocation1 + $0x30] sm:$0xff pattern:$0x75316420] }
 0x12e   :  { %v532_v51 = vpop.permute.xlu1 %531 }
 0x12f   :  { %v553_v23 = vsel %vm535_vm4, %v532_v51, %v534_v63 }
 0x130   :  { %590 = vst [vmem:[#allocation2 + $0x120] sm:$0xf0] %v553_v23  ;;  %826 = vrot.lane.b32.xlu0 %v4920_v62, %s4623_s11 }
 0x131   :  { %v5136_v45 = vld.sshfl [vmem:[#allocation1 + $0x20] sm:$0xff pattern:$0x75316420]  ;;  %v5138_v13 = vld.sshfl [vmem:[#allocation1 + $0x28] sm:$0xff pattern:$0x75316420] }
 0x132   :  { %v524_v35 = vpop.permute.xlu0 %523  ;;  %v5140_v44 = vpop.permute.xlu2 %660  ;;  %1206 = vst [vmem:[#allocation1 + $0x20] ss:$2 sm:$0xff] %v1036_v27 }
 0x133   :  { %v548_v63 = vsel %vm535_vm4, %v5022_v54, %v524_v35  ;;  %v549_v39 = vsel %vm535_vm4, %v524_v35, %v526_v52  ;;  %1087 = vrot.lane.b32.xlu2 %v5046_v11, %s4625_s13  ;;  %v5155_v54 = vld.sshfl [vmem:[#allocation1 + $0x38] sm:$0xff pattern:$0x75316420] }
 0x134   :  { %585 = vst [vmem:[#allocation2 + $0xf8] sm:$0xf0] %v548_v63  ;;  %941 = vrot.lane.b32.xlu1 %v4949_v20, %s4626_s14  ;;  %v1211_v20 = vld.sshfl [vmem:[#allocation1 + $0x10] sm:$0xff pattern:$0x75316420] }
 0x135   :  { %586 = vst [vmem:[#allocation2 + $0x100] sm:$0xf0] %v549_v39 }
 0x136   :  { %v647_v42 = vpop.permute.xlu1 %646  ;;  %1208 = vst [vmem:[#allocation1 + $0x30] ss:$2 sm:$0xff] %v5007_v32 }
 0x137   :  { %v684_v62 = vsel %vm682_vm5, %v647_v42, %v5102_v49 }
 0x138   :  { %721 = vst [vmem:[#allocation2 + $0x138] sm:$0xf] %v684_v62  ;;  %939 = vrot.lane.b32.xlu0 %v4947_v19, %s4626_s14 }
 0x139   :  { %v1214_v18 = vld.sshfl [vmem:[#allocation1 + $0x28] sm:$0xff pattern:$0x75316420] }
 0x13a   :  { %v530_v27 = vpop.permute.xlu0 %529  ;;  %v5158_v1 = vpop.permute.xlu2 %666 }
 0x13b   :  { %v551_v11 = vsel %vm535_vm4, %v5051_v16, %v530_v27  ;;  %v552_v28 = vsel %vm535_vm4, %v530_v27, %v532_v51  ;;  %1240 = vrot.lane.b32.xlu2 %v1212_v0, %s4624_s12 }
 0x13c   :  { %588 = vst [vmem:[#allocation2 + $0x110] sm:$0xf0] %v551_v11  ;;  %1238 = vrot.lane.b32.xlu1 %v1211_v20, %s4624_s12 }
 0x13d   :  { %589 = vst [vmem:[#allocation2 + $0x118] sm:$0xf0] %v552_v28  ;;  %v1216_v32 = vld.sshfl [vmem:[#allocation1 + $0x38] sm:$0xff pattern:$0x75316420] }
 0x13e   :  { %v653_v52 = vpop.permute.xlu1 %652  ;;  %v1215_v16 = vld.sshfl [vmem:[#allocation1 + $0x30] sm:$0xff pattern:$0x75316420] }
 0x13f   :  { %v687_v19 = vsel %vm682_vm5, %v653_v52, %v5120_v6  ;;  %1220 = vst [vmem:[#allocation1 + $0x30] ss:$2 sm:$0xff] %v5036_v9  ;;  %v1213_v9 = vld.sshfl [vmem:[#allocation1 + $0x20] sm:$0xff pattern:$0x75316420] }
 0x140   :  { %724 = vst [vmem:[#allocation2 + $0x150] sm:$0xf] %v687_v19  ;;  %1089 = vrot.lane.b32.xlu0 %v5049_v60, %s4625_s13  ;;  %v1186_v60 = vld [vmem:[#allocation5 + $0x20] sm:$0xff] }
 0x141   :  { %1217 = vst [vmem:[#allocation1] ss:$2 sm:$0xff] %v1186_v60 }
 0x142   :  { %v645_v53 = vpop.permute.xlu0 %644  ;;  %v5170_v5 = vpop.permute.xlu2 %672  ;;  %1219 = vst [vmem:[#allocation1 + $0x20] ss:$2 sm:$0xff] %v5066_v29  ;;  %v1187_v29 = vld [vmem:[#allocation5 + $0x28] sm:$0xff] }
 0x143   :  { %v683_v15 = vsel %vm682_vm5, %v645_v53, %v647_v42  ;;  %1091 = vrot.lane.b32.xlu2 %v5024_v55, %s4625_s13  ;;  %1218 = vst [vmem:[#allocation1 + $0x10] ss:$2 sm:$0xff] %v1187_v29 }
 0x144   :  { %720 = vst [vmem:[#allocation2 + $0x130] sm:$0xf] %v683_v15  ;;  %945 = vrot.lane.b32.xlu1 %v4960_v7, %s4626_s14 }
 0x146   :  { %v659_v61 = vpop.permute.xlu1 %658 }
 0x147   :  { %v690_v51 = vsel %vm682_vm5, %v659_v61, %v5140_v44 }
 0x148   :  { %727 = vst [vmem:[#allocation2 + $0x168] sm:$0xf] %v690_v51  ;;  %943 = vrot.lane.b32.xlu0 %v4955_v22, %s4626_s14 }
 0x14a   :  { %v651_v21 = vpop.permute.xlu0 %650  ;;  %v5181_v23 = vpop.permute.xlu2 %678  ;;  %v1224_v15 = vld.sshfl [vmem:[#allocation1 + $0x18] sm:$0xff pattern:$0x75316420] }
 0x14b   :  { %v685_v35 = vsel %vm682_vm5, %v5102_v49, %v651_v21  ;;  %v686_v55 = vsel %vm682_vm5, %v651_v21, %v653_v52  ;;  %947 = vrot.lane.b32.xlu2 %v5068_v10, %s4626_s14 }
 0x14c   :  { %722 = vst [vmem:[#allocation2 + $0x140] sm:$0xf] %v685_v35  ;;  %1242 = vrot.lane.b32.xlu1 %v1213_v9, %s4624_s12 }
 0x14d   :  { %723 = vst [vmem:[#allocation2 + $0x148] sm:$0xf] %v686_v55 }
 0x14e   :  { %v665_v7 = vpop.permute.xlu1 %664 }
 0x14f   :  { %v693_v22 = vsel %vm682_vm5, %v665_v7, %v5158_v1 }
 0x150   :  { %730 = vst [vmem:[#allocation2 + $0x180] sm:$0xf] %v693_v22  ;;  %1093 = vrot.lane.b32.xlu0 %v5026_v59, %s4625_s13  ;;  %v1222_v22 = vld.sshfl [vmem:[#allocation1 + $0x8] sm:$0xff pattern:$0x75316420] }
 0x152   :  { %v657_v49 = vpop.permute.xlu0 %656  ;;  %v5194_v63 = vpop.permute.xlu2 %794 }
 0x153   :  { %v688_v39 = vsel %vm682_vm5, %v5120_v6, %v657_v49  ;;  %v689_v42 = vsel %vm682_vm5, %v657_v49, %v659_v61  ;;  %1248 = vrot.lane.b32.xlu2 %v1216_v32, %s4624_s12  ;;  %v1223_v61 = vld.sshfl [vmem:[#allocation1 + $0x10] sm:$0xff pattern:$0x75316420] }
 0x154   :  { %725 = vst [vmem:[#allocation2 + $0x158] sm:$0xf] %v688_v39  ;;  %1246 = vrot.lane.b32.xlu1 %v1215_v16, %s4624_s12  ;;  %v1221_v16 = vld.sshfl [vmem:[#allocation1] sm:$0xff pattern:$0x75316420] }
 0x155   :  { %726 = vst [vmem:[#allocation2 + $0x160] sm:$0xf] %v689_v42  ;;  %v1225_v42 = vld.sshfl [vmem:[#allocation1 + $0x20] sm:$0xff pattern:$0x75316420] }
 0x156   :  { %v671_v62 = vpop.permute.xlu1 %670 }
 0x157   :  { %v696_v10 = vsel %vm682_vm5, %v671_v62, %v5170_v5 }
 0x158   :  { %733 = vst [vmem:[#allocation2 + $0x198] sm:$0xf] %v696_v10  ;;  %1095 = vrot.lane.b32.xlu0 %v5116_v40, %s4625_s13  ;;  %v1191_v10 = vld [vmem:[#allocation5 + $0x48] sm:$0xf] }
 0x159   :  { %1230 = vst [vmem:[#allocation1 + $0x10] ss:$2 sm:$0xff] %v1191_v10 }
 0x15a   :  { %v663_v59 = vpop.permute.xlu0 %662  ;;  %v5205_v27 = vpop.permute.xlu2 %800 }
 0x15b   :  { %v691_v6 = vsel %vm682_vm5, %v5140_v44, %v663_v59  ;;  %v692_v11 = vsel %vm682_vm5, %v663_v59, %v665_v7  ;;  %1099 = vrot.lane.b32.xlu2 %v5126_v3, %s4625_s13 }
 0x15c   :  { %728 = vst [vmem:[#allocation2 + $0x170] sm:$0xf] %v691_v6  ;;  %953 = vrot.lane.b32.xlu1 %v5044_v43, %s4626_s14 }
 0x15d   :  { %729 = vst [vmem:[#allocation2 + $0x178] sm:$0xf] %v692_v11  ;;  %v1228_v11 = vld.sshfl [vmem:[#allocation1 + $0x38] sm:$0xff pattern:$0x75316420] }
 0x15e   :  { %v677_v28 = vpop.permute.xlu1 %676 }
 0x15f   :  { %v699_v0 = vsel %vm682_vm5, %v677_v28, %v5181_v23 }
 0x160   :  { %736 = vst [vmem:[#allocation2 + $0x1b0] sm:$0xf] %v699_v0  ;;  %951 = vrot.lane.b32.xlu0 %v5038_v12, %s4626_s14 }
 0x162   :  { %v669_v40 = vpop.permute.xlu0 %668  ;;  %v5218_v44 = vpop.permute.xlu2 %806 }
 0x163   :  { %v694_v20 = vsel %vm682_vm5, %v5158_v1, %v669_v40  ;;  %v695_v52 = vsel %vm682_vm5, %v669_v40, %v671_v62  ;;  %949 = vrot.lane.b32.xlu2 %v5062_v24, %s4626_s14 }
 0x164   :  { %731 = vst [vmem:[#allocation2 + $0x188] sm:$0xf] %v694_v20  ;;  %1244 = vrot.lane.b32.xlu1 %v1214_v18, %s4624_s12 }
 0x165   :  { %732 = vst [vmem:[#allocation2 + $0x190] sm:$0xf] %v695_v52 }
 0x166   :  { %v793_v19 = vpop.permute.xlu1 %792 }
 0x167   :  { %v831_v3 = vsel %vm830_vm6, %v793_v19, %v5194_v63 }
 0x168   :  { %868 = vst [vmem:[#allocation2 + $0x130] sm:$0xf0] %v831_v3  ;;  %1101 = vrot.lane.b32.xlu0 %v5128_v17, %s4625_s13 }
 0x16a   :  { %v675_v12 = vpop.permute.xlu0 %674  ;;  %v5233_v32 = vpop.permute.xlu2 %812 }
 0x16b   :  { %v697_v43 = vsel %vm682_vm5, %v5170_v5, %v675_v12  ;;  %v698_v1 = vsel %vm682_vm5, %v675_v12, %v677_v28  ;;  %955 = vrot.lane.b32.xlu2 %v4986_v37, %s4626_s14  ;;  %v1227_v28 = vld.sshfl [vmem:[#allocation1 + $0x30] sm:$0xff pattern:$0x75316420] }
 0x16c   :  { %734 = vst [vmem:[#allocation2 + $0x1a0] sm:$0xf] %v697_v43  ;;  %1250 = vrot.lane.b32.xlu1 %v1221_v16, %s4624_s12 }
 0x16d   :  { %735 = vst [vmem:[#allocation2 + $0x1a8] sm:$0xf] %v698_v1 }
 0x16e   :  { %v799_v53 = vpop.permute.xlu1 %798 }
 0x16f   :  { %v834_v24 = vsel %vm830_vm6, %v799_v53, %v5205_v27 }
 0x170   :  { %871 = vst [vmem:[#allocation2 + $0x148] sm:$0xf0] %v834_v24  ;;  %1097 = vrot.lane.b32.xlu0 %v5118_v33, %s4625_s13 }
 0x172   :  { %v681_v17 = vpop.permute.xlu0 %680  ;;  %v819_v51 = vpop.permute.xlu2 %818 }
 0x173   :  { %v700_v5 = vsel %vm682_vm5, %v5181_v23, %v681_v17  ;;  %738 = vst.msk [vmem:[#allocation2 + $0x1c0] sm:$0xf] %vm146_vm2, %v681_v17  ;;  %1256 = vrot.lane.b32.xlu2 %v1224_v15, %s4624_s12  ;;  %v1233_v17 = vld.sshfl [vmem:[#allocation1 + $0x10] sm:$0xff pattern:$0x75316420] }
 0x174   :  { %737 = vst [vmem:[#allocation2 + $0x1b8] sm:$0xf] %v700_v5  ;;  %1254 = vrot.lane.b32.xlu1 %v1223_v61, %s4624_s12 }
 0x176   :  { %v805_v9 = vpop.permute.xlu1 %804 }
 0x177   :  { %v837_v37 = vsel %vm830_vm6, %v805_v9, %v5218_v44 }
 0x178   :  { %874 = vst [vmem:[#allocation2 + $0x160] sm:$0xf0] %v837_v37  ;;  %1103 = vrot.lane.b32.xlu0 %v5079_v26, %s4625_s13 }
 0x17a   :  { %v797_v33 = vpop.permute.xlu0 %796  ;;  %v825_v35 = vpop.permute.xlu2 %824 }
 0x17b   :  { %v832_v60 = vsel %vm830_vm6, %v5194_v63, %v797_v33  ;;  %v833_v18 = vsel %vm830_vm6, %v797_v33, %v799_v53  ;;  %1107 = vrot.lane.b32.xlu2 %v5058_v57, %s4625_s13 }
 0x17c   :  { %869 = vst [vmem:[#allocation2 + $0x138] sm:$0xf0] %v832_v60  ;;  %961 = vrot.lane.b32.xlu1 %v4979_v34, %s4626_s14  ;;  %v1350_v60 = vld [vmem:[#allocation2 + $0x98] sm:$0xff] }
 0x17d   :  { %870 = vst [vmem:[#allocation2 + $0x140] sm:$0xf0] %v833_v18 }
 0x17e   :  { %v811_v21 = vpop.permute.xlu1 %810 }
 0x17f   :  { %v840_v23 = vsel %vm830_vm6, %v811_v21, %v5233_v32 }
 0x180   :  { %877 = vst [vmem:[#allocation2 + $0x178] sm:$0xf0] %v840_v23  ;;  %959 = vrot.lane.b32.xlu0 %v4977_v30, %s4626_s14  ;;  %v1190_v30 = vld [vmem:[#allocation5 + $0x40] sm:$0xff] }
 0x181   :  { %1229 = vst [vmem:[#allocation1] ss:$2 sm:$0xff] %v1190_v30 }
 0x182   :  { %v803_v26 = vpop.permute.xlu0 %802 }
 0x183   :  { %v835_v55 = vsel %vm830_vm6, %v5205_v27, %v803_v26  ;;  %v836_v7 = vsel %vm830_vm6, %v803_v26, %v805_v9  ;;  %957 = vrot.lane.b32.xlu2 %v4988_v25, %s4626_s14 }
 0x184   :  { %872 = vst [vmem:[#allocation2 + $0x150] sm:$0xf0] %v835_v55  ;;  %1252 = vrot.lane.b32.xlu1 %v1222_v22, %s4624_s12 }
 0x185   :  { %873 = vst [vmem:[#allocation2 + $0x158] sm:$0xf0] %v836_v7  ;;  %v5271_v34 = vpop.permute.xlu2 %1236 }
 0x186   :  { %v817_v29 = vpop.permute.xlu1 %816 }
 0x187   :  { %v843_v57 = vsel %vm830_vm6, %v817_v29, %v819_v51 }
 0x188   :  { %880 = vst [vmem:[#allocation2 + $0x190] sm:$0xf0] %v843_v57  ;;  %1109 = vrot.lane.b32.xlu0 %v5060_v14, %s4625_s13  ;;  %v1231_v1 = vld.sshfl [vmem:[#allocation1] sm:$0xff pattern:$0x75316420]  ;;  %v1351_v57 = vld [vmem:[#allocation2 + $0xa0] sm:$0xff] }
 0x18a   :  { %v809_v49 = vpop.permute.xlu0 %808 }
 0x18b   :  { %v838_v63 = vsel %vm830_vm6, %v5218_v44, %v809_v49  ;;  %v839_v39 = vsel %vm830_vm6, %v809_v49, %v811_v21  ;;  %963 = vrot.lane.b32.xlu2 %v5098_v47, %s4626_s14  ;;  %v1331_v21 = vld [vmem:[#allocation2] sm:$0xff] }
 0x18c   :  { %875 = vst [vmem:[#allocation2 + $0x168] sm:$0xf0] %v838_v63  ;;  %1258 = vrot.lane.b32.xlu1 %v1225_v42, %s4624_s12  ;;  %v5363_v42 = vld [vmem:[#allocation8 + $0x8] sm:$0xff] }
 0x18d   :  { %876 = vst [vmem:[#allocation2 + $0x170] sm:$0xf0] %v839_v39  ;;  %v1088_v14 = vpop.permute.xlu2 %1087 }
 0x18e   :  { %v823_v25 = vpop.permute.xlu1 %822 }
 0x18f   :  { %v846_v62 = vsel %vm830_vm6, %v823_v25, %v825_v35 }
 0x190   :  { %883 = vst [vmem:[#allocation2 + $0x1a8] sm:$0xf0] %v846_v62  ;;  %1105 = vrot.lane.b32.xlu0 %v5087_v36, %s4625_s13 }
 0x192   :  { %v815_v59 = vpop.permute.xlu0 %814 }
 0x193   :  { %v841_v27 = vsel %vm830_vm6, %v5233_v32, %v815_v59  ;;  %v842_v6 = vsel %vm830_vm6, %v815_v59, %v817_v29  ;;  %1264 = vrot.lane.b32.xlu2 %v1228_v11, %s4624_s12  ;;  %v1370_v29 = vld [vmem:[#allocation2 + $0x138] sm:$0xff]  ;;  %v1333_v59 = vld [vmem:[#allocation2 + $0x10] sm:$0xff] }
 0x194   :  { %878 = vst [vmem:[#allocation2 + $0x180] sm:$0xf0] %v841_v27  ;;  %1262 = vrot.lane.b32.xlu1 %v1227_v28, %s4624_s12 }
 0x195   :  { %879 = vst [vmem:[#allocation2 + $0x188] sm:$0xf0] %v842_v6  ;;  %v5289_v36 = vpop.permute.xlu2 %1240 }
 0x198   :  { %1111 = vrot.lane.b32.xlu0 %v5136_v45, %s4625_s13 }
 0x19a   :  { %v821_v47 = vpop.permute.xlu0 %820 }
 0x19b   :  { %v844_v0 = vsel %vm830_vm6, %v819_v51, %v821_v47  ;;  %v845_v40 = vsel %vm830_vm6, %v821_v47, %v823_v25  ;;  %1115 = vrot.lane.b32.xlu2 %v5151_v38, %s4625_s13  ;;  %v1226_v38 = vld.sshfl [vmem:[#allocation1 + $0x28] sm:$0xff pattern:$0x75316420] }
 0x19c   :  { %881 = vst [vmem:[#allocation2 + $0x198] sm:$0xf0] %v844_v0  ;;  %969 = vrot.lane.b32.xlu1 %v5076_v4, %s4626_s14 }
 0x19d   :  { %882 = vst [vmem:[#allocation2 + $0x1a0] sm:$0xf0] %v845_v40  ;;  %v5299_v45 = vpop.permute.xlu2 %1091  ;;  %v1372_v40 = vld [vmem:[#allocation2 + $0x148] sm:$0xff] }
 0x19e   :  { %v1235_v44 = vpop.permute.xlu1 %1234 }
 0x19f   :  { %v1273_v52 = vsel %vm1272_vm7, %v1235_v44, %v5271_v34 }
 0x1a0   :  { %967 = vrot.lane.b32.xlu0 %v5074_v31, %s4626_s14  ;;  %1310 = vst [vmem:[#allocation2 + $0x260] sm:$0xf] %v1273_v52  ;;  %v1334_v52 = vld [vmem:[#allocation2 + $0x18] sm:$0xff] }
 0x1a2   :  { %v5301_v20 = vpop.permute.xlu0 %826 }
 0x1a3   :  { %v847_v19 = vsel %vm830_vm6, %v825_v35, %v5301_v20  ;;  %965 = vrot.lane.b32.xlu2 %v5100_v48, %s4626_s14  ;;  %v5346_v35 = vld [vmem:[#allocation8] sm:$0xff] }
 0x1a4   :  { %884 = vst [vmem:[#allocation2 + $0x1b0] sm:$0xf0] %v847_v19  ;;  %1260 = vrot.lane.b32.xlu1 %v1226_v38, %s4624_s12 }
 0x1a5   :  { %v948_v31 = vpop.permute.xlu2 %947 }
 0x1a6   :  { %v942_v4 = vpop.permute.xlu1 %941 }
 0x1a7   :  { %v1407_v12 = vld [vmem:[#allocation2 + $0x260] sm:$0xf] }
 0x1a8   :  { %1117 = vrot.lane.b32.xlu0 %v5155_v54, %s4625_s13  ;;  %4413 = vmatpush.msk.msra.mxu2 %vm1445_vm9, %v1407_v12 }
 0x1aa   :  { %v940_v3 = vpop.permute.xlu0 %939 }
 0x1ab   :  { %v978_v43 = vsel %vm977_vm8, %v940_v3, %v942_v4  ;;  %971 = vrot.lane.b32.xlu2 %v5013_v50, %s4626_s14 }
 0x1ac   :  { %1015 = vst [vmem:[#allocation2 + $0x1c8] sm:$0xf] %v978_v43  ;;  %1266 = vrot.lane.b32.xlu1 %v1231_v1, %s4624_s12 }
 0x1ad   :  { %v5319_v48 = vpop.permute.xlu2 %1248 }
 0x1ae   :  { %v1239_v54 = vpop.permute.xlu1 %1238 }
 0x1af   :  { %v1274_v16 = vsel %vm1272_vm7, %v5271_v34, %v1239_v54  ;;  %v1275_v50 = vsel %vm1272_vm7, %v1239_v54, %v5289_v36  ;;  %v1332_v34 = vld [vmem:[#allocation2 + $0x8] sm:$0xff] }
 0x1b0   :  { %1113 = vrot.lane.b32.xlu0 %v5138_v13, %s4625_s13  ;;  %1311 = vst [vmem:[#allocation2 + $0x268] sm:$0xf] %v1274_v16 }
 0x1b1   :  { %1312 = vst [vmem:[#allocation2 + $0x270] sm:$0xf] %v1275_v50 }
 0x1b2   :  { %v1090_v32 = vpop.permute.xlu0 %1089 }
 0x1b3   :  { %v1126_v53 = vsel %vm1125_vm10, %v1088_v14, %v1090_v32  ;;  %v1127_v24 = vsel %vm1125_vm10, %v1090_v32, %v5299_v45  ;;  %975 = vrot.lane.b32.xlu2 %v5000_v46, %s4626_s14  ;;  %v1232_v46 = vld.sshfl [vmem:[#allocation1 + $0x8] sm:$0xff pattern:$0x75316420]  ;;  %v1352_v14 = vld [vmem:[#allocation2 + $0xa8] sm:$0xff] }
 0x1b4   :  { %1163 = vst [vmem:[#allocation2 + $0x1c8] sm:$0xf0] %v1126_v53  ;;  %1270 = vrot.lane.b32.xlu1 %v1233_v17, %s4624_s12 }
 0x1b5   :  { %1164 = vst [vmem:[#allocation2 + $0x1d0] sm:$0xf0] %v1127_v24  ;;  %v5333_v13 = vpop.permute.xlu2 %1099 }
 0x1b6   :  { %v946_v5 = vpop.permute.xlu1 %945 }
 0x1b7   :  { %v981_v61 = vsel %vm977_vm8, %v946_v5, %v948_v31  ;;  %v1408_v51 = vld [vmem:[#allocation2 + $0x268] sm:$0xf] }
 0x1b8   :  { %1119 = vrot.lane.b32.xlu0 %v5107_v58, %s4625_s13  ;;  %1018 = vst [vmem:[#allocation2 + $0x1e0] sm:$0xf] %v981_v61  ;;  %4416 = vmatpush.msk.msra.mxu1 %vm1445_vm9, %v1408_v51  ;;  %v1369_v58 = vld [vmem:[#allocation2 + $0x130] sm:$0xff] }
 0x1b9   :  { %v1409_v7 = vld [vmem:[#allocation2 + $0x270] sm:$0xf] }
 0x1ba   :  { %v944_v15 = vpop.permute.xlu0 %943 }
 0x1bb   :  { %v979_v9 = vsel %vm977_vm8, %v942_v4, %v944_v15  ;;  %v980_v37 = vsel %vm977_vm8, %v944_v15, %v946_v5  ;;  %v1388_v33 = vld [vmem:[#allocation2 + $0x1c8] sm:$0xff]  ;;  %828 = vrot.lane.b32.xlu2 %v4932_v8, %s4623_s11  ;;  %v1375_v5 = vld [vmem:[#allocation2 + $0x160] sm:$0xff] }
 0x1bc   :  { %1016 = vst [vmem:[#allocation2 + $0x1d0] sm:$0xf] %v979_v9  ;;  %1515 = vmatpush.msra.mxu2 %v1388_v33  ;;  %1268 = vrot.lane.b32.xlu1 %v1232_v46, %s4624_s12 }
 0x1bd   :  { %1017 = vst [vmem:[#allocation2 + $0x1d8] sm:$0xf] %v980_v37  ;;  %v950_v18 = vpop.permute.xlu2 %949 }
 0x1be   :  { %1516 = vmatpush.msra.mxu2 %v1369_v58  ;;  %v5344_v23 = vpop.permute.xlu1 %1242  ;;  %v982_v55 = vsel %vm977_vm8, %v948_v31, %v950_v18 }
 0x1bf   :  { %v1276_v8 = vsel %vm1272_vm7, %v5289_v36, %v5344_v23  ;;  %1019 = vst [vmem:[#allocation2 + $0x1e8] sm:$0xf] %v982_v55  ;;  %v1335_v55 = vld [vmem:[#allocation2 + $0x20] sm:$0xff] }
 0x1c0   :  { %1123 = vrot.lane.b32.xlu0 %v5089_v41, %s4625_s13  ;;  %1517 = vmatpush.msra.mxu2 %v1350_v60  ;;  %1313 = vst [vmem:[#allocation2 + $0x278] sm:$0xf] %v1276_v8  ;;  %v1373_v60 = vld [vmem:[#allocation2 + $0x150] sm:$0xff] }
 0x1c2   :  { %v1094_v26 = vpop.permute.xlu0 %1093  ;;  %1518 = vmatpush.msra.mxu2 %v1331_v21  ;;  %v1354_v21 = vld [vmem:[#allocation2 + $0xb8] sm:$0xff] }
 0x1c3   :  { %v1128_v41 = vsel %vm1125_vm10, %v5299_v45, %v1094_v26  ;;  %v1389_v22 = vld [vmem:[#allocation2 + $0x1d0] sm:$0xff]  ;;  %4414 = vmatmul.msk.f32.vlgmr.msra.gmra.mxu2 %vm1438_vm11, %v5346_v35 }
 0x1c4   :  { %4419 = vmatpush.msk.msrb.mxu2 %vm1445_vm9, %v1409_v7  ;;  %1165 = vst [vmem:[#allocation2 + $0x1d8] sm:$0xf0] %v1128_v41  ;;  %1538 = vmatpush.msra.mxu1 %v1389_v22  ;;  %v1353_v45 = vld [vmem:[#allocation2 + $0xb0] sm:$0xff]  ;;  %v1336_v41 = vld [vmem:[#allocation2 + $0x28] sm:$0xff] }
 0x1c5   :  { %1121 = vrot.lane.b32.xlu1 %v5109_v56, %s4625_s13  ;;  %v956_v30 = vpop.permute.xlu2 %955  ;;  %v1371_v56 = vld [vmem:[#allocation2 + $0x140] sm:$0xff] }
 0x1c6   :  { %1539 = vmatpush.msra.mxu1 %v1370_v29  ;;  %v1247_v49 = vpop.permute.xlu1 %1246 }
 0x1c7   :  { %v1279_v39 = vsel %vm1272_vm7, %v1247_v49, %v5319_v48 }
 0x1c8   :  { %973 = vrot.lane.b32.xlu0 %v5019_v2, %s4626_s14  ;;  %1540 = vmatpush.msra.mxu1 %v1351_v57  ;;  %1316 = vst [vmem:[#allocation2 + $0x290] sm:$0xf] %v1279_v39  ;;  %v1410_v2 = vld [vmem:[#allocation2 + $0x278] sm:$0xf]  ;;  %v7280_v57 = vmov 0   ;;  %v1376_v39 = vld [vmem:[#allocation2 + $0x168] sm:$0xff] }
 0x1c9   :  { %4422 = vmatpush.msk.msra.mxu3 %vm1445_vm9, %v1410_v2  ;;  %4508 = vset.pattern.permute.xlu0 %v7280_v57  ;;  %v1338_v2 = vld [vmem:[#allocation2 + $0x38] sm:$0xff] }
 0x1ca   :  { %v1096_v63 = vpop.permute.xlu0 %1095  ;;  %1541 = vmatpush.msra.mxu1 %v1332_v34  ;;  %4507 = vset.pattern.permute.xlu2 %v7280_v57 }
 0x1cb   :  { %v1129_v25 = vsel %vm1125_vm10, %v1094_v26, %v1096_v63  ;;  %v1390_v62 = vld [vmem:[#allocation2 + $0x1d8] sm:$0xff]  ;;  %4417 = vmatmul.msk.f32.vlgmr.msra.gmra.mxu1 %vm1438_vm11, %v5346_v35  ;;  %4415 = vmatmul.msk.f32.gmra.mxu2 %vm1438_vm11, %v5363_v42 }
 0x1cc   :  { %1166 = vst [vmem:[#allocation2 + $0x1e0] sm:$0xf0] %v1129_v25  ;;  %1561 = vmatpush.msrb.mxu2 %v1390_v62  ;;  %v1357_v25 = vld [vmem:[#allocation2 + $0xd0] sm:$0xff] }
 0x1cd   :  { %v5371_v10 = vpop.permute.xlu2 %1256 }
 0x1ce   :  { %1562 = vmatpush.msrb.mxu2 %v1371_v56  ;;  %v954_v27 = vpop.permute.xlu1 %953 }
 0x1cf   :  { %v985_v11 = vsel %vm977_vm8, %v954_v27, %v956_v30  ;;  %v1413_v28 = vld [vmem:[#allocation2 + $0x290] sm:$0xf] }
 0x1d0   :  { %1563 = vmatpush.msrb.mxu2 %v1352_v14  ;;  %1022 = vst [vmem:[#allocation2 + $0x200] sm:$0xf] %v985_v11 }
 0x1d2   :  { %v952_v6 = vpop.permute.xlu0 %951  ;;  %1564 = vmatpush.msrb.mxu2 %v1333_v59 }
 0x1d3   :  { %v983_v36 = vsel %vm977_vm8, %v950_v18, %v952_v6  ;;  %v984_v47 = vsel %vm977_vm8, %v952_v6, %v954_v27  ;;  %v1391_v0 = vld [vmem:[#allocation2 + $0x1e0] sm:$0xff]  ;;  %4418 = vmatmul.msk.f32.gmra.mxu1 %vm1438_vm11, %v5363_v42  ;;  %4420 = vmatmul.msk.f32.vlgmr.msrb.gmra.mxu2 %vm1438_vm11, %v5346_v35  ;;  %v1374_v18 = vld [vmem:[#allocation2 + $0x158] sm:$0xff] }
 0x1d4   :  { %4431 = vmatpush.msk.msra.mxu2 %vm1445_vm9, %v1413_v28  ;;  %1020 = vst [vmem:[#allocation2 + $0x1f0] sm:$0xf] %v983_v36  ;;  %1584 = vmatpush.msra.mxu3 %v1391_v0 }
 0x1d5   :  { %1021 = vst [vmem:[#allocation2 + $0x1f8] sm:$0xf] %v984_v47  ;;  %v5381_v44 = vpop.permute.xlu2 %1107 }
 0x1d6   :  { %1585 = vmatpush.msra.mxu3 %v1372_v40  ;;  %v1245_v19 = vpop.permute.xlu1 %1244  ;;  %v5457_v40 = vld [vmem:[%s7275_s3] sm:$0xff] }
 0x1d7   :  { %v1277_v31 = vsel %vm1272_vm7, %v5344_v23, %v1245_v19  ;;  %v1278_v4 = vsel %vm1272_vm7, %v1245_v19, %v1247_v49  ;;  %v1355_v23 = vld [vmem:[#allocation2 + $0xc0] sm:$0xff]  ;;  %1430 = vperm.xlu2 %4507, %v5457_v40  }
 0x1d8   :  { %1586 = vmatpush.msra.mxu3 %v1353_v45  ;;  %1314 = vst [vmem:[#allocation2 + $0x280] sm:$0xf] %v1277_v31 }
 0x1d9   :  { %1315 = vst [vmem:[#allocation2 + $0x288] sm:$0xf] %v1278_v4  ;;  %v1360_v4 = vld [vmem:[#allocation2 + $0xe8] sm:$0xff] }
 0x1da   :  { %v1102_v38 = vpop.permute.xlu0 %1101  ;;  %1587 = vmatpush.msra.mxu3 %v1334_v52 }
 0x1db   :  { %v1132_v3 = vsel %vm1125_vm10, %v5333_v13, %v1102_v38  ;;  %4423 = vmatmul.msk.f32.vlgmr.msra.gmra.mxu3 %vm1438_vm11, %v5346_v35  ;;  %4421 = vmatmul.msk.f32.gmra.mxu2 %vm1438_vm11, %v5363_v42 }
 0x1dc   :  { %1169 = vst [vmem:[#allocation2 + $0x1f8] sm:$0xf0] %v1132_v3  ;;  %v1341_v3 = vld [vmem:[#allocation2 + $0x50] sm:$0xff] }
 0x1dd   :  { %v958_v12 = vpop.permute.xlu2 %957 }
 0x1de   :  { %v5392_v43 = vpop.permute.xlu1 %1250  ;;  %v986_v54 = vsel %vm977_vm8, %v956_v30, %v958_v12 }
 0x1df   :  { %v1411_v32 = vld [vmem:[#allocation2 + $0x280] sm:$0xf]  ;;  %1023 = vst [vmem:[#allocation2 + $0x208] sm:$0xf] %v986_v54  ;;  %v1280_v24 = vsel %vm1272_vm7, %v5319_v48, %v5392_v43  ;;  %v1337_v48 = vld [vmem:[#allocation2 + $0x30] sm:$0xff] }
 0x1e0   :  { %4425 = vmatpush.msk.msra.mxu0 %vm1445_vm9, %v1411_v32  ;;  %v1412_v17 = vld [vmem:[#allocation2 + $0x288] sm:$0xf]  ;;  %1317 = vst [vmem:[#allocation2 + $0x298] sm:$0xf] %v1280_v24  ;;  %v1377_v24 = vld [vmem:[#allocation2 + $0x170] sm:$0xff] }
 0x1e1   :  { %4428 = vmatpush.msk.msrb.mxu1 %vm1445_vm9, %v1412_v17  ;;  %v1358_v17 = vld [vmem:[#allocation2 + $0xd8] sm:$0xff] }
 0x1e2   :  { %v1098_v1 = vpop.permute.xlu0 %1097 }
 0x1e3   :  { %v1130_v16 = vsel %vm1125_vm10, %v1096_v63, %v1098_v1  ;;  %v1131_v53 = vsel %vm1125_vm10, %v1098_v1, %v5333_v13  ;;  %v1394_v50 = vld [vmem:[#allocation2 + $0x1f8] sm:$0xff]  ;;  %4424 = vmatmul.msk.f32.gmra.mxu3 %vm1438_vm11, %v5363_v42  ;;  %v1356_v13 = vld [vmem:[#allocation2 + $0xc8] sm:$0xff]  ;;  %v5427_v63 = vld [vmem:[%s7275_s3 + $0x8] sm:$0xff] }
 0x1e4   :  { %1167 = vst [vmem:[#allocation2 + $0x1e8] sm:$0xf0] %v1130_v16  ;;  %1653 = vmatpush.msra.mxu2 %v1394_v50  ;;  %1435 = vperm.xlu0 %4508, %v5427_v63   ;;  %v1378_v50 = vld [vmem:[#allocation2 + $0x178] sm:$0xff] }
 0x1e5   :  { %1168 = vst [vmem:[#allocation2 + $0x1f0] sm:$0xf0] %v1131_v53  ;;  %v5405_v15 = vpop.permute.xlu2 %963 }
 0x1e6   :  { %1654 = vmatpush.msra.mxu2 %v1375_v5  ;;  %v1255_v61 = vpop.permute.xlu1 %1254  ;;  %v1359_v5 = vld [vmem:[#allocation2 + $0xe0] sm:$0xff] }
 0x1e7   :  { %v1283_v9 = vsel %vm1272_vm7, %v1255_v61, %v5371_v10  ;;  %v1414_v58 = vld [vmem:[#allocation2 + $0x298] sm:$0xf] }
 0x1e8   :  { %1655 = vmatpush.msra.mxu2 %v1356_v13  ;;  %1320 = vst [vmem:[#allocation2 + $0x2b0] sm:$0xf] %v1283_v9  ;;  %4434 = vmatpush.msk.msrb.mxu3 %vm1445_vm9, %v1414_v58 }
 0x1ea   :  { %v5407_v51 = vpop.permute.xlu0 %1103  ;;  %1656 = vmatpush.msra.mxu2 %v1337_v48 }
 0x1eb   :  { %v1133_v37 = vsel %vm1125_vm10, %v1102_v38, %v5407_v51  ;;  %v1392_v33 = vld [vmem:[#allocation2 + $0x1e8] sm:$0xff]  ;;  %4432 = vmatmul.msk.f32.vlgmr.msra.gmra.mxu2 %vm1438_vm11, %v5346_v35 }
 0x1ec   :  { %1170 = vst [vmem:[#allocation2 + $0x200] sm:$0xf0] %v1133_v37  ;;  %1607 = vmatpush.msra.mxu0 %v1392_v33  ;;  %v1393_v46 = vld [vmem:[#allocation2 + $0x1f0] sm:$0xff] }
 0x1ed   :  { %1630 = vmatpush.msrb.mxu1 %v1393_v46  ;;  %v5416_v26 = vpop.permute.xlu2 %1264 }
 0x1ee   :  { %1608 = vmatpush.msra.mxu0 %v1373_v60  ;;  %v962_v8 = vpop.permute.xlu1 %961  ;;  %v1380_v60 = vld [vmem:[#allocation2 + $0x188] sm:$0xff] }
 0x1ef   :  { %1631 = vmatpush.msrb.mxu1 %v1374_v18  ;;  %v989_v22 = vsel %vm977_vm8, %v962_v8, %v5405_v15  ;;  %v1417_v29 = vld [vmem:[#allocation2 + $0x2b0] sm:$0xf] }
 0x1f0   :  { %1609 = vmatpush.msra.mxu0 %v1354_v21  ;;  %1026 = vst [vmem:[#allocation2 + $0x220] sm:$0xf] %v989_v22  ;;  %4443 = vmatpush.msk.msrb.mxu2 %vm1445_vm9, %v1417_v29  ;;  %v1361_v18 = vld [vmem:[#allocation2 + $0xf0] sm:$0xff] }
 0x1f1   :  { %1632 = vmatpush.msrb.mxu1 %v1355_v23  ;;  %v1342_v23 = vld [vmem:[#allocation2 + $0x58] sm:$0xff] }
 0x1f2   :  { %v960_v7 = vpop.permute.xlu0 %959  ;;  %1610 = vmatpush.msra.mxu0 %v1335_v55 }
 0x1f3   :  { %v987_v30 = vsel %vm977_vm8, %v958_v12, %v960_v7  ;;  %1633 = vmatpush.msrb.mxu1 %v1336_v41  ;;  %v988_v34 = vsel %vm977_vm8, %v960_v7, %v962_v8  ;;  %v1395_v49 = vld [vmem:[#allocation2 + $0x200] sm:$0xff]  ;;  %4426 = vmatmul.msk.f32.vlgmr.msra.gmra.mxu0 %vm1438_vm11, %v5346_v35 }
 0x1f4   :  { %1024 = vst [vmem:[#allocation2 + $0x210] sm:$0xf] %v987_v30  ;;  %1676 = vmatpush.msrb.mxu3 %v1395_v49  ;;  %4429 = vmatmul.msk.f32.vlgmr.msrb.gmra.mxu1 %vm1438_vm11, %v5346_v35 }
 0x1f5   :  { %1025 = vst [vmem:[#allocation2 + $0x218] sm:$0xf] %v988_v34  ;;  %4433 = vmatmul.msk.f32.gmra.mxu2 %vm1438_vm11, %v5363_v42  ;;  %v5437_v62 = vpop.permute.xlu2 %1115 }
 0x1f6   :  { %1677 = vmatpush.msrb.mxu3 %v1376_v39  ;;  %v1253_v56 = vpop.permute.xlu1 %1252 }
 0x1f7   :  { %v1281_v59 = vsel %vm1272_vm7, %v5392_v43, %v1253_v56  ;;  %v1282_v27 = vsel %vm1272_vm7, %v1253_v56, %v1255_v61 }
 0x1f8   :  { %1678 = vmatpush.msrb.mxu3 %v1357_v25  ;;  %1318 = vst [vmem:[#allocation2 + $0x2a0] sm:$0xf] %v1281_v59  ;;  %v1345_v59 = vld [vmem:[#allocation2 + $0x70] sm:$0xff] }
 0x1f9   :  { %1319 = vst [vmem:[#allocation2 + $0x2a8] sm:$0xf] %v1282_v27 }
 0x1fa   :  { %v1110_v14 = vpop.permute.xlu0 %1109  ;;  %1679 = vmatpush.msrb.mxu3 %v1338_v2 }
 0x1fb   :  { %v1136_v6 = vsel %vm1125_vm10, %v5381_v44, %v1110_v14  ;;  %4435 = vmatmul.msk.f32.vlgmr.msrb.gmra.mxu3 %vm1438_vm11, %v5346_v35  ;;  %4427 = vmatmul.msk.f32.gmra.mxu0 %vm1438_vm11, %v5363_v42 }
 0x1fc   :  { %1173 = vst [vmem:[#allocation2 + $0x218] sm:$0xf0] %v1136_v6  ;;  %4430 = vmatmul.msk.f32.gmra.mxu1 %vm1438_vm11, %v5363_v42 }
 0x1fd   :  { %v966_v11 = vpop.permute.xlu2 %965 }
 0x1fe   :  { %v5450_v28 = vpop.permute.xlu1 %1258  ;;  %v990_v47 = vsel %vm977_vm8, %v5405_v15, %v966_v11  ;;  %v1339_v15 = vld [vmem:[#allocation2 + $0x40] sm:$0xff] }
 0x1ff   :  { %v1415_v0 = vld [vmem:[#allocation2 + $0x2a0] sm:$0xf]  ;;  %1027 = vst [vmem:[#allocation2 + $0x228] sm:$0xf] %v990_v47  ;;  %v1284_v19 = vsel %vm1272_vm7, %v5371_v10, %v5450_v28  ;;  %v1381_v47 = vld [vmem:[#allocation2 + $0x190] sm:$0xff] }
 0x200   :  { %4437 = vmatpush.msk.msrb.mxu0 %vm1445_vm9, %v1415_v0  ;;  %v1416_v31 = vld [vmem:[#allocation2 + $0x2a8] sm:$0xf]  ;;  %1321 = vst [vmem:[#allocation2 + $0x2b8] sm:$0xf] %v1284_v19  ;;  %v1382_v0 = vld [vmem:[#allocation2 + $0x198] sm:$0xff]  ;;  %v1343_v19 = vld [vmem:[#allocation2 + $0x60] sm:$0xff] }
 0x201   :  { %4440 = vmatpush.msk.msra.mxu1 %vm1445_vm9, %v1416_v31 }
 0x202   :  { %v1106_v36 = vpop.permute.xlu0 %1105 }
 0x203   :  { %v1134_v45 = vsel %vm1125_vm10, %v5407_v51, %v1106_v36  ;;  %v1135_v52 = vsel %vm1125_vm10, %v1106_v36, %v5381_v44  ;;  %v1398_v38 = vld [vmem:[#allocation2 + $0x218] sm:$0xff]  ;;  %4436 = vmatmul.msk.f32.gmra.mxu3 %vm1438_vm11, %v5363_v42  ;;  %v1379_v44 = vld [vmem:[#allocation2 + $0x180] sm:$0xff]  ;;  %v1340_v51 = vld [vmem:[#allocation2 + $0x48] sm:$0xff] }
 0x204   :  { %1171 = vst [vmem:[#allocation2 + $0x208] sm:$0xf0] %v1134_v45  ;;  %1745 = vmatpush.msrb.mxu2 %v1398_v38  ;;  %v1362_v45 = vld [vmem:[#allocation2 + $0xf8] sm:$0xff] }
 0x205   :  { %1172 = vst [vmem:[#allocation2 + $0x210] sm:$0xf0] %v1135_v52  ;;  %v5471_v10 = vpop.permute.xlu2 %971  ;;  %v1363_v52 = vld [vmem:[#allocation2 + $0x100] sm:$0xff] }
 0x206   :  { %1746 = vmatpush.msrb.mxu2 %v1379_v44  ;;  %v1263_v12 = vpop.permute.xlu1 %1262 }
 0x207   :  { %v1287_v1 = vsel %vm1272_vm7, %v1263_v12, %v5416_v26  ;;  %v1418_v53 = vld [vmem:[#allocation2 + $0x2b8] sm:$0xf] }
 0x208   :  { %1747 = vmatpush.msrb.mxu2 %v1360_v4  ;;  %1324 = vst [vmem:[#allocation2 + $0x2d0] sm:$0xf] %v1287_v1  ;;  %4446 = vmatpush.msk.msra.mxu3 %vm1445_vm9, %v1418_v53  ;;  %v1344_v4 = vld [vmem:[#allocation2 + $0x68] sm:$0xff] }
 0x209   :  { %v1384_v1 = vld [vmem:[#allocation2 + $0x1a8] sm:$0xff] }
 0x20a   :  { %v5473_v43 = vpop.permute.xlu0 %1111  ;;  %1748 = vmatpush.msrb.mxu2 %v1341_v3 }
 0x20b   :  { %v1137_v54 = vsel %vm1125_vm10, %v1110_v14, %v5473_v43  ;;  %v1396_v32 = vld [vmem:[#allocation2 + $0x208] sm:$0xff]  ;;  %4444 = vmatmul.msk.f32.vlgmr.msrb.gmra.mxu2 %vm1438_vm11, %v5346_v35  ;;  %v1383_v14 = vld [vmem:[#allocation2 + $0x1a0] sm:$0xff] }
 0x20c   :  { %1174 = vst [vmem:[#allocation2 + $0x220] sm:$0xf0] %v1137_v54  ;;  %1699 = vmatpush.msrb.mxu0 %v1396_v32  ;;  %v1397_v16 = vld [vmem:[#allocation2 + $0x210] sm:$0xff]  ;;  %v1346_v32 = vld [vmem:[#allocation2 + $0x78] sm:$0xff] }
 0x20d   :  { %1722 = vmatpush.msra.mxu1 %v1397_v16  ;;  %v5482_v13 = vpop.permute.xlu2 %975  ;;  %v1365_v54 = vld [vmem:[#allocation2 + $0x110] sm:$0xff] }
 0x20e   :  { %1700 = vmatpush.msrb.mxu0 %v1377_v24  ;;  %v970_v48 = vpop.permute.xlu1 %969  ;;  %1033 = vst.msk [vmem:[#allocation2 + $0x258] sm:$0xf] %vm146_vm2, %v5482_v13 }
 0x20f   :  { %1723 = vmatpush.msra.mxu1 %v1378_v50  ;;  %v993_v9 = vsel %vm977_vm8, %v970_v48, %v5471_v10  ;;  %v1421_v37 = vld [vmem:[#allocation2 + $0x2d0] sm:$0xf] }
 0x210   :  { %1701 = vmatpush.msrb.mxu0 %v1358_v17  ;;  %1030 = vst [vmem:[#allocation2 + $0x240] sm:$0xf] %v993_v9  ;;  %4455 = vmatpush.msk.msra.mxu2 %vm1445_vm9, %v1421_v37 }
 0x211   :  { %1724 = vmatpush.msra.mxu1 %v1359_v5 }
 0x212   :  { %v968_v61 = vpop.permute.xlu0 %967  ;;  %1702 = vmatpush.msrb.mxu0 %v1339_v15 }
 0x213   :  { %v991_v33 = vsel %vm977_vm8, %v966_v11, %v968_v61  ;;  %1725 = vmatpush.msra.mxu1 %v1340_v51  ;;  %v992_v46 = vsel %vm977_vm8, %v968_v61, %v970_v48  ;;  %4438 = vmatmul.msk.f32.vlgmr.msrb.gmra.mxu0 %vm1438_vm11, %v5346_v35  ;;  %v1399_v58 = vld [vmem:[#allocation2 + $0x220] sm:$0xff]  ;;  %v1349_v51 = vld [vmem:[#allocation2 + $0x90] sm:$0xff] }
 0x214   :  { %1028 = vst [vmem:[#allocation2 + $0x230] sm:$0xf] %v991_v33  ;;  %1768 = vmatpush.msra.mxu3 %v1399_v58  ;;  %4441 = vmatmul.msk.f32.vlgmr.msra.gmra.mxu1 %vm1438_vm11, %v5346_v35  ;;  %v1385_v33 = vld [vmem:[#allocation2 + $0x1b0] sm:$0xff]  ;;  %v1366_v58 = vld [vmem:[#allocation2 + $0x118] sm:$0xff] }
 0x215   :  { %1029 = vst [vmem:[#allocation2 + $0x238] sm:$0xf] %v992_v46  ;;  %4445 = vmatmul.msk.f32.gmra.mxu2 %vm1438_vm11, %v5363_v42  ;;  %v829_v21 = vpop.permute.xlu2 %828 }
 0x216   :  { %1769 = vmatpush.msra.mxu3 %v1380_v60  ;;  %v1261_v55 = vpop.permute.xlu1 %1260  ;;  %v848_v7 = vsel %vm830_vm6, %v5301_v20, %v829_v21  ;;  %886 = vst.msk [vmem:[#allocation2 + $0x1c0] sm:$0xf0] %vm295_vm3, %v829_v21  ;;  %v1367_v60 = vld [vmem:[#allocation2 + $0x120] sm:$0xff]  ;;  %v1348_v21 = vld [vmem:[#allocation2 + $0x88] sm:$0xff] }
 0x217   :  { %v1285_v41 = vsel %vm1272_vm7, %v5450_v28, %v1261_v55  ;;  %885 = vst [vmem:[#allocation2 + $0x1b8] sm:$0xf0] %v848_v7  ;;  %v1286_v29 = vsel %vm1272_vm7, %v1261_v55, %v1263_v12 }
 0x218   :  { %1770 = vmatpush.msra.mxu3 %v1361_v18  ;;  %1322 = vst [vmem:[#allocation2 + $0x2c0] sm:$0xf] %v1285_v41  ;;  %v1347_v18 = vld [vmem:[#allocation2 + $0x80] sm:$0xff] }
 0x219   :  { %1323 = vst [vmem:[#allocation2 + $0x2c8] sm:$0xf] %v1286_v29 }
 0x21a   :  { %v1118_v8 = vpop.permute.xlu0 %1117  ;;  %1771 = vmatpush.msra.mxu3 %v1342_v23 }
 0x21b   :  { %v1140_v22 = vsel %vm1125_vm10, %v5437_v62, %v1118_v8  ;;  %4439 = vmatmul.msk.f32.gmra.mxu0 %vm1438_vm11, %v5363_v42  ;;  %4447 = vmatmul.msk.f32.vlgmr.msra.gmra.mxu3 %vm1438_vm11, %v5346_v35 }
 0x21c   :  { %1177 = vst [vmem:[#allocation2 + $0x238] sm:$0xf0] %v1140_v22  ;;  %4442 = vmatmul.msk.f32.gmra.mxu1 %vm1438_vm11, %v5363_v42 }
 0x21e   :  { %v1267_v20 = vpop.permute.xlu1 %1266  ;;  %v1386_v46 = vld [vmem:[#allocation2 + $0x1b8] sm:$0xff] }
 0x21f   :  { %v1288_v34 = vsel %vm1272_vm7, %v5416_v26, %v1267_v20  ;;  %v1419_v2 = vld [vmem:[#allocation2 + $0x2c0] sm:$0xf]  ;;  %v1364_v26 = vld [vmem:[#allocation2 + $0x108] sm:$0xff] }
 0x220   :  { %1325 = vst [vmem:[#allocation2 + $0x2d8] sm:$0xf] %v1288_v34  ;;  %4449 = vmatpush.msk.msra.mxu0 %vm1445_vm9, %v1419_v2  ;;  %v1420_v56 = vld [vmem:[#allocation2 + $0x2c8] sm:$0xf] }
 0x221   :  { %4452 = vmatpush.msk.msrb.mxu1 %vm1445_vm9, %v1420_v56 }
 0x222   :  { %v1114_v30 = vpop.permute.xlu0 %1113 }
 0x223   :  { %v1138_v49 = vsel %vm1125_vm10, %v5473_v43, %v1114_v30  ;;  %v1139_v39 = vsel %vm1125_vm10, %v1114_v30, %v5437_v62  ;;  %4448 = vmatmul.msk.f32.gmra.mxu3 %vm1438_vm11, %v5363_v42  ;;  %v1402_v25 = vld [vmem:[#allocation2 + $0x238] sm:$0xff] }
 0x224   :  { %1175 = vst [vmem:[#allocation2 + $0x228] sm:$0xf0] %v1138_v49  ;;  %1837 = vmatpush.msra.mxu2 %v1402_v25 }
 0x225   :  { %1176 = vst [vmem:[#allocation2 + $0x230] sm:$0xf0] %v1139_v39 }
 0x226   :  { %1838 = vmatpush.msra.mxu2 %v1383_v14  ;;  %v1271_v62 = vpop.permute.xlu1 %1270 }
 0x227   :  { %1328 = vst.msk [vmem:[#allocation2 + $0x2f0] sm:$0xf] %vm146_vm2, %v1271_v62  ;;  %v1422_v6 = vld [vmem:[#allocation2 + $0x2d8] sm:$0xf] }
 0x228   :  { %1839 = vmatpush.msra.mxu2 %v1364_v26  ;;  %4458 = vmatpush.msk.msrb.mxu3 %vm1445_vm9, %v1422_v6 }
 0x22a   :  { %v1120_v27 = vpop.permute.xlu0 %1119  ;;  %1840 = vmatpush.msra.mxu2 %v1345_v59 }
 0x22b   :  { %v1141_v11 = vsel %vm1125_vm10, %v1118_v8, %v1120_v27  ;;  %v1400_v28 = vld [vmem:[#allocation2 + $0x228] sm:$0xff]  ;;  %4456 = vmatmul.msk.f32.vlgmr.msra.gmra.mxu2 %vm1438_vm11, %v5346_v35 }
 0x22c   :  { %1178 = vst [vmem:[#allocation2 + $0x240] sm:$0xf0] %v1141_v11  ;;  %1791 = vmatpush.msra.mxu0 %v1400_v28  ;;  %v1401_v36 = vld [vmem:[#allocation2 + $0x230] sm:$0xff] }
 0x22d   :  { %1814 = vmatpush.msrb.mxu1 %v1401_v36 }
 0x22e   :  { %1792 = vmatpush.msra.mxu0 %v1381_v47  ;;  %v1269_v38 = vpop.permute.xlu1 %1268  ;;  %v1425_v31 = vld [vmem:[#allocation2 + $0x2f0] sm:$0xf] }
 0x22f   :  { %1815 = vmatpush.msrb.mxu1 %v1382_v0  ;;  %v1289_v3 = vsel %vm1272_vm7, %v1267_v20, %v1269_v38  ;;  %v1290_v12 = vsel %vm1272_vm7, %v1269_v38, %v1271_v62  ;;  %4467 = vmatpush.msk.msrb.mxu2 %vm1445_vm9, %v1425_v31  ;;  %v7279_v20 = vmov 2  }
 0x230   :  { %1793 = vmatpush.msra.mxu0 %v1362_v45  ;;  %1326 = vst [vmem:[#allocation2 + $0x2e0] sm:$0xf] %v1289_v3  ;;  %4510 = vset.pattern.permute.xlu1 %v7279_v20 }
 0x231   :  { %1816 = vmatpush.msrb.mxu1 %v1363_v52  ;;  %1327 = vst [vmem:[#allocation2 + $0x2e8] sm:$0xf] %v1290_v12  ;;  %4509 = vset.pattern.permute.xlu0 %v7279_v20  ;;  %v5566_v30 = vpop.permute.xlu2 %1430 }
 0x232   :  { %v1124_v44 = vpop.permute.xlu0 %1123  ;;  %1794 = vmatpush.msra.mxu0 %v1343_v19  ;;  %2303 = vperm.xlu1 %4510, %v5427_v63  }
 0x233   :  { %1181 = vst.msk [vmem:[#allocation2 + $0x258] sm:$0xf0] %vm295_vm3, %v1124_v44  ;;  %1817 = vmatpush.msrb.mxu1 %v1344_v4  ;;  %4450 = vmatmul.msk.f32.vlgmr.msra.gmra.mxu0 %vm1438_vm11, %v5346_v35  ;;  %v1403_v43 = vld [vmem:[#allocation2 + $0x240] sm:$0xff] }
 0x234   :  { %4453 = vmatmul.msk.f32.vlgmr.msrb.gmra.mxu1 %vm1438_vm11, %v5346_v35  ;;  %1860 = vmatpush.msrb.mxu3 %v1403_v43 }
 0x235   :  { %4457 = vmatmul.msk.f32.gmra.mxu2 %vm1438_vm11, %v5363_v42  ;;  %2299 = vperm.xlu0 %4509, %v5457_v40  }
 0x236   :  { %1861 = vmatpush.msrb.mxu3 %v1384_v1 }
 0x237   :  { %v1122_v16 = vpop.permute.xlu1 %1121  ;;  %v1423_v48 = vld [vmem:[#allocation2 + $0x2e0] sm:$0xf] }
 0x238   :  { %1862 = vmatpush.msrb.mxu3 %v1365_v54  ;;  %v1142_v24 = vsel %vm1125_vm10, %v1120_v27, %v1122_v16  ;;  %v1143_v15 = vsel %vm1125_vm10, %v1122_v16, %v1124_v44  ;;  %4461 = vmatpush.msk.msrb.mxu0 %vm1445_vm9, %v1423_v48  ;;  %v1424_v61 = vld [vmem:[#allocation2 + $0x2e8] sm:$0xf] }
 0x239   :  { %1179 = vst [vmem:[#allocation2 + $0x248] sm:$0xf0] %v1142_v24  ;;  %4464 = vmatpush.msk.msra.mxu1 %vm1445_vm9, %v1424_v61 }
 0x23a   :  { %v974_v53 = vpop.permute.xlu0 %973  ;;  %1863 = vmatpush.msrb.mxu3 %v1346_v32  ;;  %v1406_v50 = vld [vmem:[#allocation2 + $0x258] sm:$0xff]  ;;  %1180 = vst [vmem:[#allocation2 + $0x250] sm:$0xf0] %v1143_v15 }
 0x23b   :  { %v994_v17 = vsel %vm977_vm8, %v5471_v10, %v974_v53  ;;  %v995_v5 = vsel %vm977_vm8, %v974_v53, %v5482_v13  ;;  %4451 = vmatmul.msk.f32.gmra.mxu0 %vm1438_vm11, %v5363_v42  ;;  %4459 = vmatmul.msk.f32.vlgmr.msrb.gmra.mxu3 %vm1438_vm11, %v5346_v35  ;;  %v1387_v10 = vld [vmem:[#allocation2 + $0x1c0] sm:$0xff]  ;;  %v1368_v13 = vld [vmem:[#allocation2 + $0x128] sm:$0xff] }
 0x23c   :  { %1031 = vst [vmem:[#allocation2 + $0x248] sm:$0xf] %v994_v17  ;;  %1929 = vmatpush.msrb.mxu2 %v1406_v50  ;;  %4454 = vmatmul.msk.f32.gmra.mxu1 %vm1438_vm11, %v5363_v42 }
 0x23d   :  { %1032 = vst [vmem:[#allocation2 + $0x250] sm:$0xf] %v995_v5 }
 0x23e   :  { %1930 = vmatpush.msrb.mxu2 %v1387_v10 }
 0x240   :  { %1931 = vmatpush.msrb.mxu2 %v1368_v13 }
 0x242   :  { %1932 = vmatpush.msrb.mxu2 %v1349_v51 }
 0x243   :  { %4468 = vmatmul.msk.f32.vlgmr.msrb.gmra.mxu2 %vm1438_vm11, %v5346_v35  ;;  %4460 = vmatmul.msk.f32.gmra.mxu3 %vm1438_vm11, %v5363_v42  ;;  %v1404_v9 = vld [vmem:[#allocation2 + $0x248] sm:$0xff] }
 0x244   :  { %1883 = vmatpush.msrb.mxu0 %v1404_v9  ;;  %v1405_v37 = vld [vmem:[#allocation2 + $0x250] sm:$0xff] }
 0x245   :  { %1906 = vmatpush.msra.mxu1 %v1405_v37 }
 0x246   :  { %1884 = vmatpush.msrb.mxu0 %v1385_v33  ;;  %v1520_v23 = vpop.f32.mrf.mxu2 }
 0x247   :  { %1907 = vmatpush.msra.mxu1 %v1386_v46  ;;  %v5576_v34 = vadd.f32 %v1520_v23, %v5566_v30 }
 0x248   :  { %1885 = vmatpush.msrb.mxu0 %v1366_v58  ;;  %v1543_v7 = vpop.f32.mrf.mxu1 }
 0x249   :  { %1908 = vmatpush.msra.mxu1 %v1367_v60  ;;  %v5579_v49 = vadd.f32 %v1543_v7, %v5566_v30  ;;  %v2064_v26 = vmul.f32 %v5576_v34, %v5576_v34 }
 0x24a   :  { %1886 = vmatpush.msrb.mxu0 %v1347_v18 }
 0x24b   :  { %4462 = vmatmul.msk.f32.vlgmr.msrb.gmra.mxu0 %vm1438_vm11, %v5346_v35  ;;  %4469 = vmatmul.msk.f32.gmra.mxu2 %vm1438_vm11, %v5363_v42  ;;  %v2065_v59 = vmul.f32 %v5579_v49, %v5579_v49 }
 0x24c   :  { %1909 = vmatpush.msra.mxu1 %v1348_v21 }
 0x24d   :  { %4465 = vmatmul.msk.f32.vlgmr.msra.gmra.mxu1 %vm1438_vm11, %v5346_v35 }
 0x24e   :  { %v1523_v55 = vpop.f32.mrf.mxu2 }
 0x250   :  { %v1546_v29 = vpop.f32.mrf.mxu1 }
 0x253   :  { %4463 = vmatmul.msk.f32.gmra.mxu0 %vm1438_vm11, %v5363_v42 }
 0x255   :  { %4466 = vmatmul.msk.f32.gmra.mxu1 %vm1438_vm11, %v5363_v42  ;;  %v5573_v42 = vld [vmem:[%s7277_s5] sm:$0xff]  ;;  %vm2382_vm11 = vcmask 285696  }
 0x256   :  { %v1566_v8 = vpop.f32.mrf.mxu2  ;;  %v5582_v25 = vperm.slane %v5573_v42, 0  ;;  %v5585_v63 = vperm.slane %v5573_v42, 1  ;;  %v5587_v2 = vpop.permute.xlu0 %1435  ;;  %v5603_v6 = vperm.slane %v5573_v42, 2  ;;  %v5624_v44 = vperm.slane %v5573_v42, 3 }
 0x257   :  { %v5590_v14 = vadd.f32 %v1566_v8, %v5566_v30  ;;  %v5597_v62 = vadd.f32 %v1523_v55, %v5587_v2  ;;  %v5600_v27 = vadd.f32 %v1546_v29, %v5587_v2  ;;  %v5648_v13 = vperm.slane %v5573_v42, 4 }
 0x258   :  { %v1981_v11 = vmul.f32 %v5582_v25, %v5576_v34  ;;  %v1982_v28 = vmul.f32 %v5585_v63, %v5579_v49  ;;  %v2102_v0 = vmul.f32 %v2064_v26, %v5582_v25  ;;  %v2103_v45 = vmul.f32 %v2065_v59, %v5585_v63 }
 0x259   :  { %7328 = vst [vmem:[#allocation14_spill] sm:$0xff] %v5597_v62  ;;  %v2066_v47 = vmul.f32 %v5590_v14, %v5590_v14  ;;  %v2083_v38 = vmul.f32 %v5597_v62, %v5597_v62  ;;  %v2084_v31 = vmul.f32 %v5600_v27, %v5600_v27  ;;  %v1983_v4 = vmul.f32 %v5603_v6, %v5590_v14 }
 0x25a   :  { %7329 = vst [vmem:[#allocation15_spill] sm:$0xff] %v5600_v27  ;;  %v2019_v3 = vadd.f32 %v1982_v28, %v1981_v11  ;;  %v2000_v43 = vmul.f32 %v5582_v25, %v5597_v62  ;;  %v2001_v1 = vmul.f32 %v5585_v63, %v5600_v27  ;;  %v2140_v53 = vadd.f32 %v2103_v45, %v2102_v0 }
 0x25b   :  { %v2104_v16 = vmul.f32 %v2066_v47, %v5603_v6  ;;  %v2121_v5 = vmul.f32 %v2083_v38, %v5582_v25  ;;  %v2122_v15 = vmul.f32 %v2084_v31, %v5585_v63  ;;  %v5665_v8 = vperm.slane %v5573_v42, 5 }
 0x25c   :  { %v2020_v10 = vadd.f32 %v2019_v3, %v1983_v4  ;;  %v2041_v9 = vadd.f32 %v2001_v1, %v2000_v43  ;;  %v5684_v0 = vperm.slane %v5573_v42, 6 }
 0x25d   :  { %v2141_v46 = vadd.f32 %v2140_v53, %v2104_v16  ;;  %v2161_v23 = vadd.f32 %v2122_v15, %v2121_v5 }
 0x25e   :  { %v1569_v41 = vpop.f32.mrf.mxu2  ;;  %v1589_v22 = vpop.f32.mrf.mxu3 }
 0x25f   :  { %v5610_v36 = vadd.f32 %v1589_v22, %v5566_v30  ;;  %v5617_v19 = vadd.f32 %v1569_v41, %v5587_v2 }
 0x261   :  { %7330 = vst [vmem:[#allocation16_spill] sm:$0xff] %v5617_v19  ;;  %v2067_v32 = vmul.f32 %v5610_v36, %v5610_v36  ;;  %v2085_v17 = vmul.f32 %v5617_v19, %v5617_v19  ;;  %v1984_v61 = vmul.f32 %v5624_v44, %v5610_v36  ;;  %v2002_v51 = vmul.f32 %v5603_v6, %v5617_v19 }
 0x263   :  { %v2105_v33 = vmul.f32 %v2067_v32, %v5624_v44  ;;  %v2123_v21 = vmul.f32 %v2085_v17, %v5603_v6  ;;  %v2021_v55 = vadd.f32 %v2020_v10, %v1984_v61 }
 0x265   :  { %v2162_v47 = vadd.f32 %v2161_v23, %v2123_v21 }
 0x266   :  { %v1592_v40 = vpop.f32.mrf.mxu3 }
 0x267   :  { %v5639_v50 = vadd.f32 %v1592_v40, %v5587_v2 }
 0x269   :  { %7331 = vst [vmem:[#allocation17_spill] sm:$0xff] %v5639_v50  ;;  %v2086_v18 = vmul.f32 %v5639_v50, %v5639_v50  ;;  %v2003_v29 = vmul.f32 %v5624_v44, %v5639_v50 }
 0x26b   :  { %v2124_v28 = vmul.f32 %v2086_v18, %v5624_v44 }
 0x26d   :  { %v2163_v17 = vadd.f32 %v2162_v47, %v2124_v28 }
 0x26e   :  { %v1658_v39 = vpop.f32.mrf.mxu2 }
 0x26f   :  { %v5670_v22 = vadd.f32 %v1658_v39, %v5566_v30 }
 0x270   :  { %v1612_v35 = vpop.f32.mrf.mxu0 }
 0x271   :  { %v1635_v56 = vpop.f32.mrf.mxu1  ;;  %v5633_v54 = vadd.f32 %v1612_v35, %v5566_v30  ;;  %v2042_v35 = vadd.f32 %v2041_v9, %v2002_v51  ;;  %v2070_v31 = vmul.f32 %v5670_v22, %v5670_v22  ;;  %v1987_v10 = vmul.f32 %v5684_v0, %v5670_v22 }
 0x272   :  { %v5656_v58 = vadd.f32 %v1635_v56, %v5566_v30  ;;  %v2142_v56 = vadd.f32 %v2141_v46, %v2105_v33 }
 0x273   :  { %v2068_v37 = vmul.f32 %v5633_v54, %v5633_v54  ;;  %v1985_v41 = vmul.f32 %v5648_v13, %v5633_v54  ;;  %v2043_v4 = vadd.f32 %v2042_v35, %v2003_v29  ;;  %v2108_v51 = vmul.f32 %v2070_v31, %v5684_v0 }
 0x274   :  { %v2069_v26 = vmul.f32 %v5656_v58, %v5656_v58  ;;  %v1986_v38 = vmul.f32 %v5665_v8, %v5656_v58 }
 0x275   :  { %v2106_v40 = vmul.f32 %v2068_v37, %v5648_v13 }
 0x276   :  { %v2107_v1 = vmul.f32 %v2069_v26, %v5665_v8 }
 0x277   :  { %v2143_v43 = vadd.f32 %v2142_v56, %v2106_v40 }
 0x278   :  { %v1615_v52 = vpop.f32.mrf.mxu0  ;;  %v1661_v12 = vpop.f32.mrf.mxu2 }
 0x279   :  { %v1638_v48 = vpop.f32.mrf.mxu1  ;;  %v5659_v60 = vadd.f32 %v1615_v52, %v5587_v2  ;;  %v2022_v52 = vadd.f32 %v2021_v55, %v1985_v41  ;;  %v5694_v16 = vadd.f32 %v1661_v12, %v5587_v2  ;;  %v5711_v12 = vld [vmem:[%s7277_s5 + $0x8] sm:$0xff]  ;;  %v2144_v37 = vadd.f32 %v2143_v43, %v2107_v1 }
 0x27a   :  { %v5681_v39 = vadd.f32 %v1638_v48, %v5587_v2  ;;  %v5703_v48 = vperm.slane %v5573_v42, 7  ;;  %v5748_v1 = vperm.slane %v5711_v12, 1 }
 0x27b   :  { %7332 = vst [vmem:[#allocation18_spill] sm:$0xff] %v5659_v60  ;;  %v2087_v11 = vmul.f32 %v5659_v60, %v5659_v60  ;;  %v2004_v32 = vmul.f32 %v5648_v13, %v5659_v60  ;;  %v2023_v61 = vadd.f32 %v2022_v52, %v1986_v38  ;;  %v2089_v33 = vmul.f32 %v5694_v16, %v5694_v16 }
 0x27c   :  { %7333 = vst [vmem:[#allocation19_spill] sm:$0xff] %v5681_v39  ;;  %v2088_v5 = vmul.f32 %v5681_v39, %v5681_v39  ;;  %v2005_v42 = vmul.f32 %v5665_v8, %v5681_v39  ;;  %v2006_v40 = vmul.f32 %v5684_v0, %v5694_v16 }
 0x27d   :  { %7334 = vst [vmem:[#allocation20_spill] sm:$0xff] %v5694_v16  ;;  %v2125_v53 = vmul.f32 %v2087_v11, %v5648_v13  ;;  %v2024_v35 = vadd.f32 %v2023_v61, %v1987_v10  ;;  %v2145_v11 = vadd.f32 %v2144_v37, %v2108_v51  ;;  %v2127_v38 = vmul.f32 %v2089_v33, %v5684_v0 }
 0x27e   :  { %v1681_v24 = vpop.f32.mrf.mxu3  ;;  %v2126_v21 = vmul.f32 %v2088_v5, %v5665_v8  ;;  %7338 = vst [vmem:[#allocation24_spill] sm:$0xff] %v5748_v1  ;;  %v5757_v5 = vperm.slane %v5711_v12, 2 }
 0x27f   :  { %v5700_v15 = vadd.f32 %v1681_v24, %v5566_v30  ;;  %v2044_v24 = vadd.f32 %v2043_v4, %v2004_v32  ;;  %v2164_v18 = vadd.f32 %v2163_v17, %v2125_v53 }
 0x280   :  { %7339 = vst [vmem:[#allocation25_spill] sm:$0xff] %v5757_v5 }
 0x281   :  { %v2071_v23 = vmul.f32 %v5700_v15, %v5700_v15  ;;  %v2045_v28 = vadd.f32 %v2044_v24, %v2005_v42  ;;  %v1988_v47 = vmul.f32 %v5703_v48, %v5700_v15  ;;  %v2165_v52 = vadd.f32 %v2164_v18, %v2126_v21 }
 0x283   :  { %v2109_v31 = vmul.f32 %v2071_v23, %v5703_v48  ;;  %v2046_v61 = vadd.f32 %v2045_v28, %v2006_v40  ;;  %v2025_v10 = vadd.f32 %v2024_v35, %v1988_v47  ;;  %v2166_v42 = vadd.f32 %v2165_v52, %v2127_v38 }
 0x286   :  { %v1684_v45 = vpop.f32.mrf.mxu3 }
 0x287   :  { %v5724_v55 = vadd.f32 %v1684_v45, %v5587_v2 }
 0x289   :  { %7335 = vst [vmem:[#allocation21_spill] sm:$0xff] %v5724_v55  ;;  %v2090_v4 = vmul.f32 %v5724_v55, %v5724_v55  ;;  %v2007_v33 = vmul.f32 %v5703_v48, %v5724_v55 }
 0x28e   :  { %v1750_v59 = vpop.f32.mrf.mxu2 }
 0x28f   :  { %v5751_v32 = vadd.f32 %v1750_v59, %v5566_v30  ;;  %v2146_v59 = vadd.f32 %v2145_v11, %v2109_v31 }
 0x290   :  { %v1704_v7 = vpop.f32.mrf.mxu0 }
 0x291   :  { %v1727_v3 = vpop.f32.mrf.mxu1  ;;  %v5714_v9 = vadd.f32 %v1704_v7, %v5566_v30  ;;  %v5727_v7 = vperm.slane %v5711_v12, 0  ;;  %v2074_v23 = vmul.f32 %v5751_v32, %v5751_v32 }
 0x292   :  { %v5734_v26 = vadd.f32 %v1727_v3, %v5566_v30 }
 0x293   :  { %7336 = vst [vmem:[#allocation22_spill] sm:$0xff] %v5727_v7  ;;  %v2072_v56 = vmul.f32 %v5714_v9, %v5714_v9  ;;  %v1989_v3 = vmul.f32 %v5727_v7, %v5714_v9 }
 0x294   :  { %v2073_v17 = vmul.f32 %v5734_v26, %v5734_v26  ;;  %v1990_v21 = vmul.f32 %v5748_v1, %v5734_v26 }
 0x295   :  { %v2110_v53 = vmul.f32 %v2072_v56, %v5727_v7  ;;  %v2026_v18 = vadd.f32 %v2025_v10, %v1989_v3  ;;  %v5787_v3 = vperm.slane %v5711_v12, 3  ;;  %v5795_v10 = vperm.slane %v5711_v12, 4 }
 0x296   :  { %v2111_v28 = vmul.f32 %v2073_v17, %v5748_v1 }
 0x297   :  { %v2147_v56 = vadd.f32 %v2146_v59, %v2110_v53  ;;  %7342 = vst [vmem:[#allocation28_spill] sm:$0xff] %v5787_v3  ;;  %v1991_v53 = vmul.f32 %v5757_v5, %v5751_v32  ;;  %v2027_v59 = vadd.f32 %v2026_v18, %v1990_v21 }
 0x298   :  { %v1707_v46 = vpop.f32.mrf.mxu0  ;;  %v1753_v41 = vpop.f32.mrf.mxu2  ;;  %7343 = vst [vmem:[#allocation29_spill] sm:$0xff] %v5795_v10 }
 0x299   :  { %v5739_v45 = vadd.f32 %v1707_v46, %v5587_v2  ;;  %v1730_v43 = vpop.f32.mrf.mxu1  ;;  %v2128_v46 = vmul.f32 %v2090_v4, %v5703_v48  ;;  %v5778_v47 = vadd.f32 %v1753_v41, %v5587_v2  ;;  %v2112_v41 = vmul.f32 %v2074_v23, %v5757_v5 }
 0x29a   :  { %v5762_v37 = vadd.f32 %v1730_v43, %v5587_v2 }
 0x29b   :  { %7337 = vst [vmem:[#allocation23_spill] sm:$0xff] %v5739_v45  ;;  %v2091_v51 = vmul.f32 %v5739_v45, %v5739_v45  ;;  %v2008_v11 = vmul.f32 %v5727_v7, %v5739_v45  ;;  %v2167_v43 = vadd.f32 %v2166_v42, %v2128_v46 }
 0x29c   :  { %7340 = vst [vmem:[#allocation26_spill] sm:$0xff] %v5762_v37  ;;  %v2092_v38 = vmul.f32 %v5762_v37, %v5762_v37 }
 0x29d   :  { %7341 = vst [vmem:[#allocation27_spill] sm:$0xff] %v5778_v47  ;;  %v2129_v52 = vmul.f32 %v2091_v51, %v5727_v7 }
 0x29e   :  { %v1773_v29 = vpop.f32.mrf.mxu3  ;;  %v2130_v46 = vmul.f32 %v2092_v38, %v5748_v1  ;;  %v2010_v38 = vmul.f32 %v5757_v5, %v5778_v47 }
 0x29f   :  { %v5772_v35 = vadd.f32 %v1773_v29, %v5566_v30  ;;  %v2047_v29 = vadd.f32 %v2046_v61, %v2007_v33  ;;  %v2093_v61 = vmul.f32 %v5778_v47, %v5778_v47  ;;  %v2168_v42 = vadd.f32 %v2167_v43, %v2129_v52 }
 0x2a0   :  { %v2009_v33 = vmul.f32 %v5748_v1, %v5762_v37 }
 0x2a1   :  { %v2075_v17 = vmul.f32 %v5772_v35, %v5772_v35  ;;  %v2048_v20 = vadd.f32 %v2047_v29, %v2008_v11  ;;  %v1992_v57 = vmul.f32 %v5787_v3, %v5772_v35  ;;  %v2028_v11 = vadd.f32 %v2027_v59, %v1991_v53 }
 0x2a2   :  { %v2169_v37 = vadd.f32 %v2168_v42, %v2130_v46  ;;  %v5835_v42 = vperm.slane %v5711_v12, 6 }
 0x2a3   :  { %v2113_v45 = vmul.f32 %v2075_v17, %v5787_v3  ;;  %v2049_v43 = vadd.f32 %v2048_v20, %v2009_v33  ;;  %v2131_v17 = vmul.f32 %v2093_v61, %v5757_v5  ;;  %v2029_v16 = vadd.f32 %v2028_v11, %v1992_v57 }
 0x2a4   :  { %7347 = vst [vmem:[#allocation33_spill] sm:$0xff] %v5835_v42  ;;  %v5844_v11 = vperm.slane %v5711_v12, 7 }
 0x2a6   :  { %v1776_v31 = vpop.f32.mrf.mxu3  ;;  %7348 = vst [vmem:[#allocation34_spill] sm:$0xff] %v5844_v11 }
 0x2a7   :  { %v5808_v18 = vadd.f32 %v1776_v31, %v5587_v2 }
 0x2a9   :  { %7344 = vst [vmem:[#allocation30_spill] sm:$0xff] %v5808_v18  ;;  %v2011_v59 = vmul.f32 %v5787_v3, %v5808_v18  ;;  %v2094_v57 = vmul.f32 %v5808_v18, %v5808_v18 }
 0x2ae   :  { %v1842_v40 = vpop.f32.mrf.mxu2 }
 0x2b0   :  { %v1796_v24 = vpop.f32.mrf.mxu0 }
 0x2b1   :  { %v5784_v4 = vadd.f32 %v1796_v24, %v5566_v30  ;;  %v1819_v51 = vpop.f32.mrf.mxu1  ;;  %v2148_v24 = vadd.f32 %v2147_v56, %v2111_v28 }
 0x2b2   :  { %v5811_v21 = vadd.f32 %v1819_v51, %v5566_v30  ;;  %v5820_v51 = vperm.slane %v5711_v12, 5 }
 0x2b3   :  { %v2076_v23 = vmul.f32 %v5784_v4, %v5784_v4  ;;  %v2149_v52 = vadd.f32 %v2148_v24, %v2112_v41  ;;  %v1993_v29 = vmul.f32 %v5795_v10, %v5784_v4  ;;  %v5828_v24 = vadd.f32 %v1842_v40, %v5566_v30 }
 0x2b4   :  { %7345 = vst [vmem:[#allocation31_spill] sm:$0xff] %v5820_v51  ;;  %v2077_v20 = vmul.f32 %v5811_v21, %v5811_v21  ;;  %v2050_v40 = vadd.f32 %v2049_v43, %v2010_v38  ;;  %v2132_v43 = vmul.f32 %v2094_v57, %v5787_v3 }
 0x2b5   :  { %v2114_v31 = vmul.f32 %v2076_v23, %v5795_v10  ;;  %v2150_v41 = vadd.f32 %v2149_v52, %v2113_v45  ;;  %v2030_v33 = vadd.f32 %v2029_v16, %v1993_v29  ;;  %v56_v45 = vld [vmem:[%s7277_s5 + $0x10] sm:$0x7]  ;;  %v2170_v23 = vadd.f32 %v2169_v37, %v2131_v17 }
 0x2b6   :  { %v1994_v52 = vmul.f32 %v5820_v51, %v5811_v21  ;;  %v2051_v29 = vadd.f32 %v2050_v40, %v2011_v59  ;;  %v2078_v37 = vmul.f32 %v5828_v24, %v5828_v24  ;;  %v2115_v38 = vmul.f32 %v2077_v20, %v5820_v51 }
 0x2b7   :  { %v5858_v12 = vperm.slane %v56_v45, 2  ;;  %v5870_v20 = vperm.slane %v56_v45, 1 }
 0x2b8   :  { %v1799_v56 = vpop.f32.mrf.mxu0  ;;  %v1845_v28 = vpop.f32.mrf.mxu2  ;;  %v2031_v17 = vadd.f32 %v2030_v33, %v1994_v52  ;;  %v2116_v60 = vmul.f32 %v2078_v37, %v5835_v42 }
 0x2b9   :  { %v5823_v53 = vadd.f32 %v1799_v56, %v5587_v2  ;;  %v1822_v61 = vpop.f32.mrf.mxu1  ;;  %v2151_v56 = vadd.f32 %v2150_v41, %v2114_v31  ;;  %7350 = vst [vmem:[#allocation36_spill] sm:$0xff] %v5858_v12  ;;  %v5863_v41 = vperm.slane %v56_v45, 0  ;;  %v5868_v59 = vadd.f32 %v1845_v28, %v5587_v2 }
 0x2ba   :  { %7353 = vst [vmem:[#allocation39_spill] sm:$0xff] %v5870_v20  ;;  %v2171_v45 = vadd.f32 %v2170_v23, %v2132_v43 }
 0x2bb   :  { %7346 = vst [vmem:[#allocation32_spill] sm:$0xff] %v5823_v53  ;;  %v2012_v18 = vmul.f32 %v5795_v10, %v5823_v53  ;;  %v2095_v16 = vmul.f32 %v5823_v53, %v5823_v53  ;;  %v2152_v53 = vadd.f32 %v2151_v56, %v2115_v38  ;;  %v2097_v37 = vmul.f32 %v5868_v59, %v5868_v59 }
 0x2bc   :  { %7351 = vst [vmem:[#allocation37_spill] sm:$0xff] %v5863_v41 }
 0x2bd   :  { %7352 = vst [vmem:[#allocation38_spill] sm:$0xff] %v5868_v59  ;;  %v2052_v39 = vadd.f32 %v2051_v29, %v2012_v18  ;;  %v2133_v57 = vmul.f32 %v2095_v16, %v5795_v10  ;;  %v2153_v50 = vadd.f32 %v2152_v53, %v2116_v60 }
 0x2be   :  { %v1865_v55 = vpop.f32.mrf.mxu3 }
 0x2bf   :  { %v5838_v46 = vadd.f32 %v1865_v55, %v5566_v30  ;;  %v5853_v55 = vadd.f32 %v1822_v61, %v5587_v2  ;;  %v1995_v61 = vmul.f32 %v5835_v42, %v5828_v24  ;;  %v2172_v27 = vadd.f32 %v2171_v45, %v2133_v57 }
 0x2c1   :  { %7349 = vst [vmem:[#allocation35_spill] sm:$0xff] %v5853_v55  ;;  %v2079_v31 = vmul.f32 %v5838_v46, %v5838_v46  ;;  %v2013_v33 = vmul.f32 %v5820_v51, %v5853_v55  ;;  %v2096_v56 = vmul.f32 %v5853_v55, %v5853_v55  ;;  %v1996_v28 = vmul.f32 %v5844_v11, %v5838_v46 }
 0x2c2   :  { %v2032_v18 = vadd.f32 %v2031_v17, %v1995_v61 }
 0x2c3   :  { %v2117_v16 = vmul.f32 %v2079_v31, %v5844_v11  ;;  %v2053_v62 = vadd.f32 %v2052_v39, %v2013_v33 }
 0x2c4   :  { %v2033_v17 = vadd.f32 %v2032_v18, %v1996_v28 }
 0x2c5   :  { %v2154_v53 = vadd.f32 %v2153_v50, %v2117_v16 }
 0x2c6   :  { %v1934_v40 = vpop.f32.mrf.mxu2  ;;  %v1868_v47 = vpop.f32.mrf.mxu3 }
 0x2c7   :  { %v5876_v52 = vadd.f32 %v1934_v40, %v5566_v30  ;;  %v5885_v29 = vadd.f32 %v1868_v47, %v5587_v2  ;;  %v2014_v40 = vmul.f32 %v5835_v42, %v5868_v59  ;;  %v2134_v47 = vmul.f32 %v2096_v56, %v5820_v51 }
 0x2c8   :  { %v1888_v38 = vpop.f32.mrf.mxu0 }
 0x2c9   :  { %7354 = vst [vmem:[#allocation40_spill] sm:$0xff] %v5876_v52  ;;  %v5892_v55 = vadd.f32 %v1888_v38, %v5566_v30  ;;  %v2082_v23 = vmul.f32 %v5876_v52, %v5876_v52  ;;  %v1999_v61 = vmul.f32 %v5858_v12, %v5876_v52  ;;  %v2015_v39 = vmul.f32 %v5844_v11, %v5885_v29 }
 0x2ca   :  { %7355 = vst [vmem:[#allocation41_spill] sm:$0xff] %v5885_v29  ;;  %v1911_v19 = vpop.f32.mrf.mxu1  ;;  %v2054_v50 = vadd.f32 %v2053_v62, %v2014_v40  ;;  %v2135_v38 = vmul.f32 %v2097_v37, %v5835_v42  ;;  %v2173_v16 = vadd.f32 %v2172_v27, %v2134_v47 }
 0x2cb   :  { %v5897_v43 = vadd.f32 %v1911_v19, %v5566_v30  ;;  %v1997_v31 = vmul.f32 %v5863_v41, %v5892_v55  ;;  %v2080_v60 = vmul.f32 %v5892_v55, %v5892_v55  ;;  %v2098_v19 = vmul.f32 %v5885_v29, %v5885_v29 }
 0x2cc   :  { %v2120_v18 = vmul.f32 %v2082_v23, %v5858_v12  ;;  %v2037_v10 = vsel %vm2036_vm12, %v1999_v61, 0.0  ;;  %v2174_v61 = vadd.f32 %v2173_v16, %v2135_v38 }
 0x2cd   :  { %v2081_v30 = vmul.f32 %v5897_v43, %v5897_v43  ;;  %v2034_v57 = vadd.f32 %v2033_v17, %v1997_v31  ;;  %v2118_v33 = vmul.f32 %v2080_v60, %v5863_v41  ;;  %v1998_v56 = vmul.f32 %v5870_v20, %v5897_v43 }
 0x2ce   :  { %v1937_v28 = vpop.f32.mrf.mxu2  ;;  %v2055_v31 = vadd.f32 %v2054_v50, %v2015_v39  ;;  %v2136_v62 = vmul.f32 %v2098_v19, %v5844_v11 }
 0x2cf   :  { %v5917_v45 = vadd.f32 %v1937_v28, %v5587_v2  ;;  %v2119_v59 = vmul.f32 %v2081_v30, %v5870_v20  ;;  %v2035_v29 = vadd.f32 %v2034_v57, %v1998_v56  ;;  %v2155_v17 = vadd.f32 %v2154_v53, %v2118_v33 }
 0x2d0   :  { %v1891_v52 = vpop.f32.mrf.mxu0  ;;  %v2175_v57 = vadd.f32 %v2174_v61, %v2136_v62 }
 0x2d1   :  { %7356 = vst [vmem:[#allocation42_spill] sm:$0xff] %v5917_v45  ;;  %v5922_v60 = vadd.f32 %v1891_v52, %v5587_v2  ;;  %v2018_v37 = vmul.f32 %v5858_v12, %v5917_v45  ;;  %v2038_v28 = vadd.f32 %v2037_v10, %v2035_v29  ;;  %v2156_v23 = vadd.f32 %v2155_v17, %v2119_v59 }
 0x2d2   :  { %v1914_v40 = vpop.f32.mrf.mxu1  ;;  %v2157_v52 = vsel %vm2036_vm12, %v2120_v18, 0.0  ;;  %v2101_v29 = vmul.f32 %v5917_v45, %v5917_v45 }
 0x2d3   :  { %7357 = vst [vmem:[#allocation43_spill] sm:$0xff] %v5922_v60  ;;  %v2016_v27 = vmul.f32 %v5863_v41, %v5922_v60  ;;  %v2099_v47 = vmul.f32 %v5922_v60, %v5922_v60  ;;  %v5933_v53 = vadd.f32 %v1914_v40, %v5587_v2  ;;  %2039 = vadd.xlane.f32.xlu1 %v2038_v28  ;;  %v2058_v2 = vsel %vm2036_vm12, %v2018_v37, 0.0  ;;  %v5947_v40 = vpop.permute.xlu1 %2303  ;;  %v5949_v28 = vpop.permute.xlu0 %2299 }
 0x2d4   :  { %v2158_v39 = vadd.f32 %v2157_v52, %v2156_v23  ;;  %v2139_v18 = vmul.f32 %v2101_v29, %v5858_v12  ;;  %7359 = vst [vmem:[#allocation45_spill] sm:$0xff] %v5947_v40  ;;  %v7300_v23 = vmov 1  }
 0x2d5   :  { %7358 = vst [vmem:[#allocation44_spill] sm:$0xff] %v5933_v53  ;;  %v2056_v30 = vadd.f32 %v2055_v31, %v2016_v27  ;;  %v2137_v19 = vmul.f32 %v2099_v47, %v5863_v41  ;;  %v2017_v10 = vmul.f32 %v5870_v20, %v5933_v53  ;;  %v2100_v59 = vmul.f32 %v5933_v53, %v5933_v53 }
 0x2d6   :  { %2159 = vadd.xlane.f32.xlu0 %v2158_v39  ;;  %v2178_v17 = vsel %vm2036_vm12, %v2139_v18, 0.0  ;;  %4511 = vset.pattern.permute.xlu1 %v7300_v23 }
 0x2d7   :  { %v2057_v33 = vadd.f32 %v2056_v30, %v2017_v10  ;;  %v2138_v56 = vmul.f32 %v2100_v59, %v5870_v20  ;;  %v2176_v38 = vadd.f32 %v2175_v57, %v2137_v19  ;;  %4512 = vset.pattern.permute.xlu2 %v7300_v23 }
 0x2d9   :  { %v2059_v50 = vadd.f32 %v2058_v2, %v2057_v33  ;;  %v2177_v16 = vadd.f32 %v2176_v38, %v2138_v56 }
 0x2db   :  { %2060 = vadd.xlane.f32.xlu2 %v2059_v50  ;;  %v2179_v31 = vadd.f32 %v2178_v17, %v2177_v16 }
 0x2e3   :  { %2180 = vadd.xlane.f32.xlu2 %v2179_v31  ;;  %v4522_v31 = vld [vmem:[%s7275_s3] sm:$0xff] }
 0x346   :  { %v2040_v62 = vpop.xlane.xlu1 %2039 }
 0x347   :  { %v5953_v37 = vmul.f32 0.00048828125, %v2040_v62 }
 0x349   :  { %v2160_v27 = vpop.xlane.xlu0 %2159  ;;  %v2184_v52 = vmul.f32 %v5953_v37, %v5953_v37 }
 0x34a   :  { %v2182_v47 = vmul.f32 0.00048828125, %v2160_v27 }
 0x34c   :  { %v2186_v61 = vsub.f32 %v2182_v47, %v2184_v52 }
 0x34e   :  { %v2226_v39 = vadd.f32 1e-05, %v2186_v61  ;;  %v2061_v30 = vpop.xlane.xlu2 %2060 }
 0x34f   :  { %v5957_v19 = vmul.f32 0.00048828125, %v2061_v30 }
 0x350   :  { %4516 = vrsqrt.f32 %v2226_v39  ;;  %vm2234_vm14 = vweird.f32 %v2226_v39 }
 0x351   :  { %7360 = vst [vmem:[#allocation46_spill] sm:$0xff] %v5957_v19  ;;  %v2185_v2 = vmul.f32 %v5957_v19, %v5957_v19 }
 0x356   :  { %v4517_v10 = vpop.eup %4516  ;;  %v2181_v59 = vpop.xlane.xlu2 %2180 }
 0x357   :  { %v2229_v29 = vmul.f32 %v4517_v10, %v2226_v39  ;;  %v2183_v57 = vmul.f32 0.00048828125, %v2181_v59  ;;  %vm2235_vm13 = vweird.f32 %v4517_v10  ;;  %v4523_v39 = vld [vmem:[%s7275_s3 + $0x8] sm:$0xff]  ;;  %s4630_s3 = smov 35  }
 0x358   :  { %vm2236_vm15 = vmor %vm2234_vm14, %vm2235_vm13  ;;  %vm2480_vm13 = vcmask 1047832   ;;  %vm2384_vm14 = vcmask 638296  }
 0x359   :  { %v2230_v33 = vmul.f32 %v4517_v10, %v2229_v29  ;;  %v2187_v56 = vsub.f32 %v2183_v57, %v2185_v2  ;;  %v7361_v2 = vmov 0   ;;  %v2195_v57 = vsub.f32 %v5700_v15, %v5953_v37 }
 0x35a   :  { %v2191_v15 = vsub.f32 %v5610_v36, %v5953_v37 }
 0x35b   :  { %v2231_v50 = vmul.f32 0.5, %v2230_v33  ;;  %v2227_v38 = vadd.f32 1e-05, %v2187_v56  ;;  %v2189_v33 = vsub.f32 %v5579_v49, %v5953_v37  ;;  %v2188_v56 = vsub.f32 %v5576_v34, %v5953_v37 }
 0x35c   :  { %v2190_v49 = vsub.f32 %v5590_v14, %v5953_v37 }
 0x35d   :  { %v2232_v18 = vsub.f32 1.5, %v2231_v50  ;;  %4518 = vrsqrt.f32 %v2227_v38  ;;  %vm2244_vm3 = vweird.f32 %v2227_v38 }
 0x35f   :  { %v2233_v16 = vmul.f32 %v4517_v10, %v2232_v18 }
 0x361   :  { %v2237_v17 = vsel %vm2236_vm15, %v4517_v10, %v2233_v16  ;;  %vm2499_vm15 = vcmask 351232  }
 0x362   :  { %v2248_v62 = vmul.f32 %v4522_v31, %v2237_v17 }
 0x363   :  { %v4519_v27 = vpop.eup %4518 }
 0x364   :  { %v2239_v47 = vmul.f32 %v4519_v27, %v2227_v38  ;;  %2252 = vperm.xlu1 %4511, %v2248_v62   ;;  %vm2245_vm2 = vweird.f32 %v4519_v27  ;;  %v2198_v38 = vsub.f32 %v5751_v32, %v5953_v37 }
 0x365   :  { %vm2246_vm9 = vmor %vm2244_vm3, %vm2245_vm2 }
 0x366   :  { %v2240_v52 = vmul.f32 %v4519_v27, %v2239_v47 }
 0x368   :  { %v2241_v61 = vmul.f32 0.5, %v2240_v52 }
 0x36a   :  { %v2242_v30 = vsub.f32 1.5, %v2241_v61 }
 0x36c   :  { %v2243_v59 = vmul.f32 %v4519_v27, %v2242_v30 }
 0x36e   :  { %v2247_v29 = vsel %vm2246_vm9, %v4519_v27, %v2243_v59 }
 0x36f   :  { %v2249_v10 = vmul.f32 %v4523_v39, %v2247_v29 }
 0x371   :  { %2257 = vperm.xlu2 %4512, %v2249_v10  }
 0x379   :  { %4513 = vset.pattern.permute.xlu2 %v7361_v2  ;;  %v2201_v2 = vsub.f32 %v5811_v21, %v5953_v37 }
 0x3d6   :  { %v5974_v50 = vpop.permute.xlu1 %2252 }
 0x3d7   :  { %v2267_v18 = vmul.f32 %v5974_v50, %v2195_v57  ;;  %v2261_v16 = vmul.f32 %v5974_v50, %v2189_v33  ;;  %v2260_v17 = vmul.f32 %v5974_v50, %v2188_v56  ;;  %v2270_v31 = vmul.f32 %v5974_v50, %v2198_v38 }
 0x3d8   :  { %v2263_v27 = vmul.f32 %v5974_v50, %v2191_v15  ;;  %v2262_v47 = vmul.f32 %v5974_v50, %v2190_v49  ;;  %v2193_v57 = vsub.f32 %v5656_v58, %v5953_v37  ;;  %v2192_v33 = vsub.f32 %v5633_v54, %v5953_v37 }
 0x3d9   :  { %v2313_v34 = vadd.f32 %v5949_v28, %v2267_v18  ;;  %v2307_v62 = vadd.f32 %v5949_v28, %v2261_v16  ;;  %v2306_v32 = vadd.f32 %v5949_v28, %v2260_v17  ;;  %v2316_v36 = vadd.f32 %v5949_v28, %v2270_v31 }
 0x3da   :  { %v2309_v39 = vadd.f32 %v5949_v28, %v2263_v27  ;;  %v2308_v10 = vadd.f32 %v5949_v28, %v2262_v47  ;;  %v2273_v18 = vmul.f32 %v5974_v50, %v2201_v2  ;;  %v2265_v16 = vmul.f32 %v5974_v50, %v2193_v57 }
 0x3db   :  { %v2351_v52 = vmax.f32 %v2313_v34, 0.0  ;;  %v2345_v61 = vmax.f32 %v2307_v62, 0.0  ;;  %v2344_v30 = vmax.f32 %v2306_v32, 0.0  ;;  %v2354_v56 = vmax.f32 %v2316_v36, 0.0 }
 0x3dc   :  { %v2347_v38 = vmax.f32 %v2309_v39, 0.0  ;;  %v2346_v17 = vmax.f32 %v2308_v10, 0.0  ;;  %v2264_v15 = vmul.f32 %v5974_v50, %v2192_v33  ;;  %v2319_v58 = vadd.f32 %v5949_v28, %v2273_v18 }
 0x3dd   :  { %v2370_v59 = vmul.f32 %v2351_v52, %v5703_v48  ;;  %v2364_v29 = vmul.f32 %v2345_v61, %v5585_v63  ;;  %v2363_v14 = vmul.f32 %v2344_v30, %v5582_v25  ;;  %v2373_v31 = vmul.f32 %v2354_v56, %v5757_v5 }
 0x3de   :  { %v2366_v21 = vmul.f32 %v2347_v38, %v5624_v44  ;;  %v2311_v49 = vadd.f32 %v5949_v28, %v2265_v16  ;;  %v2365_v34 = vmul.f32 %v2346_v17, %v5603_v6  ;;  %v2310_v54 = vadd.f32 %v5949_v28, %v2264_v15 }
 0x3df   :  { %2419 = vrot.lane.b32.xlu0 %v2370_v59, %s4630_s3  ;;  %2407 = vrot.lane.b32.xlu1 %v2364_v29, %s4630_s3  ;;  %v2204_v62 = vsub.f32 %v5892_v55, %v5953_v37  ;;  %v2196_v32 = vsub.f32 %v5714_v9, %v5953_v37  ;;  %v2194_v27 = vsub.f32 %v5670_v22, %v5953_v37  ;;  %v2357_v47 = vmax.f32 %v2319_v58, 0.0 }
 0x3e0   :  { %2405 = vrot.lane.b32.xlu2 %v2363_v14, %s4630_s3  ;;  %v2349_v52 = vmax.f32 %v2311_v49, 0.0  ;;  %v2348_v36 = vmax.f32 %v2310_v54, 0.0  ;;  %v2199_v10 = vsub.f32 %v5772_v35, %v5953_v37  ;;  %v2197_v2 = vsub.f32 %v5734_v26, %v5953_v37 }
 0x3e1   :  { %v2276_v61 = vmul.f32 %v5974_v50, %v2204_v62  ;;  %v2268_v30 = vmul.f32 %v5974_v50, %v2196_v32  ;;  %v2266_v59 = vmul.f32 %v5974_v50, %v2194_v27  ;;  %v2376_v29 = vmul.f32 %v2357_v47, %v5820_v51 }
 0x3e2   :  { %v2368_v55 = vmul.f32 %v2349_v52, %v5665_v8  ;;  %v2367_v39 = vmul.f32 %v2348_v36, %v5648_v13  ;;  %v2271_v56 = vmul.f32 %v5974_v50, %v2199_v10  ;;  %v2269_v18 = vmul.f32 %v5974_v50, %v2197_v2 }
 0x3e3   :  { %v2322_v9 = vadd.f32 %v5949_v28, %v2276_v61  ;;  %v2314_v14 = vadd.f32 %v5949_v28, %v2268_v30  ;;  %v2312_v22 = vadd.f32 %v5949_v28, %v2266_v59  ;;  %v2202_v26 = vsub.f32 %v5828_v24, %v5953_v37 }
 0x3e4   :  { %v2317_v15 = vadd.f32 %v5949_v28, %v2271_v56  ;;  %v2203_v52 = vsub.f32 %v5838_v46, %v5953_v37  ;;  %v7363_v46 = vld [vmem:[#allocation40_spill] sm:$0xff] }
 0x3e5   :  { %v2360_v57 = vmax.f32 %v2322_v9, 0.0  ;;  %v2352_v33 = vmax.f32 %v2314_v14, 0.0  ;;  %v2350_v38 = vmax.f32 %v2312_v22, 0.0  ;;  %v2274_v49 = vmul.f32 %v5974_v50, %v2202_v26  ;;  %v7362_v9 = vld [vmem:[#allocation29_spill] sm:$0xff] }
 0x3e6   :  { %v2355_v58 = vmax.f32 %v2317_v15, 0.0  ;;  %v2275_v59 = vmul.f32 %v5974_v50, %v2203_v52 }
 0x3e7   :  { %2425 = vrot.lane.b32.xlu0 %v2373_v31, %s4630_s3  ;;  %2411 = vrot.lane.b32.xlu1 %v2366_v21, %s4630_s3  ;;  %v2379_v16 = vmul.f32 %v2360_v57, %v5863_v41  ;;  %v2371_v17 = vmul.f32 %v2352_v33, %v5727_v7  ;;  %v2369_v35 = vmul.f32 %v2350_v38, %v5684_v0 }
 0x3e8   :  { %2409 = vrot.lane.b32.xlu2 %v2365_v34, %s4630_s3  ;;  %v2315_v31 = vadd.f32 %v5949_v28, %v2269_v18  ;;  %v2200_v21 = vsub.f32 %v5784_v4, %v5953_v37  ;;  %v4631_v34 = vmov 0.0   ;;  %v2374_v32 = vmul.f32 %v2355_v58, %v5787_v3 }
 0x3e9   :  { %2383 = vst.msk [vmem:[#allocation3] sm:$0xff] %vm2382_vm11, %v4631_v34  ;;  %v2320_v24 = vadd.f32 %v5949_v28, %v2274_v49  ;;  %v2205_v4 = vsub.f32 %v5897_v43, %v5953_v37  ;;  %v2206_v43 = vsub.f32 %v7363_v46, %v5953_v37  ;;  %v6086_v37 = vpop.permute.xlu2 %2257 }
 0x3ea   :  { %v2353_v54 = vmax.f32 %v2315_v31, 0.0  ;;  %v2272_v62 = vmul.f32 %v5974_v50, %v2200_v21  ;;  %7364 = vst [vmem:[#allocation40_spill] sm:$0xff] %v6086_v37 }
 0x3eb   :  { %v2358_v61 = vmax.f32 %v2320_v24, 0.0  ;;  %v2277_v30 = vmul.f32 %v5974_v50, %v2205_v4  ;;  %v2278_v2 = vmul.f32 %v5974_v50, %v2206_v43  ;;  %2385 = vst.msk [vmem:[#allocation3 + $0x90] sm:$0xff] %vm2384_vm14, %v4631_v34 }
 0x3ec   :  { %v2372_v27 = vmul.f32 %v2353_v54, %v5748_v1  ;;  %v2318_v47 = vadd.f32 %v5949_v28, %v2272_v62 }
 0x3ed   :  { %v2324_v56 = vadd.f32 %v5949_v28, %v2278_v2 }
 0x3ee   :  { %v2356_v36 = vmax.f32 %v2318_v47, 0.0 }
 0x3ef   :  { %2431 = vrot.lane.b32.xlu0 %v2376_v29, %s4630_s3  ;;  %2415 = vrot.lane.b32.xlu1 %v2368_v55, %s4630_s3  ;;  %v2377_v29 = vmul.f32 %v2358_v61, %v5835_v42  ;;  %v2323_v55 = vadd.f32 %v5949_v28, %v2277_v30  ;;  %v2362_v38 = vmax.f32 %v2324_v56, 0.0 }
 0x3f0   :  { %2413 = vrot.lane.b32.xlu2 %v2367_v39, %s4630_s3  ;;  %v2375_v14 = vmul.f32 %v2356_v36, %v7362_v9  ;;  %v2321_v39 = vadd.f32 %v5949_v28, %v2275_v59 }
 0x3f1   :  { %v2361_v22 = vmax.f32 %v2323_v55, 0.0  ;;  %v2381_v18 = vmul.f32 %v2362_v38, %v5858_v12 }
 0x3f2   :  { %v2359_v10 = vmax.f32 %v2321_v39, 0.0 }
 0x3f3   :  { %v2380_v57 = vmul.f32 %v2361_v22, %v5870_v20 }
 0x3f4   :  { %v2378_v33 = vmul.f32 %v2359_v10, %v5844_v11 }
 0x3f7   :  { %2437 = vrot.lane.b32.xlu0 %v2379_v16, %s4630_s3  ;;  %2421 = vrot.lane.b32.xlu1 %v2371_v17, %s4630_s3 }
 0x3f8   :  { %2417 = vrot.lane.b32.xlu2 %v2369_v35, %s4630_s3 }
 0x3ff   :  { %2427 = vrot.lane.b32.xlu1 %v2374_v32, %s4630_s3 }
 0x400   :  { %2423 = vrot.lane.b32.xlu2 %v2372_v27, %s4630_s3 }
 0x407   :  { %2433 = vrot.lane.b32.xlu1 %v2377_v29, %s4630_s3 }
 0x408   :  { %2429 = vrot.lane.b32.xlu2 %v2375_v14, %s4630_s3 }
 0x40f   :  { %2439 = vrot.lane.b32.xlu1 %v2380_v57, %s4630_s3 }
 0x410   :  { %2435 = vrot.lane.b32.xlu2 %v2378_v33, %s4630_s3 }
 0x418   :  { %2441 = vrot.lane.b32.xlu2 %v2381_v18, %s4630_s3 }
 0x43a   :  { %v2406_v16 = vpop.permute.xlu2 %2405 }
 0x43b   :  { %2481 = vst.msk [vmem:[#allocation3] sm:$0xff] %vm2480_vm13, %v2406_v16 }
 0x442   :  { %v2410_v50 = vpop.permute.xlu2 %2409  ;;  %v6088_v17 = vld [vmem:[#allocation3] sm:$0xff] }
 0x443   :  { %2841 = vrot.lane.b32.xlu2 %v6088_v17, %s4621_s9  ;;  %2709 = vrot.lane.b32.xlu1 %v6088_v17, %s4620_s1 }
 0x444   :  { %2577 = vrot.lane.b32.xlu0 %v6088_v17, %s4619_s0 }
 0x44a   :  { %v2414_v28 = vpop.permute.xlu2 %2413 }
 0x44b   :  { %3501 = vrot.lane.b32.xlu2 %v6088_v17, %s4624_s12  ;;  %3369 = vrot.lane.b32.xlu1 %v6088_v17, %s4625_s13 }
 0x44c   :  { %3237 = vrot.lane.b32.xlu0 %v6088_v17, %s4626_s14 }
 0x451   :  { %v2420_v15 = vpop.permute.xlu0 %2419  ;;  %v2408_v35 = vpop.permute.xlu1 %2407 }
 0x452   :  { %v6103_v31 = vsel %vm2382_vm11, %v2406_v16, %v2408_v35  ;;  %v6106_v26 = vsel %vm2382_vm11, %v2408_v35, %v2410_v50  ;;  %v2418_v21 = vpop.permute.xlu2 %2417 }
 0x453   :  { %2482 = vst [vmem:[#allocation3 + $0x8] sm:$0xff] %v6103_v31  ;;  %v6110_v58 = vsel %vm2382_vm11, %v2418_v21, %v2420_v15  ;;  %3105 = vrot.lane.b32.xlu2 %v6088_v17, %s4623_s11  ;;  %2973 = vrot.lane.b32.xlu1 %v6088_v17, %s4622_s10 }
 0x454   :  { %2483 = vst [vmem:[#allocation3 + $0x10] sm:$0xff] %v6106_v26 }
 0x455   :  { %2488 = vst [vmem:[#allocation3 + $0x38] sm:$0xff] %v6110_v58 }
 0x459   :  { %v2426_v49 = vpop.permute.xlu0 %2425  ;;  %v2412_v54 = vpop.permute.xlu1 %2411 }
 0x45a   :  { %v6119_v62 = vsel %vm2382_vm11, %v2410_v50, %v2412_v54  ;;  %v6122_v32 = vsel %vm2382_vm11, %v2412_v54, %v2414_v28  ;;  %v2424_v24 = vpop.permute.xlu2 %2423  ;;  %v6135_v47 = vld [vmem:[#allocation3 + $0x8] sm:$0xff] }
 0x45b   :  { %2484 = vst [vmem:[#allocation3 + $0x18] sm:$0xff] %v6119_v62  ;;  %v6126_v27 = vsel %vm2382_vm11, %v2424_v24, %v2426_v49  ;;  %2579 = vrot.lane.b32.xlu1 %v6103_v31, %s4619_s0  ;;  %2581 = vrot.lane.b32.xlu2 %v6106_v26, %s4619_s0  ;;  %v6138_v4 = vld [vmem:[#allocation3 + $0x10] sm:$0xff] }
 0x45c   :  { %2485 = vst [vmem:[#allocation3 + $0x20] sm:$0xff] %v6122_v32  ;;  %2583 = vrot.lane.b32.xlu0 %v6119_v62, %s4619_s0  ;;  %v2508_v52 = vld [vmem:[#allocation3 + $0x38] sm:$0xff] }
 0x45d   :  { %2491 = vst [vmem:[#allocation3 + $0x50] sm:$0xff] %v6126_v27 }
 0x45e   :  { %2527 = vst [vmem:[#allocation4 + $0x38] sm:$0xff] %v2508_v52 }
 0x461   :  { %v2432_v61 = vpop.permute.xlu0 %2431  ;;  %v2416_v30 = vpop.permute.xlu1 %2415 }
 0x462   :  { %v6142_v36 = vsel %vm2382_vm11, %v2414_v28, %v2416_v30  ;;  %v6145_v59 = vsel %vm2382_vm11, %v2416_v30, %v2418_v21  ;;  %v2430_v29 = vpop.permute.xlu2 %2429  ;;  %v6155_v34 = vld [vmem:[#allocation3 + $0x18] sm:$0xff] }
 0x463   :  { %2486 = vst [vmem:[#allocation3 + $0x28] sm:$0xff] %v6142_v36  ;;  %v6149_v55 = vsel %vm2382_vm11, %v2430_v29, %v2432_v61  ;;  %2585 = vrot.lane.b32.xlu1 %v6122_v32, %s4619_s0  ;;  %2587 = vrot.lane.b32.xlu2 %v6142_v36, %s4619_s0  ;;  %v6160_v14 = vld [vmem:[#allocation3 + $0x20] sm:$0xff] }
 0x464   :  { %2487 = vst [vmem:[#allocation3 + $0x30] sm:$0xff] %v6145_v59  ;;  %2589 = vrot.lane.b32.xlu0 %v6145_v59, %s4619_s0  ;;  %v6163_v39 = vld [vmem:[#allocation3 + $0x50] sm:$0xff] }
 0x465   :  { %2494 = vst [vmem:[#allocation3 + $0x68] sm:$0xff] %v6149_v55 }
 0x466   :  { %2530 = vst [vmem:[#allocation4 + $0x50] sm:$0xff] %v6163_v39 }
 0x469   :  { %v2438_v46 = vpop.permute.xlu0 %2437  ;;  %v2422_v43 = vpop.permute.xlu1 %2421 }
 0x46a   :  { %v6167_v22 = vsel %vm2382_vm11, %v2420_v15, %v2422_v43  ;;  %v6170_v10 = vsel %vm2382_vm11, %v2422_v43, %v2424_v24  ;;  %v2436_v2 = vpop.permute.xlu2 %2435  ;;  %v2506_v33 = vld [vmem:[#allocation3 + $0x28] sm:$0xff] }
 0x46b   :  { %2489 = vst [vmem:[#allocation3 + $0x40] sm:$0xff] %v6167_v22  ;;  %v6174_v57 = vsel %vm2382_vm11, %v2436_v2, %v2438_v46  ;;  %2591 = vrot.lane.b32.xlu1 %v6110_v58, %s4619_s0  ;;  %2593 = vrot.lane.b32.xlu2 %v6167_v22, %s4619_s0  ;;  %v2507_v56 = vld [vmem:[#allocation3 + $0x30] sm:$0xff] }
 0x46c   :  { %2490 = vst [vmem:[#allocation3 + $0x48] sm:$0xff] %v6170_v10  ;;  %2595 = vrot.lane.b32.xlu0 %v6170_v10, %s4619_s0  ;;  %v2514_v38 = vld [vmem:[#allocation3 + $0x68] sm:$0xff] }
 0x46d   :  { %2497 = vst [vmem:[#allocation3 + $0x80] sm:$0xff] %v6174_v57 }
 0x46e   :  { %2525 = vst [vmem:[#allocation4 + $0x28] sm:$0xff] %v2506_v33 }
 0x46f   :  { %2526 = vst [vmem:[#allocation4 + $0x30] sm:$0xff] %v2507_v56 }
 0x470   :  { %2533 = vst [vmem:[#allocation4 + $0x68] sm:$0xff] %v2514_v38 }
 0x471   :  { %v2428_v18 = vpop.permute.xlu1 %2427 }
 0x472   :  { %v6185_v16 = vsel %vm2382_vm11, %v2426_v49, %v2428_v18  ;;  %v6188_v50 = vsel %vm2382_vm11, %v2428_v18, %v2430_v29  ;;  %v2509_v28 = vld [vmem:[#allocation3 + $0x40] sm:$0xff] }
 0x473   :  { %2492 = vst [vmem:[#allocation3 + $0x58] sm:$0xff] %v6185_v16  ;;  %2597 = vrot.lane.b32.xlu1 %v6126_v27, %s4619_s0  ;;  %2599 = vrot.lane.b32.xlu2 %v6185_v16, %s4619_s0  ;;  %v2510_v15 = vld [vmem:[#allocation3 + $0x48] sm:$0xff] }
 0x474   :  { %2493 = vst [vmem:[#allocation3 + $0x60] sm:$0xff] %v6188_v50  ;;  %2601 = vrot.lane.b32.xlu0 %v6188_v50, %s4619_s0  ;;  %v2517_v35 = vld [vmem:[#allocation3 + $0x80] sm:$0xff] }
 0x475   :  { %2528 = vst [vmem:[#allocation4 + $0x40] sm:$0xff] %v2509_v28 }
 0x476   :  { %2529 = vst [vmem:[#allocation4 + $0x48] sm:$0xff] %v2510_v15 }
 0x477   :  { %2536 = vst [vmem:[#allocation4 + $0x80] sm:$0xff] %v2517_v35 }
 0x479   :  { %v2434_v21 = vpop.permute.xlu1 %2433 }
 0x47a   :  { %v2456_v49 = vsel %vm2382_vm11, %v2432_v61, %v2434_v21  ;;  %v6200_v54 = vsel %vm2382_vm11, %v2434_v21, %v2436_v2  ;;  %v6202_v24 = vld [vmem:[#allocation3 + $0x58] sm:$0xff]  ;;  %v2442_v61 = vpop.permute.xlu2 %2441 }
 0x47b   :  { %2495 = vst [vmem:[#allocation3 + $0x70] sm:$0xff] %v2456_v49  ;;  %2603 = vrot.lane.b32.xlu1 %v6149_v55, %s4619_s0  ;;  %2605 = vrot.lane.b32.xlu2 %v2456_v49, %s4619_s0  ;;  %v2513_v52 = vld [vmem:[#allocation3 + $0x60] sm:$0xff] }
 0x47c   :  { %2496 = vst [vmem:[#allocation3 + $0x78] sm:$0xff] %v6200_v54  ;;  %2607 = vrot.lane.b32.xlu0 %v6200_v54, %s4619_s0 }
 0x47d   :  { %2531 = vst [vmem:[#allocation4 + $0x58] sm:$0xff] %v6202_v24 }
 0x47e   :  { %2532 = vst [vmem:[#allocation4 + $0x60] sm:$0xff] %v2513_v52 }
 0x481   :  { %v2440_v30 = vpop.permute.xlu1 %2439 }
 0x482   :  { %v2459_v29 = vsel %vm2382_vm11, %v2438_v46, %v2440_v30  ;;  %v2460_v43 = vsel %vm2382_vm11, %v2440_v30, %v2442_v61  ;;  %v2515_v2 = vld [vmem:[#allocation3 + $0x70] sm:$0xff] }
 0x483   :  { %2498 = vst [vmem:[#allocation3 + $0x88] sm:$0xff] %v2459_v29  ;;  %2609 = vrot.lane.b32.xlu1 %v6174_v57, %s4619_s0  ;;  %2611 = vrot.lane.b32.xlu2 %v2459_v29, %s4619_s0  ;;  %v6216_v33 = vld [vmem:[#allocation3 + $0x78] sm:$0xff] }
 0x484   :  { %2500 = vst.msk [vmem:[#allocation3 + $0x90] sm:$0xff] %vm2499_vm15, %v2460_v43 }
 0x485   :  { %2534 = vst [vmem:[#allocation4 + $0x70] sm:$0xff] %v2515_v2 }
 0x486   :  { %2535 = vst [vmem:[#allocation4 + $0x78] sm:$0xff] %v6216_v33 }
 0x48a   :  { %v2518_v56 = vld [vmem:[#allocation3 + $0x88] sm:$0xff] }
 0x48b   :  { %2715 = vrot.lane.b32.xlu1 %v6119_v62, %s4620_s1  ;;  %v2557_v46 = vld [vmem:[#allocation3 + $0x90] sm:$0xff]  ;;  %2711 = vrot.lane.b32.xlu2 %v6103_v31, %s4620_s1  ;;  %2537 = vst [vmem:[#allocation4 + $0x88] sm:$0xff] %v2518_v56 }
 0x48c   :  { %v6223_v38 = vld [vmem:[#allocation3 + $0x90] sm:$0xff]  ;;  %2613 = vrot.lane.b32.xlu0 %v2557_v46, %s4619_s0 }
 0x48d   :  { %2538 = vst.msk [vmem:[#allocation4 + $0x90] sm:$0xff] %vm2036_vm12, %v6223_v38 }
 0x493   :  { %2721 = vrot.lane.b32.xlu1 %v6145_v59, %s4620_s1  ;;  %2717 = vrot.lane.b32.xlu2 %v6122_v32, %s4620_s1 }
 0x494   :  { %2713 = vrot.lane.b32.xlu0 %v6106_v26, %s4620_s1 }
 0x49b   :  { %2727 = vrot.lane.b32.xlu1 %v6170_v10, %s4620_s1  ;;  %2723 = vrot.lane.b32.xlu2 %v6110_v58, %s4620_s1 }
 0x49c   :  { %2719 = vrot.lane.b32.xlu0 %v6142_v36, %s4620_s1 }
 0x49d   :  { %v6240_v18 = vpop.permute.xlu2 %2841 }
 0x4a3   :  { %2733 = vrot.lane.b32.xlu1 %v6188_v50, %s4620_s1  ;;  %2729 = vrot.lane.b32.xlu2 %v6126_v27, %s4620_s1 }
 0x4a4   :  { %2725 = vrot.lane.b32.xlu0 %v6167_v22, %s4620_s1 }
 0x4a5   :  { %v6248_v28 = vpop.permute.xlu2 %3501 }
 0x4ab   :  { %2739 = vrot.lane.b32.xlu1 %v6200_v54, %s4620_s1  ;;  %2735 = vrot.lane.b32.xlu2 %v6149_v55, %s4620_s1 }
 0x4ac   :  { %2731 = vrot.lane.b32.xlu0 %v6185_v16, %s4620_s1 }
 0x4ad   :  { %v6256_v15 = vpop.permute.xlu2 %3105 }
 0x4b3   :  { %2745 = vrot.lane.b32.xlu1 %v2557_v46, %s4620_s1  ;;  %2741 = vrot.lane.b32.xlu2 %v6174_v57, %s4620_s1 }
 0x4b4   :  { %2737 = vrot.lane.b32.xlu0 %v2456_v49, %s4620_s1 }
 0x4b5   :  { %v2710_v35 = vpop.permute.xlu1 %2709  ;;  %v2582_v21 = vpop.permute.xlu2 %2581 }
 0x4b6   :  { %v2578_v52 = vpop.permute.xlu0 %2577 }
 0x4bb   :  { %2845 = vrot.lane.b32.xlu1 %v6106_v26, %s4621_s9  ;;  %2847 = vrot.lane.b32.xlu2 %v6119_v62, %s4621_s9 }
 0x4bc   :  { %2743 = vrot.lane.b32.xlu0 %v2459_v29, %s4620_s1  ;;  %s4402_s1 = sshll.u32 %s7278_s6, 4  ;;  %s4403_s1 = int_to_ptr.hbm [resolvable:$true] %s4402_s1 }
 0x4bd   :  { %v6267_v61 = vpop.permute.xlu1 %3369  ;;  %v2588_v30 = vpop.permute.xlu2 %2587 }
 0x4be   :  { %v6277_v2 = vpop.permute.xlu0 %3237 }
 0x4c3   :  { %2851 = vrot.lane.b32.xlu1 %v6142_v36, %s4621_s9  ;;  %2853 = vrot.lane.b32.xlu2 %v6145_v59, %s4621_s9 }
 0x4c4   :  { %2843 = vrot.lane.b32.xlu0 %v6103_v31, %s4621_s9 }
 0x4c5   :  { %v6275_v49 = vpop.permute.xlu1 %2973  ;;  %v2594_v43 = vpop.permute.xlu2 %2593 }
 0x4cb   :  { %2857 = vrot.lane.b32.xlu1 %v6167_v22, %s4621_s9  ;;  %3371 = vrot.lane.b32.xlu2 %v6103_v31, %s4625_s13 }
 0x4cc   :  { %2849 = vrot.lane.b32.xlu0 %v6122_v32, %s4621_s9 }
 0x4cd   :  { %v2580_v29 = vpop.permute.xlu1 %2579  ;;  %v2600_v56 = vpop.permute.xlu2 %2599 }
 0x4ce   :  { %v6286_v46 = vsel %vm239_vm0, %v2578_v52, %v2580_v29  ;;  %v6289_v23 = vsel %vm239_vm0, %v2580_v29, %v2582_v21  ;;  %v2584_v40 = vpop.permute.xlu0 %2583 }
 0x4cf   :  { %v6292_v37 = vsel %vm239_vm0, %v2582_v21, %v2584_v40 }
 0x4d3   :  { %3239 = vrot.lane.b32.xlu1 %v6103_v31, %s4626_s14  ;;  %2975 = vrot.lane.b32.xlu2 %v6103_v31, %s4622_s10 }
 0x4d4   :  { %2855 = vrot.lane.b32.xlu0 %v6110_v58, %s4621_s9 }
 0x4d5   :  { %v2586_v45 = vpop.permute.xlu1 %2585  ;;  %v2606_v53 = vpop.permute.xlu2 %2605 }
 0x4d6   :  { %v6301_v52 = vsel %vm239_vm0, %v2584_v40, %v2586_v45  ;;  %v6304_v29 = vsel %vm239_vm0, %v2586_v45, %v2588_v30  ;;  %v2590_v60 = vpop.permute.xlu0 %2589 }
 0x4d7   :  { %v2620_v21 = vsel %vm239_vm0, %v2588_v30, %v2590_v60 }
 0x4d8   :  { %2657 = vst [vmem:[#allocation4 + $0xc0] sm:$0xff] %v2620_v21 }
 0x4db   :  { %3507 = vrot.lane.b32.xlu1 %v6119_v62, %s4624_s12  ;;  %3509 = vrot.lane.b32.xlu2 %v6122_v32, %s4624_s12 }
 0x4dc   :  { %3503 = vrot.lane.b32.xlu0 %v6103_v31, %s4624_s12 }
 0x4dd   :  { %v2592_v19 = vpop.permute.xlu1 %2591  ;;  %v2612_v12 = vpop.permute.xlu2 %2611 }
 0x4de   :  { %v2622_v40 = vsel %vm239_vm0, %v2592_v19, %v2594_v43  ;;  %v2621_v45 = vsel %vm239_vm0, %v2590_v60, %v2592_v19  ;;  %v2596_v20 = vpop.permute.xlu0 %2595 }
 0x4df   :  { %2659 = vst [vmem:[#allocation4 + $0xd0] sm:$0xff] %v2622_v40  ;;  %v2623_v30 = vsel %vm239_vm0, %v2594_v43, %v2596_v20 }
 0x4e0   :  { %2658 = vst [vmem:[#allocation4 + $0xc8] sm:$0xff] %v2621_v45 }
 0x4e1   :  { %2660 = vst [vmem:[#allocation4 + $0xd8] sm:$0xff] %v2623_v30 }
 0x4e3   :  { %3375 = vrot.lane.b32.xlu1 %v6119_v62, %s4625_s13  ;;  %3377 = vrot.lane.b32.xlu2 %v6122_v32, %s4625_s13 }
 0x4e4   :  { %3107 = vrot.lane.b32.xlu0 %v6103_v31, %s4623_s11 }
 0x4e5   :  { %v2598_v21 = vpop.permute.xlu1 %2597  ;;  %v2712_v41 = vpop.permute.xlu2 %2711 }
 0x4e6   :  { %v2625_v11 = vsel %vm239_vm0, %v2598_v21, %v2600_v56  ;;  %v2624_v60 = vsel %vm239_vm0, %v2596_v20, %v2598_v21  ;;  %v2602_v19 = vpop.permute.xlu0 %2601  ;;  %v6326_v40 = vsel %vm387_vm1, %v2710_v35, %v2712_v41 }
 0x4e7   :  { %2662 = vst [vmem:[#allocation4 + $0xe8] sm:$0xff] %v2625_v11  ;;  %v2626_v43 = vsel %vm239_vm0, %v2600_v56, %v2602_v19 }
 0x4e8   :  { %2661 = vst [vmem:[#allocation4 + $0xe0] sm:$0xff] %v2624_v60 }
 0x4e9   :  { %2663 = vst [vmem:[#allocation4 + $0xf0] sm:$0xff] %v2626_v43 }
 0x4eb   :  { %3241 = vrot.lane.b32.xlu1 %v6106_v26, %s4626_s14  ;;  %3243 = vrot.lane.b32.xlu2 %v6119_v62, %s4626_s14 }
 0x4ec   :  { %3505 = vrot.lane.b32.xlu0 %v6106_v26, %s4624_s12 }
 0x4ed   :  { %v2604_v31 = vpop.permute.xlu1 %2603  ;;  %v2718_v20 = vpop.permute.xlu2 %2717 }
 0x4ee   :  { %v2628_v11 = vsel %vm239_vm0, %v2604_v31, %v2606_v53  ;;  %v2627_v56 = vsel %vm239_vm0, %v2602_v19, %v2604_v31  ;;  %v2608_v45 = vpop.permute.xlu0 %2607 }
 0x4ef   :  { %2665 = vst [vmem:[#allocation4 + $0x100] sm:$0xff] %v2628_v11  ;;  %v2629_v35 = vsel %vm239_vm0, %v2606_v53, %v2608_v45 }
 0x4f0   :  { %2664 = vst [vmem:[#allocation4 + $0xf8] sm:$0xff] %v2627_v56 }
 0x4f1   :  { %2666 = vst [vmem:[#allocation4 + $0x108] sm:$0xff] %v2629_v35 }
 0x4f3   :  { %3379 = vrot.lane.b32.xlu1 %v6142_v36, %s4625_s13  ;;  %3109 = vrot.lane.b32.xlu2 %v6106_v26, %s4623_s11 }
 0x4f4   :  { %3373 = vrot.lane.b32.xlu0 %v6106_v26, %s4625_s13 }
 0x4f5   :  { %v2610_v30 = vpop.permute.xlu1 %2609  ;;  %v2724_v21 = vpop.permute.xlu2 %2723 }
 0x4f6   :  { %v2631_v60 = vsel %vm239_vm0, %v2610_v30, %v2612_v12  ;;  %v2630_v19 = vsel %vm239_vm0, %v2608_v45, %v2610_v30 }
 0x4f7   :  { %2668 = vst [vmem:[#allocation4 + $0x118] sm:$0xff] %v2631_v60 }
 0x4f8   :  { %2667 = vst [vmem:[#allocation4 + $0x110] sm:$0xff] %v2630_v19 }
 0x4fb   :  { %3113 = vrot.lane.b32.xlu1 %v6122_v32, %s4623_s11  ;;  %3247 = vrot.lane.b32.xlu2 %v6142_v36, %s4626_s14 }
 0x4fc   :  { %3511 = vrot.lane.b32.xlu0 %v6142_v36, %s4624_s12 }
 0x4fd   :  { %v2716_v53 = vpop.permute.xlu1 %2715  ;;  %v2730_v43 = vpop.permute.xlu2 %2729 }
 0x4fe   :  { %v6352_v31 = vsel %vm387_vm1, %v2716_v53, %v2718_v20  ;;  %v2614_v11 = vpop.permute.xlu0 %2613 }
 0x4ff   :  { %v2632_v56 = vsel %vm239_vm0, %v2612_v12, %v2614_v11  ;;  %2670 = vst.msk [vmem:[#allocation4 + $0x128] sm:$0xff] %vm2036_vm12, %v2614_v11  ;;  %vm3773_vm0 = vcmask 588800  }
 0x500   :  { %2669 = vst [vmem:[#allocation4 + $0x120] sm:$0xff] %v2632_v56 }
 0x503   :  { %2979 = vrot.lane.b32.xlu1 %v6119_v62, %s4622_s10  ;;  %2981 = vrot.lane.b32.xlu2 %v6122_v32, %s4622_s10 }
 0x504   :  { %3245 = vrot.lane.b32.xlu0 %v6122_v32, %s4626_s14 }
 0x505   :  { %v2722_v45 = vpop.permute.xlu1 %2721  ;;  %v2736_v35 = vpop.permute.xlu2 %2735 }
 0x506   :  { %v2753_v30 = vsel %vm387_vm1, %v2722_v45, %v2724_v21  ;;  %v2714_v60 = vpop.permute.xlu0 %2713 }
 0x507   :  { %2790 = vst [vmem:[#allocation4 + $0x160] sm:$0xff] %v2753_v30  ;;  %v6364_v12 = vsel %vm387_vm1, %v2712_v41, %v2714_v60  ;;  %v6367_v19 = vsel %vm387_vm1, %v2714_v60, %v2716_v53 }
 0x50b   :  { %3515 = vrot.lane.b32.xlu1 %v6110_v58, %s4624_s12  ;;  %3517 = vrot.lane.b32.xlu2 %v6167_v22, %s4624_s12 }
 0x50c   :  { %3111 = vrot.lane.b32.xlu0 %v6119_v62, %s4623_s11 }
 0x50d   :  { %v2728_v32 = vpop.permute.xlu1 %2727  ;;  %v2742_v11 = vpop.permute.xlu2 %2741 }
 0x50e   :  { %v2756_v56 = vsel %vm387_vm1, %v2728_v32, %v2730_v43  ;;  %v2720_v30 = vpop.permute.xlu0 %2719 }
 0x50f   :  { %2793 = vst [vmem:[#allocation4 + $0x178] sm:$0xff] %v2756_v56  ;;  %v6377_v41 = vsel %vm387_vm1, %v2718_v20, %v2720_v30  ;;  %v2752_v53 = vsel %vm387_vm1, %v2720_v30, %v2722_v45 }
 0x510   :  { %2789 = vst [vmem:[#allocation4 + $0x158] sm:$0xff] %v2752_v53 }
 0x513   :  { %3383 = vrot.lane.b32.xlu1 %v6110_v58, %s4625_s13  ;;  %3385 = vrot.lane.b32.xlu2 %v6167_v22, %s4625_s13 }
 0x514   :  { %2977 = vrot.lane.b32.xlu0 %v6106_v26, %s4622_s10 }
 0x515   :  { %v2734_v62 = vpop.permute.xlu1 %2733  ;;  %v2848_v60 = vpop.permute.xlu2 %2847 }
 0x516   :  { %v2759_v42 = vsel %vm387_vm1, %v2734_v62, %v2736_v35  ;;  %v2726_v56 = vpop.permute.xlu0 %2725 }
 0x517   :  { %2796 = vst [vmem:[#allocation4 + $0x190] sm:$0xff] %v2759_v42  ;;  %v6388_v20 = vsel %vm387_vm1, %v2724_v21, %v2726_v56  ;;  %v2755_v45 = vsel %vm387_vm1, %v2726_v56, %v2728_v32 }
 0x518   :  { %2792 = vst [vmem:[#allocation4 + $0x170] sm:$0xff] %v2755_v45 }
 0x51b   :  { %3519 = vrot.lane.b32.xlu1 %v6170_v10, %s4624_s12  ;;  %3251 = vrot.lane.b32.xlu2 %v6110_v58, %s4626_s14 }
 0x51c   :  { %3115 = vrot.lane.b32.xlu0 %v6142_v36, %s4623_s11 }
 0x51d   :  { %v2740_v26 = vpop.permute.xlu1 %2739  ;;  %v2854_v30 = vpop.permute.xlu2 %2853 }
 0x51e   :  { %v2762_v53 = vsel %vm387_vm1, %v2740_v26, %v2742_v11  ;;  %v2732_v42 = vpop.permute.xlu0 %2731 }
 0x51f   :  { %2799 = vst [vmem:[#allocation4 + $0x1a8] sm:$0xff] %v2762_v53  ;;  %v2757_v21 = vsel %vm387_vm1, %v2730_v43, %v2732_v42  ;;  %v2758_v32 = vsel %vm387_vm1, %v2732_v42, %v2734_v62 }
 0x520   :  { %2794 = vst [vmem:[#allocation4 + $0x180] sm:$0xff] %v2757_v21 }
 0x521   :  { %2795 = vst [vmem:[#allocation4 + $0x188] sm:$0xff] %v2758_v32 }
 0x523   :  { %3381 = vrot.lane.b32.xlu1 %v6145_v59, %s4625_s13  ;;  %3387 = vrot.lane.b32.xlu2 %v6170_v10, %s4625_s13 }
 0x524   :  { %2983 = vrot.lane.b32.xlu0 %v6142_v36, %s4622_s10 }
 0x525   :  { %v2746_v56 = vpop.permute.xlu1 %2745  ;;  %v6406_v45 = vpop.permute.xlu2 %3371 }
 0x526   :  { %2802 = vst.msk [vmem:[#allocation4 + $0x1c0] sm:$0xff] %vm2036_vm12, %v2746_v56  ;;  %v2738_v53 = vpop.permute.xlu0 %2737  ;;  %v3407_v43 = vsel %vm1125_vm10, %v6267_v61, %v6406_v45 }
 0x527   :  { %v2760_v62 = vsel %vm387_vm1, %v2736_v35, %v2738_v53  ;;  %v2761_v42 = vsel %vm387_vm1, %v2738_v53, %v2740_v26 }
 0x528   :  { %2797 = vst [vmem:[#allocation4 + $0x198] sm:$0xff] %v2760_v62 }
 0x529   :  { %2798 = vst [vmem:[#allocation4 + $0x1a0] sm:$0xff] %v2761_v42 }
 0x52b   :  { %3121 = vrot.lane.b32.xlu1 %v6167_v22, %s4623_s11  ;;  %3249 = vrot.lane.b32.xlu2 %v6145_v59, %s4626_s14 }
 0x52c   :  { %3513 = vrot.lane.b32.xlu0 %v6145_v59, %s4624_s12 }
 0x52d   :  { %v2846_v36 = vpop.permute.xlu1 %2845  ;;  %v6420_v21 = vpop.permute.xlu2 %2975 }
 0x52e   :  { %v6423_v61 = vsel %vm535_vm4, %v2846_v36, %v2848_v60  ;;  %v2744_v35 = vpop.permute.xlu0 %2743  ;;  %v3011_v53 = vsel %vm682_vm5, %v6275_v49, %v6420_v21 }
 0x52f   :  { %v2763_v26 = vsel %vm387_vm1, %v2742_v11, %v2744_v35  ;;  %v2764_v32 = vsel %vm387_vm1, %v2744_v35, %v2746_v56 }
 0x530   :  { %2800 = vst [vmem:[#allocation4 + $0x1b0] sm:$0xff] %v2763_v26 }
 0x531   :  { %2801 = vst [vmem:[#allocation4 + $0x1b8] sm:$0xff] %v2764_v32 }
 0x533   :  { %2987 = vrot.lane.b32.xlu1 %v6110_v58, %s4622_s10  ;;  %2989 = vrot.lane.b32.xlu2 %v6167_v22, %s4622_s10 }
 0x534   :  { %3253 = vrot.lane.b32.xlu0 %v6167_v22, %s4626_s14 }
 0x535   :  { %v2852_v62 = vpop.permute.xlu1 %2851  ;;  %v6436_v42 = vpop.permute.xlu2 %3509 }
 0x536   :  { %v6439_v11 = vsel %vm535_vm4, %v2852_v62, %v2854_v30  ;;  %v2844_v56 = vpop.permute.xlu0 %2843 }
 0x537   :  { %v2879_v49 = vsel %vm535_vm4, %v6240_v18, %v2844_v56  ;;  %v6444_v35 = vsel %vm535_vm4, %v2844_v56, %v2846_v36 }
 0x53b   :  { %3123 = vrot.lane.b32.xlu1 %v6170_v10, %s4623_s11  ;;  %2985 = vrot.lane.b32.xlu2 %v6145_v59, %s4622_s10 }
 0x53c   :  { %3119 = vrot.lane.b32.xlu0 %v6110_v58, %s4623_s11 }
 0x53d   :  { %v6452_v22 = vpop.permute.xlu1 %2857  ;;  %v3378_v26 = vpop.permute.xlu2 %3377 }
 0x53e   :  { %v2850_v32 = vpop.permute.xlu0 %2849 }
 0x53f   :  { %v6455_v51 = vsel %vm535_vm4, %v2848_v60, %v2850_v32  ;;  %v6458_v18 = vsel %vm535_vm4, %v2850_v32, %v2852_v62 }
 0x543   :  { %3521 = vrot.lane.b32.xlu1 %v6126_v27, %s4624_s12  ;;  %3523 = vrot.lane.b32.xlu2 %v6185_v16, %s4624_s12 }
 0x544   :  { %3255 = vrot.lane.b32.xlu0 %v6170_v10, %s4626_s14 }
 0x545   :  { %v3240_v58 = vpop.permute.xlu1 %3239  ;;  %v6466_v36 = vpop.permute.xlu2 %3243 }
 0x546   :  { %v3275_v56 = vsel %vm977_vm8, %v6277_v2, %v3240_v58  ;;  %v2856_v60 = vpop.permute.xlu0 %2855 }
 0x547   :  { %v6471_v9 = vsel %vm535_vm4, %v2854_v30, %v2856_v60  ;;  %v6475_v62 = vsel %vm535_vm4, %v2856_v60, %v6452_v22 }
 0x54b   :  { %2859 = vrot.lane.b32.xlu1 %v6170_v10, %s4621_s9  ;;  %3389 = vrot.lane.b32.xlu2 %v6126_v27, %s4625_s13 }
 0x54c   :  { %3117 = vrot.lane.b32.xlu0 %v6145_v59, %s4623_s11 }
 0x54d   :  { %v3508_v32 = vpop.permute.xlu1 %3507  ;;  %v6483_v3 = vpop.permute.xlu2 %3109 }
 0x54e   :  { %v3542_v2 = vsel %vm1272_vm7, %v3508_v32, %v6436_v42  ;;  %v3504_v30 = vpop.permute.xlu0 %3503 }
 0x54f   :  { %v3539_v60 = vsel %vm1272_vm7, %v6248_v28, %v3504_v30  ;;  %3844 = vmatpush.msra.mxu2 %v3542_v2 }
 0x550   :  { %3784 = vmatpush.msra.mxu3 %v3539_v60 }
 0x552   :  { %3785 = vmatpush.msra.mxu3 %v3407_v43 }
 0x553   :  { %3393 = vrot.lane.b32.xlu1 %v6188_v50, %s4625_s13  ;;  %3527 = vrot.lane.b32.xlu2 %v6149_v55, %s4624_s12 }
 0x554   :  { %2991 = vrot.lane.b32.xlu0 %v6170_v10, %s4622_s10  ;;  %3786 = vmatpush.msra.mxu3 %v3275_v56 }
 0x555   :  { %v3376_v59 = vpop.permute.xlu1 %3375  ;;  %v6495_v5 = vpop.permute.xlu2 %3247 }
 0x556   :  { %v3410_v1 = vsel %vm1125_vm10, %v3376_v59, %v3378_v26  ;;  %v3108_v7 = vpop.permute.xlu0 %3107 }
 0x557   :  { %v3143_v28 = vsel %vm830_vm6, %v6256_v15, %v3108_v7  ;;  %v3144_v43 = vsel %vm830_vm6, %v3108_v7, %v6483_v3  ;;  %3845 = vmatpush.msra.mxu2 %v3410_v1 }
 0x558   :  { %3787 = vmatpush.msra.mxu3 %v3143_v28 }
 0x55a   :  { %3788 = vmatpush.msra.mxu3 %v3011_v53 }
 0x55b   :  { %3259 = vrot.lane.b32.xlu1 %v6185_v16, %s4626_s14  ;;  %3261 = vrot.lane.b32.xlu2 %v6188_v50, %s4626_s14 }
 0x55c   :  { %3525 = vrot.lane.b32.xlu0 %v6188_v50, %s4624_s12  ;;  %3789 = vmatpush.msra.mxu3 %v2879_v49 }
 0x55d   :  { %v3242_v10 = vpop.permute.xlu1 %3241  ;;  %v6508_v56 = vpop.permute.xlu2 %2981 }
 0x55e   :  { %v3276_v15 = vsel %vm977_vm8, %v3240_v58, %v3242_v10  ;;  %v3277_v7 = vsel %vm977_vm8, %v3242_v10, %v6466_v36  ;;  %v3506_v1 = vpop.permute.xlu0 %3505  ;;  %3790 = vmatpush.msra.mxu3 %v6326_v40 }
 0x55f   :  { %v3540_v53 = vsel %vm1272_vm7, %v3504_v30, %v3506_v1  ;;  %v3541_v2 = vsel %vm1272_vm7, %v3506_v1, %v3508_v32 }
 0x560   :  { %3791 = vmatpush.msra.mxu3 %v6286_v46  ;;  %3804 = vmatpush.msra.mxu0 %v3540_v53  ;;  %v2948_v53 = vld [vmem:[#allocation3 + $0x68] sm:$0xff] }
 0x561   :  { %3824 = vmatpush.msrb.mxu1 %v3541_v2 }
 0x562   :  { %3792 = vmatpush.msra.mxu3 %v6088_v17 }
 0x563   :  { %3125 = vrot.lane.b32.xlu1 %v6126_v27, %s4623_s11  ;;  %3127 = vrot.lane.b32.xlu2 %v6185_v16, %s4623_s11 }
 0x564   :  { %3391 = vrot.lane.b32.xlu0 %v6185_v16, %s4625_s13 }
 0x565   :  { %v6524_v40 = vpop.permute.xlu1 %3379  ;;  %v6526_v49 = vpop.permute.xlu2 %3517 }
 0x566   :  { %v3411_v46 = vsel %vm1125_vm10, %v3378_v26, %v6524_v40  ;;  %v3374_v58 = vpop.permute.xlu0 %3373 }
 0x567   :  { %v3408_v17 = vsel %vm1125_vm10, %v6406_v45, %v3374_v58  ;;  %v3409_v32 = vsel %vm1125_vm10, %v3374_v58, %v3376_v59 }
 0x568   :  { %3805 = vmatpush.msra.mxu0 %v3408_v17  ;;  %3825 = vmatpush.msrb.mxu1 %v3409_v32 }
 0x56a   :  { %3806 = vmatpush.msra.mxu0 %v3276_v15  ;;  %3826 = vmatpush.msrb.mxu1 %v3277_v7 }
 0x56b   :  { %3263 = vrot.lane.b32.xlu1 %v6149_v55, %s4626_s14  ;;  %2993 = vrot.lane.b32.xlu2 %v6126_v27, %s4622_s10 }
 0x56c   :  { %3257 = vrot.lane.b32.xlu0 %v6126_v27, %s4626_s14  ;;  %3807 = vmatpush.msra.mxu0 %v3144_v43 }
 0x56d   :  { %v6539_v26 = vpop.permute.xlu1 %3113  ;;  %v3386_v30 = vpop.permute.xlu2 %3385 }
 0x56e   :  { %v6541_v45 = vpop.permute.xlu0 %3511 }
 0x56f   :  { %v3543_v60 = vsel %vm1272_vm7, %v6436_v42, %v6541_v45 }
 0x570   :  { %3864 = vmatpush.msrb.mxu3 %v3543_v60 }
 0x572   :  { %3865 = vmatpush.msrb.mxu3 %v3411_v46 }
 0x573   :  { %2997 = vrot.lane.b32.xlu1 %v6188_v50, %s4622_s10  ;;  %3131 = vrot.lane.b32.xlu2 %v6149_v55, %s4623_s11 }
 0x574   :  { %3395 = vrot.lane.b32.xlu0 %v6149_v55, %s4625_s13 }
 0x575   :  { %v2980_v27 = vpop.permute.xlu1 %2979  ;;  %v6552_v59 = vpop.permute.xlu2 %3251 }
 0x576   :  { %v3014_v28 = vsel %vm682_vm5, %v2980_v27, %v6508_v56  ;;  %v3246_v43 = vpop.permute.xlu0 %3245 }
 0x577   :  { %v3278_v42 = vsel %vm977_vm8, %v6466_v36, %v3246_v43  ;;  %v3279_v10 = vsel %vm977_vm8, %v3246_v43, %v6495_v5 }
 0x578   :  { %3846 = vmatpush.msra.mxu2 %v3278_v42  ;;  %3866 = vmatpush.msrb.mxu3 %v3279_v10 }
 0x57b   :  { %3533 = vrot.lane.b32.xlu1 %v6174_v57, %s4624_s12  ;;  %2861 = vrot.lane.b32.xlu2 %v6163_v39, %s4621_s9 }
 0x57c   :  { %3129 = vrot.lane.b32.xlu0 %v6188_v50, %s4623_s11 }
 0x57d   :  { %v6566_v55 = vpop.permute.xlu1 %3515  ;;  %v6568_v15 = vpop.permute.xlu2 %3387 }
 0x57e   :  { %v3546_v36 = vsel %vm1272_vm7, %v6566_v55, %v6526_v49  ;;  %v3112_v7 = vpop.permute.xlu0 %3111  ;;  %v6579_v39 = vsel %vm1125_vm10, %v3386_v30, %v6568_v15 }
 0x57f   :  { %v3145_v1 = vsel %vm830_vm6, %v6483_v3, %v3112_v7  ;;  %v3146_v57 = vsel %vm830_vm6, %v3112_v7, %v6539_v26 }
 0x580   :  { %3827 = vmatpush.msrb.mxu1 %v3145_v1  ;;  %3847 = vmatpush.msra.mxu2 %v3146_v57 }
 0x582   :  { %3848 = vmatpush.msra.mxu2 %v3014_v28 }
 0x583   :  { %2865 = vrot.lane.b32.xlu1 %v6188_v50, %s4621_s9  ;;  %2999 = vrot.lane.b32.xlu2 %v2948_v53, %s4622_s10 }
 0x584   :  { %2995 = vrot.lane.b32.xlu0 %v6185_v16, %s4622_s10  ;;  %3849 = vmatpush.msra.mxu2 %v6455_v51  ;;  %v6601_v51 = vld [vmem:[#allocation3 + $0x80] sm:$0xff] }
 0x585   :  { %v3384_v3 = vpop.permute.xlu1 %3383  ;;  %v3250_v2 = vpop.permute.xlu2 %3249 }
 0x586   :  { %v3414_v46 = vsel %vm1125_vm10, %v3384_v3, %v3386_v30  ;;  %v2978_v58 = vpop.permute.xlu0 %2977  ;;  %3850 = vmatpush.msra.mxu2 %v6352_v31  ;;  %v6594_v50 = vsel %vm977_vm8, %v6495_v5, %v3250_v2  ;;  %v6598_v16 = vsel %vm977_vm8, %v3250_v2, %v6552_v59  ;;  %v6610_v5 = vld [vmem:[#allocation3 + $0x70] sm:$0xff] }
 0x587   :  { %v3012_v17 = vsel %vm682_vm5, %v6420_v21, %v2978_v58  ;;  %v3013_v32 = vsel %vm682_vm5, %v2978_v58, %v2980_v27  ;;  %v3639_v58 = vld [vmem:[#allocation4 + $0x158] sm:$0xff] }
 0x588   :  { %3808 = vmatpush.msra.mxu0 %v3012_v17  ;;  %3828 = vmatpush.msrb.mxu1 %v3013_v32 }
 0x589   :  { %3851 = vmatpush.msra.mxu2 %v6301_v52  ;;  %v6615_v52 = vld [vmem:[%s7274_s2] sm:$0xff] }
 0x58a   :  { %3809 = vmatpush.msra.mxu0 %v6444_v35  ;;  %3829 = vmatpush.msrb.mxu1 %v6423_v61 }
 0x58b   :  { %3401 = vrot.lane.b32.xlu1 %v6601_v51, %s4625_s13  ;;  %3852 = vmatpush.msra.mxu2 %v6155_v34 }
 0x58c   :  { %3531 = vrot.lane.b32.xlu0 %v6200_v54, %s4624_s12  ;;  %3529 = vrot.lane.b32.xlu2 %v6610_v5, %s4624_s12 }
 0x58d   :  { %3924 = vmatpush.msrb.mxu2 %v3546_v36  ;;  %v6617_v31 = vpop.permute.xlu1 %3519  ;;  %3810 = vmatpush.msra.mxu0 %v6364_v12  ;;  %v6622_v34 = vpop.permute.xlu2 %2989 }
 0x58e   :  { %v3547_v54 = vsel %vm1272_vm7, %v6526_v49, %v6617_v31  ;;  %v6627_v21 = vpop.permute.xlu0 %3115  ;;  %3830 = vmatpush.msrb.mxu1 %v6367_v19  ;;  %4470 = vmatmul.msk.f32.vlgmr.msra.gmra.mxu3 %vm3773_vm0, %v6615_v52 }
 0x58f   :  { %3925 = vmatpush.msrb.mxu2 %v3414_v46  ;;  %v3147_v61 = vsel %vm830_vm6, %v6539_v26, %v6627_v21  ;;  %3811 = vmatpush.msra.mxu0 %v6289_v23 }
 0x590   :  { %3831 = vmatpush.msrb.mxu1 %v6292_v37  ;;  %3867 = vmatpush.msrb.mxu3 %v3147_v61 }
 0x591   :  { %3812 = vmatpush.msra.mxu0 %v6135_v47  ;;  %4473 = vmatmul.msk.f32.vlgmr.msra.gmra.mxu2 %vm3773_vm0, %v6615_v52 }
 0x592   :  { %3832 = vmatpush.msrb.mxu1 %v6138_v4  ;;  %4471 = vmatmul.msk.f32.vlgmr.msra.gmra.mxu0 %vm3773_vm0, %v6615_v52 }
 0x593   :  { %2867 = vrot.lane.b32.xlu1 %v2948_v53, %s4621_s9  ;;  %4472 = vmatmul.msk.f32.vlgmr.msrb.gmra.mxu1 %vm3773_vm0, %v6615_v52 }
 0x594   :  { %2863 = vrot.lane.b32.xlu0 %v6202_v24, %s4621_s9  ;;  %3267 = vrot.lane.b32.xlu2 %v6216_v33, %s4626_s14  ;;  %v6663_v24 = vld [vmem:[#allocation3 + $0x88] sm:$0xff] }
 0x595   :  { %v3382_v23 = vpop.permute.xlu1 %3381  ;;  %v2986_v37 = vpop.permute.xlu2 %2985 }
 0x596   :  { %v3412_v47 = vsel %vm1125_vm10, %v6524_v40, %v3382_v23  ;;  %v3413_v4 = vsel %vm1125_vm10, %v3382_v23, %v3384_v3  ;;  %v2984_v12 = vpop.permute.xlu0 %2983 }
 0x597   :  { %v3015_v19 = vsel %vm682_vm5, %v6508_v56, %v2984_v12  ;;  %v6656_v35 = vsel %vm682_vm5, %v2984_v12, %v2986_v37  ;;  %v4527_v12 = vld [vmem:[#allocation4 + $0x40] sm:$0xff] }
 0x598   :  { %3868 = vmatpush.msrb.mxu3 %v3015_v19 }
 0x59a   :  { %3869 = vmatpush.msrb.mxu3 %v6458_v18 }
 0x59b   :  { %3397 = vrot.lane.b32.xlu1 %v6610_v5, %s4625_s13 }
 0x59c   :  { %3399 = vrot.lane.b32.xlu0 %v6216_v33, %s4625_s13  ;;  %3870 = vmatpush.msrb.mxu3 %v6377_v41 }
 0x59d   :  { %v3122_v40 = vpop.permute.xlu1 %3121  ;;  %3403 = vrot.lane.b32.xlu2 %v6663_v24, %s4625_s13  ;;  %v6668_v56 = vpop.permute.xlu2 %3523 }
 0x59e   :  { %v3514_v49 = vpop.permute.xlu0 %3513  ;;  %3871 = vmatpush.msrb.mxu3 %v6304_v29 }
 0x59f   :  { %v3544_v18 = vsel %vm1272_vm7, %v6541_v45, %v3514_v49  ;;  %v3545_v26 = vsel %vm1272_vm7, %v3514_v49, %v6566_v55 }
 0x5a0   :  { %3872 = vmatpush.msrb.mxu3 %v6160_v14  ;;  %3884 = vmatpush.msrb.mxu0 %v3544_v18 }
 0x5a1   :  { %3904 = vmatpush.msra.mxu1 %v3545_v26  ;;  %4474 = vmatmul.msk.f32.vlgmr.msrb.gmra.mxu3 %vm3773_vm0, %v6615_v52 }
 0x5a2   :  { %3944 = vmatpush.msra.mxu3 %v3547_v54  ;;  %3885 = vmatpush.msrb.mxu0 %v3412_v47  ;;  %v4525_v54 = vld [vmem:[#allocation4 + $0x28] sm:$0xff] }
 0x5a3   :  { %3137 = vrot.lane.b32.xlu1 %v6601_v51, %s4623_s11  ;;  %3905 = vmatpush.msra.mxu1 %v3413_v4  ;;  %v3623_v4 = vld [vmem:[#allocation4 + $0xd8] sm:$0xff] }
 0x5a4   :  { %3535 = vrot.lane.b32.xlu0 %v6663_v24, %s4624_s12  ;;  %3945 = vmatpush.msra.mxu3 %v6579_v39  ;;  %v4524_v39 = vld [vmem:[#allocation4 + $0x38] sm:$0xff] }
 0x5a5   :  { %v2988_v29 = vpop.permute.xlu1 %2987  ;;  %3265 = vrot.lane.b32.xlu2 %v6610_v5, %s4626_s14  ;;  %3886 = vmatpush.msrb.mxu0 %v6594_v50  ;;  %v6686_v14 = vpop.permute.xlu2 %3389  ;;  %v3640_v50 = vld [vmem:[#allocation4 + $0x160] sm:$0xff] }
 0x5a6   :  { %v3017_v41 = vsel %vm682_vm5, %v2986_v37, %v2988_v29  ;;  %v3018_v30 = vsel %vm682_vm5, %v2988_v29, %v6622_v34  ;;  %v3254_v45 = vpop.permute.xlu0 %3253  ;;  %3906 = vmatpush.msra.mxu1 %v6598_v16  ;;  %v6697_v27 = vsel %vm1125_vm10, %v6568_v15, %v6686_v14 }
 0x5a7   :  { %v3282_v60 = vsel %vm977_vm8, %v6552_v59, %v3254_v45 }
 0x5a8   :  { %3926 = vmatpush.msrb.mxu2 %v3282_v60 }
 0x5ab   :  { %3003 = vrot.lane.b32.xlu1 %v6216_v33, %s4622_s10 }
 0x5ac   :  { %3269 = vrot.lane.b32.xlu0 %v6601_v51, %s4626_s14 }
 0x5ad   :  { %v6703_v28 = vpop.permute.xlu1 %3123  ;;  %3005 = vrot.lane.b32.xlu2 %v6601_v51, %s4622_s10  ;;  %v6707_v43 = vpop.permute.xlu2 %3527 }
 0x5ae   :  { %v3151_v59 = vsel %vm830_vm6, %v3122_v40, %v6703_v28  ;;  %v3120_v42 = vpop.permute.xlu0 %3119 }
 0x5af   :  { %v3150_v10 = vsel %vm830_vm6, %v3120_v42, %v3122_v40 }
 0x5b0   :  { %3927 = vmatpush.msrb.mxu2 %v3150_v10 }
 0x5b2   :  { %3928 = vmatpush.msrb.mxu2 %v3018_v30 }
 0x5b3   :  { %3139 = vrot.lane.b32.xlu1 %v6663_v24, %s4623_s11 }
 0x5b4   :  { %3135 = vrot.lane.b32.xlu0 %v6216_v33, %s4623_s11  ;;  %3929 = vmatpush.msrb.mxu2 %v6475_v62  ;;  %v3622_v62 = vld [vmem:[#allocation4 + $0xd0] sm:$0xff] }
 0x5b5   :  { %v3522_v55 = vpop.permute.xlu1 %3521  ;;  %2871 = vrot.lane.b32.xlu2 %v6216_v33, %s4621_s9  ;;  %v6719_v15 = vpop.permute.xlu2 %3261 }
 0x5b6   :  { %v3548_v36 = vsel %vm1272_vm7, %v6617_v31, %v3522_v55  ;;  %v3549_v7 = vsel %vm1272_vm7, %v3522_v55, %v6668_v56  ;;  %v6725_v1 = vpop.permute.xlu0 %3255  ;;  %3930 = vmatpush.msrb.mxu2 %v6388_v20  ;;  %v3621_v31 = vld [vmem:[#allocation4 + $0xc8] sm:$0xff]  ;;  %v3643_v55 = vld [vmem:[#allocation4 + $0x178] sm:$0xff] }
 0x5b7   :  { %v3283_v57 = vsel %vm977_vm8, %v3254_v45, %v6725_v1 }
 0x5b8   :  { %3931 = vmatpush.msrb.mxu2 %v3622_v62  ;;  %3946 = vmatpush.msra.mxu3 %v3283_v57 }
 0x5ba   :  { %3932 = vmatpush.msrb.mxu2 %v4524_v39  ;;  %3947 = vmatpush.msra.mxu3 %v3151_v59 }
 0x5bb   :  { %3001 = vrot.lane.b32.xlu1 %v6610_v5, %s4622_s10  ;;  %4477 = vmatmul.msk.f32.vlgmr.msrb.gmra.mxu2 %vm3773_vm0, %v6615_v52 }
 0x5bc   :  { %3271 = vrot.lane.b32.xlu0 %v6663_v24, %s4626_s14 }
 0x5bd   :  { %v6736_v33 = vpop.permute.xlu1 %2859  ;;  %3007 = vrot.lane.b32.xlu2 %v6663_v24, %s4622_s10  ;;  %v6740_v20 = vpop.permute.xlu2 %3127 }
 0x5be   :  { %v2887_v53 = vsel %vm535_vm4, %v6452_v22, %v6736_v33  ;;  %v3118_v3 = vpop.permute.xlu0 %3117 }
 0x5bf   :  { %v3148_v2 = vsel %vm830_vm6, %v6627_v21, %v3118_v3  ;;  %v3149_v46 = vsel %vm830_vm6, %v3118_v3, %v3120_v42  ;;  %v3642_v21 = vld [vmem:[#allocation4 + $0x170] sm:$0xff] }
 0x5c0   :  { %3887 = vmatpush.msrb.mxu0 %v3148_v2  ;;  %3907 = vmatpush.msra.mxu1 %v3149_v46 }
 0x5c2   :  { %3888 = vmatpush.msrb.mxu0 %v6656_v35  ;;  %3908 = vmatpush.msra.mxu1 %v3017_v41 }
 0x5c3   :  { %2869 = vrot.lane.b32.xlu1 %v6610_v5, %s4621_s9 }
 0x5c4   :  { %3133 = vrot.lane.b32.xlu0 %v6610_v5, %s4623_s11  ;;  %3889 = vmatpush.msrb.mxu0 %v6439_v11  ;;  %v3620_v5 = vld [vmem:[#allocation4 + $0xc0] sm:$0xff] }
 0x5c5   :  { %v6754_v22 = vpop.permute.xlu1 %3393  ;;  %2875 = vrot.lane.b32.xlu2 %v6663_v24, %s4621_s9  ;;  %3909 = vmatpush.msra.mxu1 %v6471_v9  ;;  %v6759_v17 = vpop.permute.xlu2 %2993  ;;  %v4526_v9 = vld [vmem:[#allocation4 + $0x30] sm:$0xff] }
 0x5c6   :  { %v2992_v32 = vpop.permute.xlu0 %2991  ;;  %3890 = vmatpush.msrb.mxu0 %v3639_v58 }
 0x5c7   :  { %v3019_v16 = vsel %vm682_vm5, %v6622_v34, %v2992_v32  ;;  %3910 = vmatpush.msra.mxu1 %v3640_v50  ;;  %v3020_v11 = vsel %vm682_vm5, %v2992_v32, %v6759_v17 }
 0x5c8   :  { %3891 = vmatpush.msrb.mxu0 %v3620_v5  ;;  %3948 = vmatpush.msra.mxu3 %v3019_v16 }
 0x5c9   :  { %3911 = vmatpush.msra.mxu1 %v3621_v31 }
 0x5ca   :  { %3892 = vmatpush.msrb.mxu0 %v4525_v54  ;;  %3949 = vmatpush.msra.mxu3 %v2887_v53 }
 0x5cb   :  { %3273 = vrot.lane.b32.xlu1 %v6223_v38, %s4626_s14  ;;  %3912 = vmatpush.msra.mxu1 %v4526_v9 }
 0x5cc   :  { %2873 = vrot.lane.b32.xlu0 %v6601_v51, %s4621_s9  ;;  %3964 = vmatpush.msra.mxu0 %v3548_v36  ;;  %v4528_v36 = vld [vmem:[#allocation4 + $0x48] sm:$0xff] }
 0x5cd   :  { %v3260_v34 = vpop.permute.xlu1 %3259  ;;  %3984 = vmatpush.msrb.mxu1 %v3549_v7  ;;  %3141 = vrot.lane.b32.xlu2 %v6223_v38, %s4623_s11  ;;  %v6771_v61 = vpop.permute.xlu2 %3131 }
 0x5ce   :  { %v3286_v23 = vsel %vm977_vm8, %v3260_v34, %v6719_v15  ;;  %v3526_v37 = vpop.permute.xlu0 %3525  ;;  %3950 = vmatpush.msra.mxu3 %v3642_v21  ;;  %3965 = vmatpush.msra.mxu0 %v6697_v27  ;;  %v3646_v21 = vld [vmem:[#allocation4 + $0x190] sm:$0xff] }
 0x5cf   :  { %v3550_v47 = vsel %vm1272_vm7, %v6668_v56, %v3526_v37  ;;  %v3551_v51 = vsel %vm1272_vm7, %v3526_v37, %v6707_v43  ;;  %4475 = vmatmul.msk.f32.vlgmr.msrb.gmra.mxu0 %vm3773_vm0, %v6615_v52  ;;  %4476 = vmatmul.msk.f32.vlgmr.msra.gmra.mxu1 %vm3773_vm0, %v6615_v52  ;;  %v3645_v37 = vld [vmem:[#allocation4 + $0x188] sm:$0xff] }
 0x5d0   :  { %3951 = vmatpush.msra.mxu3 %v3623_v4  ;;  %4004 = vmatpush.msra.mxu2 %v3550_v47  ;;  %v3627_v47 = vld [vmem:[#allocation4 + $0xf8] sm:$0xff]  ;;  %v3626_v4 = vld [vmem:[#allocation4 + $0xf0] sm:$0xff] }
 0x5d2   :  { %3952 = vmatpush.msra.mxu3 %v4527_v12 }
 0x5d3   :  { %2877 = vrot.lane.b32.xlu1 %v6223_v38, %s4621_s9  ;;  %4478 = vmatmul.msk.f32.vlgmr.msra.gmra.mxu3 %vm3773_vm0, %v6615_v52 }
 0x5d4   :  { %4024 = vmatpush.msrb.mxu3 %v3551_v51  ;;  %3537 = vrot.lane.b32.xlu0 %v6223_v38, %s4624_s12  ;;  %v3625_v51 = vld [vmem:[#allocation4 + $0xe8] sm:$0xff] }
 0x5d5   :  { %v3126_v19 = vpop.permute.xlu1 %3125  ;;  %v6790_v35 = vpop.permute.xlu2 %2861 }
 0x5d6   :  { %v3152_v24 = vsel %vm830_vm6, %v6703_v28, %v3126_v19  ;;  %v3153_v40 = vsel %vm830_vm6, %v3126_v19, %v6740_v20  ;;  %v3392_v56 = vpop.permute.xlu0 %3391  ;;  %v2888_v26 = vsel %vm535_vm4, %v6736_v33, %v6790_v35  ;;  %v4529_v19 = vld [vmem:[#allocation4 + $0x60] sm:$0xff] }
 0x5d7   :  { %v3417_v49 = vsel %vm1125_vm10, %v6686_v14, %v3392_v56  ;;  %v3418_v18 = vsel %vm1125_vm10, %v3392_v56, %v6754_v22  ;;  %v4531_v56 = vld [vmem:[#allocation4 + $0x58] sm:$0xff] }
 0x5d8   :  { %3985 = vmatpush.msrb.mxu1 %v3417_v49  ;;  %4005 = vmatpush.msra.mxu2 %v3418_v18 }
 0x5da   :  { %4006 = vmatpush.msra.mxu2 %v3286_v23  ;;  %v3644_v23 = vld [vmem:[#allocation4 + $0x180] sm:$0xff] }
 0x5dc   :  { %3405 = vrot.lane.b32.xlu0 %v6223_v38, %s4625_s13 }
 0x5dd   :  { %v3264_v29 = vpop.permute.xlu1 %3263  ;;  %v6805_v41 = vpop.permute.xlu2 %2999 }
 0x5de   :  { %v3287_v30 = vsel %vm977_vm8, %v6719_v15, %v3264_v29  ;;  %v3258_v14 = vpop.permute.xlu0 %3257 }
 0x5df   :  { %v3284_v45 = vsel %vm977_vm8, %v6725_v1, %v3258_v14  ;;  %v3285_v60 = vsel %vm977_vm8, %v3258_v14, %v3260_v34 }
 0x5e0   :  { %3966 = vmatpush.msra.mxu0 %v3284_v45  ;;  %3986 = vmatpush.msrb.mxu1 %v3285_v60 }
 0x5e2   :  { %3967 = vmatpush.msra.mxu0 %v3152_v24  ;;  %3987 = vmatpush.msrb.mxu1 %v3153_v40  ;;  %v4530_v40 = vld [vmem:[#allocation4 + $0x50] sm:$0xff] }
 0x5e4   :  { %3009 = vrot.lane.b32.xlu0 %v6223_v38, %s4622_s10  ;;  %3968 = vmatpush.msra.mxu0 %v3020_v11  ;;  %v3624_v38 = vld [vmem:[#allocation4 + $0xe0] sm:$0xff] }
 0x5e5   :  { %v2998_v27 = vpop.permute.xlu1 %2997 }
 0x5e6   :  { %v6814_v28 = vpop.permute.xlu0 %3395  ;;  %v3023_v59 = vsel %vm682_vm5, %v2998_v27, %v6805_v41  ;;  %3969 = vmatpush.msra.mxu0 %v2888_v26  ;;  %v3530_v10 = vpop.permute.xlu2 %3529 }
 0x5e7   :  { %v3419_v42 = vsel %vm1125_vm10, %v6754_v22, %v6814_v28  ;;  %v3552_v15 = vsel %vm1272_vm7, %v6707_v43, %v3530_v10 }
 0x5e8   :  { %3970 = vmatpush.msra.mxu0 %v3643_v55  ;;  %4025 = vmatpush.msrb.mxu3 %v3419_v42 }
 0x5ea   :  { %3971 = vmatpush.msra.mxu0 %v3624_v38  ;;  %4026 = vmatpush.msrb.mxu3 %v3287_v30 }
 0x5ec   :  { %3972 = vmatpush.msra.mxu0 %v4528_v36 }
 0x5ed   :  { %v6823_v7 = vpop.permute.xlu1 %3533  ;;  %4479 = vmatmul.msk.f32.vlgmr.msra.gmra.mxu0 %vm3773_vm0, %v6615_v52 }
 0x5ee   :  { %4044 = vmatpush.msrb.mxu0 %v3552_v15  ;;  %v3130_v1 = vpop.permute.xlu0 %3129  ;;  %v6831_v62 = vpop.permute.xlu2 %3267 }
 0x5ef   :  { %v3154_v57 = vsel %vm830_vm6, %v6740_v20, %v3130_v1  ;;  %v3155_v43 = vsel %vm830_vm6, %v3130_v1, %v6771_v61 }
 0x5f0   :  { %4007 = vmatpush.msra.mxu2 %v3154_v57  ;;  %4027 = vmatpush.msrb.mxu3 %v3155_v43 }
 0x5f2   :  { %4028 = vmatpush.msrb.mxu3 %v3023_v59 }
 0x5f5   :  { %v2866_v39 = vpop.permute.xlu1 %2865 }
 0x5f6   :  { %v2996_v33 = vpop.permute.xlu0 %2995 }
 0x5f7   :  { %v3021_v53 = vsel %vm682_vm5, %v6759_v17, %v2996_v33  ;;  %v3022_v3 = vsel %vm682_vm5, %v2996_v33, %v2998_v27  ;;  %v6836_v2 = vpop.permute.xlu2 %3403 }
 0x5f8   :  { %3988 = vmatpush.msrb.mxu1 %v3021_v53  ;;  %4008 = vmatpush.msra.mxu2 %v3022_v3 }
 0x5fd   :  { %v3402_v20 = vpop.permute.xlu1 %3401 }
 0x5fe   :  { %v3532_v46 = vpop.permute.xlu0 %3531  ;;  %v3423_v22 = vsel %vm1125_vm10, %v3402_v20, %v6836_v2 }
 0x5ff   :  { %v3553_v58 = vsel %vm1272_vm7, %v3530_v10, %v3532_v46  ;;  %v3554_v32 = vsel %vm1272_vm7, %v3532_v46, %v6823_v7  ;;  %v3266_v50 = vpop.permute.xlu2 %3265 }
 0x600   :  { %v3288_v16 = vsel %vm977_vm8, %v3264_v29, %v3266_v50  ;;  %v3289_v17 = vsel %vm977_vm8, %v3266_v50, %v6831_v62  ;;  %v3647_v50 = vld [vmem:[#allocation4 + $0x198] sm:$0xff] }
 0x605   :  { %v6846_v11 = vpop.permute.xlu1 %2867 }
 0x606   :  { %v2891_v5 = vsel %vm535_vm4, %v2866_v39, %v6846_v11  ;;  %v2864_v31 = vpop.permute.xlu0 %2863 }
 0x607   :  { %v2889_v54 = vsel %vm535_vm4, %v6790_v35, %v2864_v31  ;;  %v2890_v9 = vsel %vm535_vm4, %v2864_v31, %v2866_v39  ;;  %v3006_v34 = vpop.permute.xlu2 %3005  ;;  %4029 = vmatpush.msrb.mxu3 %v2891_v5  ;;  %v3628_v31 = vld [vmem:[#allocation4 + $0x100] sm:$0xff] }
 0x608   :  { %3989 = vmatpush.msrb.mxu1 %v2889_v54  ;;  %4009 = vmatpush.msra.mxu2 %v2890_v9  ;;  %v3629_v54 = vld [vmem:[#allocation4 + $0x108] sm:$0xff] }
 0x609   :  { %4030 = vmatpush.msrb.mxu3 %v3646_v21  ;;  %v4532_v9 = vld [vmem:[#allocation4 + $0x68] sm:$0xff] }
 0x60a   :  { %3990 = vmatpush.msrb.mxu1 %v3644_v23  ;;  %4010 = vmatpush.msra.mxu2 %v3645_v37  ;;  %v3649_v21 = vld [vmem:[#allocation4 + $0x1a8] sm:$0xff]  ;;  %v3650_v23 = vld [vmem:[#allocation4 + $0x1b0] sm:$0xff] }
 0x60b   :  { %4031 = vmatpush.msrb.mxu3 %v3627_v47  ;;  %v3630_v37 = vld [vmem:[#allocation4 + $0x110] sm:$0xff]  ;;  %v3631_v47 = vld [vmem:[#allocation4 + $0x118] sm:$0xff] }
 0x60c   :  { %3991 = vmatpush.msrb.mxu1 %v3625_v51  ;;  %4011 = vmatpush.msra.mxu2 %v3626_v4 }
 0x60d   :  { %v3398_v12 = vpop.permute.xlu1 %3397  ;;  %4032 = vmatpush.msrb.mxu3 %v4529_v19  ;;  %v7365_v19 = vmov 1  }
 0x60e   :  { %v3420_v35 = vsel %vm1125_vm10, %v6814_v28, %v3398_v12  ;;  %v3400_v24 = vpop.permute.xlu0 %3399  ;;  %3992 = vmatpush.msrb.mxu1 %v4530_v40  ;;  %4012 = vmatpush.msra.mxu2 %v4531_v56  ;;  %v4535_v40 = vld [vmem:[#allocation4 + $0x80] sm:$0xff] }
 0x60f   :  { %v3421_v49 = vsel %vm1125_vm10, %v3398_v12, %v3400_v24  ;;  %v3422_v18 = vsel %vm1125_vm10, %v3400_v24, %v3402_v20  ;;  %v6857_v26 = vpop.permute.xlu2 %2871  ;;  %4045 = vmatpush.msrb.mxu0 %v3420_v35  ;;  %4481 = vmatmul.msk.f32.vlgmr.msra.gmra.mxu2 %vm3773_vm0, %v6615_v52  ;;  %v4534_v24 = vld [vmem:[#allocation4 + $0x78] sm:$0xff] }
 0x610   :  { %4064 = vmatpush.msra.mxu1 %v3553_v58  ;;  %4084 = vmatpush.msrb.mxu2 %v3554_v32  ;;  %v6899_v58 = vld [vmem:[%s7276_s4] sm:$0xff]  ;;  %s4632_s4 = smov [#allocation10]  }
 0x611   :  { %4046 = vmatpush.msrb.mxu0 %v3288_v16  ;;  %4482 = vmatmul.msk.f32.vlgmr.msrb.gmra.mxu3 %vm3773_vm0, %v6615_v52  ;;  %v3648_v16 = vld [vmem:[#allocation4 + $0x1a0] sm:$0xff]  ;;  %s4400_s7 = sshll.u32 %s4632_s4, 4  ;;  %s4401_s7 = int_to_ptr.vmem [resolvable:$true] %s4400_s7 }
 0x612   :  { %4065 = vmatpush.msra.mxu1 %v3421_v49  ;;  %4085 = vmatpush.msrb.mxu2 %v3422_v18 }
 0x613   :  { %4480 = vmatmul.msk.f32.vlgmr.msrb.gmra.mxu1 %vm3773_vm0, %v6615_v52  ;;  %3770 = vperm.xlu2 %4513, %v6899_v58  }
 0x614   :  { %4066 = vmatpush.msra.mxu1 %v3289_v17 }
 0x615   :  { %v3138_v29 = vpop.permute.xlu1 %3137 }
 0x616   :  { %v6865_v30 = vpop.permute.xlu0 %3535 }
 0x617   :  { %v3555_v14 = vsel %vm1272_vm7, %v6823_v7, %v6865_v30  ;;  %v6870_v45 = vpop.permute.xlu2 %3007 }
 0x618   :  { %v3027_v60 = vsel %vm682_vm5, %v3006_v34, %v6870_v45  ;;  %4104 = vmatpush.msra.mxu3 %v3555_v14 }
 0x61a   :  { %4105 = vmatpush.msra.mxu3 %v3423_v22 }
 0x61b   :  { %4514 = vset.pattern.permute.xlu2 %v7365_v19 }
 0x61d   :  { %v3004_v27 = vpop.permute.xlu1 %3003 }
 0x61e   :  { %v3026_v28 = vsel %vm682_vm5, %v3004_v27, %v3006_v34  ;;  %v3270_v59 = vpop.permute.xlu0 %3269  ;;  %v4533_v34 = vld [vmem:[#allocation4 + $0x70] sm:$0xff] }
 0x61f   :  { %v3290_v42 = vsel %vm977_vm8, %v6831_v62, %v3270_v59  ;;  %v6877_v10 = vpop.permute.xlu2 %2875 }
 0x620   :  { %4086 = vmatpush.msrb.mxu2 %v3290_v42  ;;  %v4536_v42 = vld [vmem:[#allocation4 + $0x88] sm:$0xff] }
 0x625   :  { %v3140_v55 = vpop.permute.xlu1 %3139 }
 0x626   :  { %v3159_v15 = vsel %vm830_vm6, %v3138_v29, %v3140_v55  ;;  %v3136_v38 = vpop.permute.xlu0 %3135 }
 0x627   :  { %v3158_v36 = vsel %vm830_vm6, %v3136_v38, %v3138_v29  ;;  %v3142_v7 = vpop.permute.xlu2 %3141 }
 0x628   :  { %v6882_v1 = vsel %vm830_vm6, %v3140_v55, %v3142_v7  ;;  %4087 = vmatpush.msrb.mxu2 %v3158_v36  ;;  %3198 = vst.msk [vmem:[#allocation4 + $0x388] sm:$0xff] %vm2036_vm12, %v3142_v7  ;;  %v3614_v55 = vld [vmem:[#allocation4 + $0x90] sm:$0xff]  ;;  %v3794_v36 = vpop.f32.mrf.mxu3 }
 0x62a   :  { %4088 = vmatpush.msrb.mxu2 %v3026_v28 }
 0x62d   :  { %v3002_v57 = vpop.permute.xlu1 %3001 }
 0x62e   :  { %v3024_v43 = vsel %vm682_vm5, %v6805_v41, %v3002_v57  ;;  %v3025_v62 = vsel %vm682_vm5, %v3002_v57, %v3004_v27  ;;  %v3272_v39 = vpop.permute.xlu0 %3271  ;;  %v3632_v27 = vld [vmem:[#allocation4 + $0x120] sm:$0xff]  ;;  %v3834_v57 = vpop.f32.mrf.mxu1 }
 0x62f   :  { %v3291_v33 = vsel %vm977_vm8, %v3270_v59, %v3272_v39 }
 0x630   :  { %4106 = vmatpush.msra.mxu3 %v3291_v33 }
 0x632   :  { %4107 = vmatpush.msra.mxu3 %v3159_v15  ;;  %v3814_v15 = vpop.f32.mrf.mxu0 }
 0x634   :  { %4108 = vmatpush.msra.mxu3 %v3027_v60  ;;  %v3651_v60 = vld [vmem:[#allocation4 + $0x1b8] sm:$0xff] }
 0x635   :  { %v2870_v53 = vpop.permute.xlu1 %2869 }
 0x636   :  { %v2892_v3 = vsel %vm535_vm4, %v6846_v11, %v2870_v53  ;;  %v2893_v20 = vsel %vm535_vm4, %v2870_v53, %v6857_v26  ;;  %v3134_v46 = vpop.permute.xlu0 %3133 }
 0x637   :  { %v3156_v22 = vsel %vm830_vm6, %v6771_v61, %v3134_v46  ;;  %v3157_v41 = vsel %vm830_vm6, %v3134_v46, %v3136_v38 }
 0x638   :  { %4047 = vmatpush.msrb.mxu0 %v3156_v22  ;;  %4067 = vmatpush.msra.mxu1 %v3157_v41  ;;  %v3874_v41 = vpop.f32.mrf.mxu3 }
 0x63a   :  { %4048 = vmatpush.msrb.mxu0 %v3024_v43  ;;  %4068 = vmatpush.msra.mxu1 %v3025_v62 }
 0x63c   :  { %4049 = vmatpush.msrb.mxu0 %v2892_v3  ;;  %4069 = vmatpush.msra.mxu1 %v2893_v20 }
 0x63d   :  { %v3274_v32 = vpop.permute.xlu1 %3273 }
 0x63e   :  { %v3292_v61 = vsel %vm977_vm8, %v3272_v39, %v3274_v32  ;;  %3330 = vst.msk [vmem:[#allocation4 + $0x420] sm:$0xff] %vm2036_vm12, %v3274_v32  ;;  %v2874_v17 = vpop.permute.xlu0 %2873  ;;  %4050 = vmatpush.msrb.mxu0 %v3647_v50  ;;  %4070 = vmatpush.msra.mxu1 %v3648_v16  ;;  %v3854_v39 = vpop.f32.mrf.mxu2 }
 0x63f   :  { %v2894_v11 = vsel %vm535_vm4, %v6857_v26, %v2874_v17  ;;  %v2895_v5 = vsel %vm535_vm4, %v2874_v17, %v6877_v10 }
 0x640   :  { %4051 = vmatpush.msrb.mxu0 %v3628_v31  ;;  %4071 = vmatpush.msra.mxu1 %v3629_v54 }
 0x641   :  { %4089 = vmatpush.msrb.mxu2 %v2894_v11  ;;  %4109 = vmatpush.msra.mxu3 %v2895_v5 }
 0x642   :  { %4052 = vmatpush.msrb.mxu0 %v4532_v9  ;;  %4072 = vmatpush.msra.mxu1 %v4533_v34 }
 0x643   :  { %4090 = vmatpush.msrb.mxu2 %v3649_v21  ;;  %4110 = vmatpush.msra.mxu3 %v3650_v23 }
 0x644   :  { %4483 = vmatmul.msk.f32.vlgmr.msrb.gmra.mxu0 %vm3773_vm0, %v6615_v52  ;;  %4484 = vmatmul.msk.f32.vlgmr.msra.gmra.mxu1 %vm3773_vm0, %v6615_v52 }
 0x645   :  { %v2878_v51 = vpop.permute.xlu1 %2877  ;;  %4091 = vmatpush.msrb.mxu2 %v3630_v37  ;;  %4111 = vmatpush.msra.mxu3 %v3631_v47  ;;  %v3728_v14 = vld [vmem:[#allocation4 + $0x420] sm:$0xff] }
 0x646   :  { %v2896_v4 = vsel %vm535_vm4, %v6877_v10, %v2878_v51  ;;  %2934 = vst.msk [vmem:[#allocation4 + $0x258] sm:$0xff] %vm2036_vm12, %v2878_v51  ;;  %v3538_v12 = vpop.permute.xlu0 %3537  ;;  %v3633_v10 = vld [vmem:[#allocation4 + $0x128] sm:$0xff] }
 0x647   :  { %v3556_v35 = vsel %vm1272_vm7, %v6865_v30, %v3538_v12  ;;  %4092 = vmatpush.msrb.mxu2 %v4534_v24  ;;  %4112 = vmatpush.msra.mxu3 %v4535_v40  ;;  %3594 = vst.msk [vmem:[#allocation4 + $0x550] sm:$0xff] %vm2036_vm12, %v3538_v12 }
 0x648   :  { %4485 = vmatmul.msk.f32.vlgmr.msrb.gmra.mxu2 %vm3773_vm0, %v6615_v52  ;;  %4486 = vmatmul.msk.f32.vlgmr.msra.gmra.mxu3 %vm3773_vm0, %v6615_v52 }
 0x649   :  { %4124 = vmatpush.msra.mxu0 %v3556_v35 }
 0x64c   :  { %v3914_v34 = vpop.f32.mrf.mxu1 }
 0x64d   :  { %v3671_v59 = vld [vmem:[#allocation4 + $0x258] sm:$0xff] }
 0x64e   :  { %v3406_v56 = vpop.permute.xlu0 %3405  ;;  %v3766_v18 = vld [vmem:[#allocation4 + $0x550] sm:$0xff] }
 0x64f   :  { %v3424_v49 = vsel %vm1125_vm10, %v6836_v2, %v3406_v56  ;;  %3462 = vst.msk [vmem:[#allocation4 + $0x4b8] sm:$0xff] %vm2036_vm12, %v3406_v56  ;;  %4144 = vmatpush.msrb.mxu1 %v3766_v18  ;;  %v3709_v2 = vld [vmem:[#allocation4 + $0x388] sm:$0xff] }
 0x650   :  { %4125 = vmatpush.msra.mxu0 %v3424_v49 }
 0x652   :  { %4126 = vmatpush.msra.mxu0 %v3292_v61 }
 0x654   :  { %4127 = vmatpush.msra.mxu0 %v6882_v1 }
 0x656   :  { %v3010_v26 = vpop.permute.xlu0 %3009  ;;  %v3747_v29 = vld [vmem:[#allocation4 + $0x4b8] sm:$0xff] }
 0x657   :  { %v3028_v30 = vsel %vm682_vm5, %v6870_v45, %v3010_v26  ;;  %3066 = vst.msk [vmem:[#allocation4 + $0x2f0] sm:$0xff] %vm2036_vm12, %v3010_v26  ;;  %4145 = vmatpush.msrb.mxu1 %v3747_v29  ;;  %v3652_v45 = vld [vmem:[#allocation4 + $0x1c0] sm:$0xff] }
 0x658   :  { %4128 = vmatpush.msra.mxu0 %v3028_v30 }
 0x659   :  { %4146 = vmatpush.msrb.mxu1 %v3728_v14 }
 0x65a   :  { %4129 = vmatpush.msra.mxu0 %v2896_v4 }
 0x65b   :  { %4147 = vmatpush.msrb.mxu1 %v3709_v2 }
 0x65c   :  { %4130 = vmatpush.msra.mxu0 %v3651_v60 }
 0x65e   :  { %v3690_v28 = vld [vmem:[#allocation4 + $0x2f0] sm:$0xff]  ;;  %4131 = vmatpush.msra.mxu0 %v3632_v27 }
 0x65f   :  { %4148 = vmatpush.msrb.mxu1 %v3690_v28 }
 0x660   :  { %4132 = vmatpush.msra.mxu0 %v4536_v42 }
 0x661   :  { %4149 = vmatpush.msrb.mxu1 %v3671_v59  ;;  %4487 = vmatmul.msk.f32.vlgmr.msra.gmra.mxu0 %vm3773_vm0, %v6615_v52 }
 0x663   :  { %4150 = vmatpush.msrb.mxu1 %v3652_v45 }
 0x665   :  { %4151 = vmatpush.msrb.mxu1 %v3633_v10  ;;  %v7366_v10 = vld [vmem:[#allocation22_spill] sm:$0xff] }
 0x667   :  { %4152 = vmatpush.msrb.mxu1 %v3614_v55 }
 0x668   :  { %4488 = vmatmul.msk.f32.vlgmr.msrb.gmra.mxu1 %vm3773_vm0, %v6615_v52 }
 0x66d   :  { %v6934_v38 = vpop.permute.xlu2 %3770 }
 0x66e   :  { %v6937_v7 = vadd.f32 %v3794_v36, %v6934_v38  ;;  %v6940_v1 = vadd.f32 %v3814_v15, %v6934_v38  ;;  %v6943_v43 = vadd.f32 %v3834_v57, %v6934_v38  ;;  %v6958_v22 = vadd.f32 %v3854_v39, %v6934_v38  ;;  %v7367_v39 = vld [vmem:[#allocation24_spill] sm:$0xff] }
 0x66f   :  { %v6966_v11 = vadd.f32 %v3874_v41, %v6934_v38  ;;  %v6982_v4 = vadd.f32 %v3914_v34, %v6934_v38 }
 0x670   :  { %v4198_v62 = vmul.f32 %v6937_v7, %v6937_v7  ;;  %v4199_v52 = vmul.f32 %v6940_v1, %v6940_v1  ;;  %v4157_v33 = vmul.f32 %v6937_v7, %v5582_v25  ;;  %v4158_v53 = vmul.f32 %v6940_v1, %v5585_v63 }
 0x671   :  { %v4200_v3 = vmul.f32 %v6943_v43, %v6943_v43  ;;  %v4159_v32 = vmul.f32 %v6943_v43, %v5603_v6  ;;  %v4201_v17 = vmul.f32 %v6958_v22, %v6958_v22  ;;  %v4202_v9 = vmul.f32 %v6966_v11, %v6966_v11 }
 0x672   :  { %v4217_v20 = vmul.f32 %v4198_v62, %v5582_v25  ;;  %v4218_v46 = vmul.f32 %v4199_v52, %v5585_v63  ;;  %v4176_v50 = vadd.f32 %v4158_v53, %v4157_v33  ;;  %v3894_v25 = vpop.f32.mrf.mxu0  ;;  %v4160_v63 = vmul.f32 %v6958_v22, %v5624_v44 }
 0x673   :  { %v4219_v16 = vmul.f32 %v4200_v3, %v5603_v6  ;;  %v4220_v54 = vmul.f32 %v4201_v17, %v5624_v44  ;;  %v6974_v6 = vadd.f32 %v3894_v25, %v6934_v38  ;;  %v4161_v23 = vmul.f32 %v6966_v11, %v5648_v13  ;;  %v3934_v44 = vpop.f32.mrf.mxu2 }
 0x674   :  { %v4236_v61 = vadd.f32 %v4218_v46, %v4217_v20  ;;  %v4177_v5 = vadd.f32 %v4176_v50, %v4159_v32  ;;  %v4221_v47 = vmul.f32 %v4202_v9, %v5648_v13  ;;  %v4204_v40 = vmul.f32 %v6982_v4, %v6982_v4  ;;  %v3954_v13 = vpop.f32.mrf.mxu3  ;;  %v7368_v50 = vld [vmem:[#allocation25_spill] sm:$0xff] }
 0x675   :  { %v4203_v51 = vmul.f32 %v6974_v6, %v6974_v6  ;;  %v4162_v19 = vmul.f32 %v6974_v6, %v5665_v8  ;;  %v6990_v56 = vadd.f32 %v3934_v44, %v6934_v38  ;;  %v4163_v18 = vmul.f32 %v6982_v4, %v5684_v0  ;;  %v7370_v44 = vld [vmem:[#allocation29_spill] sm:$0xff] }
 0x676   :  { %v4237_v31 = vadd.f32 %v4236_v61, %v4219_v16  ;;  %v4178_v21 = vadd.f32 %v4177_v5, %v4160_v63  ;;  %v4223_v29 = vmul.f32 %v4204_v40, %v5684_v0  ;;  %v6998_v14 = vadd.f32 %v3954_v13, %v6934_v38 }
 0x677   :  { %v4222_v24 = vmul.f32 %v4203_v51, %v5665_v8  ;;  %v4205_v30 = vmul.f32 %v6990_v56, %v6990_v56  ;;  %v4164_v60 = vmul.f32 %v6990_v56, %v5703_v48 }
 0x678   :  { %v4238_v37 = vadd.f32 %v4237_v31, %v4220_v54  ;;  %v4179_v12 = vadd.f32 %v4178_v21, %v4161_v23  ;;  %v4206_v59 = vmul.f32 %v6998_v14, %v6998_v14  ;;  %v4165_v55 = vmul.f32 %v6998_v14, %v7366_v10  ;;  %v7369_v54 = vld [vmem:[#allocation28_spill] sm:$0xff] }
 0x679   :  { %v4224_v28 = vmul.f32 %v4205_v30, %v5703_v48 }
 0x67a   :  { %v4239_v35 = vadd.f32 %v4238_v37, %v4221_v47  ;;  %v4180_v49 = vadd.f32 %v4179_v12, %v4162_v19  ;;  %v3974_v8 = vpop.f32.mrf.mxu0  ;;  %v4225_v36 = vmul.f32 %v4206_v59, %v7366_v10 }
 0x67b   :  { %v7006_v42 = vadd.f32 %v3974_v8, %v6934_v38 }
 0x67c   :  { %v4240_v26 = vadd.f32 %v4239_v35, %v4222_v24  ;;  %v4181_v2 = vadd.f32 %v4180_v49, %v4163_v18  ;;  %v7371_v18 = vld [vmem:[#allocation31_spill] sm:$0xff] }
 0x67d   :  { %v4207_v57 = vmul.f32 %v7006_v42, %v7006_v42  ;;  %v4166_v33 = vmul.f32 %v7006_v42, %v7367_v39 }
 0x67e   :  { %v4241_v27 = vadd.f32 %v4240_v26, %v4223_v29  ;;  %v4182_v45 = vadd.f32 %v4181_v2, %v4164_v60 }
 0x67f   :  { %v4226_v3 = vmul.f32 %v4207_v57, %v7367_v39 }
 0x680   :  { %v4242_v15 = vadd.f32 %v4241_v27, %v4224_v28  ;;  %v4183_v52 = vadd.f32 %v4182_v45, %v4165_v55  ;;  %v7372_v28 = vld [vmem:[#allocation33_spill] sm:$0xff] }
 0x682   :  { %v4243_v53 = vadd.f32 %v4242_v15, %v4225_v36  ;;  %v4184_v32 = vadd.f32 %v4183_v52, %v4166_v33  ;;  %v7373_v15 = vld [vmem:[#allocation34_spill] sm:$0xff] }
 0x684   :  { %v4244_v61 = vadd.f32 %v4243_v53, %v4226_v3 }
 0x690   :  { %v3994_v0 = vpop.f32.mrf.mxu1 }
 0x691   :  { %v7014_v62 = vadd.f32 %v3994_v0, %v6934_v38 }
 0x692   :  { %v4014_v48 = vpop.f32.mrf.mxu2 }
 0x693   :  { %v4208_v20 = vmul.f32 %v7014_v62, %v7014_v62  ;;  %v7022_v46 = vadd.f32 %v4014_v48, %v6934_v38  ;;  %v4167_v16 = vmul.f32 %v7014_v62, %v7368_v50 }
 0x694   :  { %v4034_v41 = vpop.f32.mrf.mxu3 }
 0x695   :  { %v4227_v17 = vmul.f32 %v4208_v20, %v7368_v50  ;;  %v4209_v25 = vmul.f32 %v7022_v46, %v7022_v46  ;;  %v7030_v5 = vadd.f32 %v4034_v41, %v6934_v38  ;;  %v4185_v31 = vadd.f32 %v4184_v32, %v4167_v16  ;;  %v7374_v32 = vld [vmem:[#allocation37_spill] sm:$0xff] }
 0x696   :  { %v4168_v9 = vmul.f32 %v7022_v46, %v7369_v54 }
 0x697   :  { %v4245_v34 = vadd.f32 %v4244_v61, %v4227_v17  ;;  %v4228_v21 = vmul.f32 %v4209_v25, %v7369_v54  ;;  %v4210_v23 = vmul.f32 %v7030_v5, %v7030_v5  ;;  %v4169_v12 = vmul.f32 %v7030_v5, %v7370_v44  ;;  %v7375_v61 = vld [vmem:[#allocation39_spill] sm:$0xff] }
 0x698   :  { %v4186_v51 = vadd.f32 %v4185_v31, %v4168_v9  ;;  %v7376_v9 = vld [vmem:[#allocation36_spill] sm:$0xff] }
 0x699   :  { %v4246_v24 = vadd.f32 %v4245_v34, %v4228_v21  ;;  %v4229_v40 = vmul.f32 %v4210_v23, %v7370_v44 }
 0x69a   :  { %v4187_v49 = vadd.f32 %v4186_v51, %v4169_v12 }
 0x69b   :  { %v4247_v8 = vadd.f32 %v4246_v24, %v4229_v40 }
 0x6c1   :  { %v4054_v63 = vpop.f32.mrf.mxu0  ;;  %v4074_v47 = vpop.f32.mrf.mxu1 }
 0x6c2   :  { %v7038_v37 = vadd.f32 %v4054_v63, %v6934_v38  ;;  %v7043_v19 = vadd.f32 %v4074_v47, %v6934_v38 }
 0x6c4   :  { %v4211_v13 = vmul.f32 %v7038_v37, %v7038_v37  ;;  %v4170_v26 = vmul.f32 %v7038_v37, %v7371_v18  ;;  %v4212_v30 = vmul.f32 %v7043_v19, %v7043_v19  ;;  %v4171_v59 = vmul.f32 %v7043_v19, %v7372_v28 }
 0x6c6   :  { %v4230_v2 = vmul.f32 %v4211_v13, %v7371_v18  ;;  %v4188_v27 = vadd.f32 %v4187_v49, %v4170_v26  ;;  %v4231_v45 = vmul.f32 %v4212_v30, %v7372_v28 }
 0x6c8   :  { %v4248_v55 = vadd.f32 %v4247_v8, %v4230_v2  ;;  %v4189_v52 = vadd.f32 %v4188_v27, %v4171_v59 }
 0x6ca   :  { %v4249_v33 = vadd.f32 %v4248_v55, %v4231_v45  ;;  %v7377_v55 = vmov 2  }
 0x6cb   :  { %v4094_v35 = vpop.f32.mrf.mxu2  ;;  %v4114_v60 = vpop.f32.mrf.mxu3 }
 0x6cc   :  { %v7051_v29 = vadd.f32 %v4094_v35, %v6934_v38  ;;  %v7064_v57 = vadd.f32 %v4114_v60, %v6934_v38 }
 0x6ce   :  { %v4213_v0 = vmul.f32 %v7051_v29, %v7051_v29  ;;  %v4172_v36 = vmul.f32 %v7051_v29, %v7373_v15  ;;  %v4214_v3 = vmul.f32 %v7064_v57, %v7064_v57  ;;  %v4173_v50 = vmul.f32 %v7064_v57, %v7374_v32 }
 0x6d0   :  { %v4232_v39 = vmul.f32 %v4213_v0, %v7373_v15  ;;  %v4190_v53 = vadd.f32 %v4189_v52, %v4172_v36  ;;  %v4233_v31 = vmul.f32 %v4214_v3, %v7374_v32  ;;  %v7378_v15 = vld [vmem:[#allocation46_spill] sm:$0xff] }
 0x6d1   :  { %v7379_v36 = vld [vmem:[#allocation14_spill] sm:$0xff] }
 0x6d2   :  { %v4250_v41 = vadd.f32 %v4249_v33, %v4232_v39  ;;  %v4191_v63 = vadd.f32 %v4190_v53, %v4173_v50  ;;  %v2207_v52 = vsub.f32 %v7379_v36, %v7378_v15  ;;  %v7380_v39 = vld [vmem:[#allocation15_spill] sm:$0xff]  ;;  %v7381_v53 = vld [vmem:[#allocation16_spill] sm:$0xff]  ;;  %v7383_v32 = vld [vmem:[#allocation18_spill] sm:$0xff] }
 0x6d3   :  { %v2208_v33 = vsub.f32 %v7380_v39, %v7378_v15  ;;  %v2209_v3 = vsub.f32 %v7381_v53, %v7378_v15  ;;  %v2211_v50 = vsub.f32 %v7383_v32, %v7378_v15 }
 0x6d4   :  { %v4251_v47 = vadd.f32 %v4250_v41, %v4233_v31 }
 0x6de   :  { %v4134_v10 = vpop.f32.mrf.mxu0 }
 0x6df   :  { %v7067_v48 = vadd.f32 %v4134_v10, %v6934_v38 }
 0x6e1   :  { %v4215_v20 = vmul.f32 %v7067_v48, %v7067_v48  ;;  %v4174_v17 = vmul.f32 %v7067_v48, %v7375_v61 }
 0x6e3   :  { %v4234_v54 = vmul.f32 %v4215_v20, %v7375_v61  ;;  %v4192_v23 = vadd.f32 %v4191_v63, %v4174_v17  ;;  %v7382_v20 = vld [vmem:[#allocation17_spill] sm:$0xff] }
 0x6e4   :  { %v2210_v41 = vsub.f32 %v7382_v20, %v7378_v15  ;;  %v7386_v63 = vld [vmem:[#allocation21_spill] sm:$0xff] }
 0x6e5   :  { %v4154_v16 = vpop.f32.mrf.mxu1  ;;  %v2214_v31 = vsub.f32 %v7386_v63, %v7378_v15  ;;  %v7399_v63 = vld [vmem:[#allocation45_spill] sm:$0xff] }
 0x6e6   :  { %v7079_v25 = vadd.f32 %v4154_v16, %v6934_v38  ;;  %v4252_v38 = vadd.f32 %v4251_v47, %v4234_v54  ;;  %v7384_v16 = vld [vmem:[#allocation19_spill] sm:$0xff] }
 0x6e7   :  { %v2212_v61 = vsub.f32 %v7384_v16, %v7378_v15  ;;  %v7387_v54 = vld [vmem:[#allocation23_spill] sm:$0xff] }
 0x6e8   :  { %v4175_v34 = vmul.f32 %v7079_v25, %v7376_v9  ;;  %v4216_v21 = vmul.f32 %v7079_v25, %v7079_v25 }
 0x6ea   :  { %v4193_v51 = vsel %vm2036_vm12, %v4175_v34, 0.0  ;;  %v4235_v44 = vmul.f32 %v4216_v21, %v7376_v9  ;;  %v2215_v9 = vsub.f32 %v7387_v54, %v7378_v15  ;;  %v7388_v34 = vld [vmem:[#allocation26_spill] sm:$0xff] }
 0x6eb   :  { %v4194_v12 = vadd.f32 %v4193_v51, %v4192_v23  ;;  %v2216_v21 = vsub.f32 %v7388_v34, %v7378_v15  ;;  %v7389_v23 = vld [vmem:[#allocation27_spill] sm:$0xff]  ;;  %v7390_v51 = vld [vmem:[#allocation30_spill] sm:$0xff] }
 0x6ec   :  { %v4253_v35 = vsel %vm2036_vm12, %v4235_v44, 0.0  ;;  %v2217_v47 = vsub.f32 %v7389_v23, %v7378_v15  ;;  %v2218_v44 = vsub.f32 %v7390_v51, %v7378_v15 }
 0x6ed   :  { %4195 = vadd.xlane.f32.xlu0 %v4194_v12  ;;  %v4254_v24 = vadd.f32 %v4253_v35, %v4252_v38  ;;  %v7391_v12 = vld [vmem:[#allocation32_spill] sm:$0xff]  ;;  %v7392_v35 = vld [vmem:[#allocation35_spill] sm:$0xff] }
 0x6ee   :  { %v2219_v38 = vsub.f32 %v7391_v12, %v7378_v15 }
 0x6ef   :  { %4255 = vadd.xlane.f32.xlu1 %v4254_v24  ;;  %v2220_v24 = vsub.f32 %v7392_v35, %v7378_v15 }
 0x760   :  { %v4196_v40 = vpop.xlane.xlu0 %4195 }
 0x761   :  { %v7090_v13 = vmul.f32 0.00048828125, %v4196_v40  ;;  %v7393_v40 = vld [vmem:[#allocation38_spill] sm:$0xff] }
 0x762   :  { %v4256_v49 = vpop.xlane.xlu1 %4255 }
 0x763   :  { %v4257_v18 = vmul.f32 0.00048828125, %v4256_v49  ;;  %v4258_v26 = vmul.f32 %v7090_v13, %v7090_v13  ;;  %v2221_v49 = vsub.f32 %v7393_v40, %v7378_v15 }
 0x765   :  { %v4259_v30 = vsub.f32 %v4257_v18, %v4258_v26  ;;  %v7394_v18 = vld [vmem:[#allocation41_spill] sm:$0xff] }
 0x766   :  { %v2222_v26 = vsub.f32 %v7394_v18, %v7378_v15 }
 0x767   :  { %v4279_v8 = vadd.f32 1e-05, %v4259_v30  ;;  %v7395_v30 = vld [vmem:[#allocation43_spill] sm:$0xff] }
 0x769   :  { %4520 = vrsqrt.f32 %v4279_v8  ;;  %vm4286_vm4 = vweird.f32 %v4279_v8 }
 0x76f   :  { %v4521_v2 = vpop.eup %4520 }
 0x770   :  { %v4281_v60 = vmul.f32 %v4521_v2, %v4279_v8  ;;  %vm4287_vm1 = vweird.f32 %v4521_v2  ;;  %v2223_v8 = vsub.f32 %v7395_v30, %v7378_v15 }
 0x771   :  { %vm4288_vm5 = vmor %vm4286_vm4, %vm4287_vm1 }
 0x772   :  { %v4282_v27 = vmul.f32 %v4521_v2, %v4281_v60 }
 0x774   :  { %v4283_v28 = vmul.f32 0.5, %v4282_v27  ;;  %v7397_v27 = vld [vmem:[#allocation42_spill] sm:$0xff] }
 0x776   :  { %v4284_v59 = vsub.f32 1.5, %v4283_v28  ;;  %v2225_v28 = vsub.f32 %v7397_v27, %v7378_v15  ;;  %v4261_v27 = vsub.f32 %v6940_v1, %v7090_v13  ;;  %v4268_v1 = vsub.f32 %v6998_v14, %v7090_v13 }
 0x777   :  { %v4275_v14 = vsub.f32 %v7051_v29, %v7090_v13 }
 0x778   :  { %v4285_v0 = vmul.f32 %v4521_v2, %v4284_v59  ;;  %v7398_v59 = vld [vmem:[#allocation40_spill] sm:$0xff] }
 0x779   :  { %v2283_v36 = vmul.f32 %v7398_v59, %v2211_v50  ;;  %v2284_v39 = vmul.f32 %v7398_v59, %v2212_v61  ;;  %v2286_v20 = vmul.f32 %v7398_v59, %v2214_v31  ;;  %v2287_v32 = vmul.f32 %v7398_v59, %v2215_v9 }
 0x77a   :  { %v4289_v45 = vsel %vm4288_vm5, %v4521_v2, %v4285_v0  ;;  %v7396_v2 = vld [vmem:[#allocation44_spill] sm:$0xff]  ;;  %v2279_v0 = vmul.f32 %v7398_v59, %v2207_v52  ;;  %v2289_v52 = vmul.f32 %v7398_v59, %v2217_v47  ;;  %v2293_v50 = vmul.f32 %v7398_v59, %v2221_v49 }
 0x77b   :  { %v4290_v10 = vmul.f32 %v4289_v45, %v6899_v58  ;;  %v2224_v60 = vsub.f32 %v7396_v2, %v7378_v15  ;;  %v2280_v45 = vmul.f32 %v7398_v59, %v2208_v33  ;;  %v2290_v33 = vmul.f32 %v7398_v59, %v2218_v44 }
 0x77c   :  { %v2294_v16 = vmul.f32 %v7398_v59, %v2222_v26  ;;  %v2295_v61 = vmul.f32 %v7398_v59, %v2223_v8  ;;  %v7155_v31 = vadd.f32 %v7399_v63, %v2279_v0  ;;  %v7170_v23 = vadd.f32 %v7399_v63, %v2284_v39 }
 0x77d   :  { %4293 = vperm.xlu2 %4514, %v4290_v10   ;;  %v2281_v10 = vmul.f32 %v7398_v59, %v2209_v3  ;;  %v2291_v3 = vmul.f32 %v7398_v59, %v2219_v38  ;;  %v7158_v54 = vadd.f32 %v7399_v63, %v2280_v45  ;;  %v7176_v51 = vadd.f32 %v7399_v63, %v2286_v20 }
 0x77e   :  { %v7179_v44 = vadd.f32 %v7399_v63, %v2287_v32  ;;  %v7185_v38 = vadd.f32 %v7399_v63, %v2289_v52  ;;  %v7188_v35 = vadd.f32 %v7399_v63, %v2290_v33  ;;  %v7197_v49 = vadd.f32 %v7399_v63, %v2293_v50 }
 0x77f   :  { %v7161_v9 = vadd.f32 %v7399_v63, %v2281_v10  ;;  %v7200_v18 = vadd.f32 %v7399_v63, %v2294_v16  ;;  %v7203_v26 = vadd.f32 %v7399_v63, %v2295_v61  ;;  %v4264_v0 = vsub.f32 %v6966_v11, %v7090_v13 }
 0x780   :  { %v4265_v45 = vsub.f32 %v6974_v6, %v7090_v13  ;;  %v4266_v10 = vsub.f32 %v6982_v4, %v7090_v13  ;;  %v4271_v11 = vsub.f32 %v7022_v46, %v7090_v13  ;;  %v4272_v6 = vsub.f32 %v7030_v5, %v7090_v13 }
 0x781   :  { %v4273_v4 = vsub.f32 %v7038_v37, %v7090_v13  ;;  %v4278_v46 = vsub.f32 %v7079_v25, %v7090_v13 }
 0x785   :  { %4515 = vset.pattern.permute.xlu2 %v7377_v55  ;;  %v2282_v55 = vmul.f32 %v7398_v59, %v2210_v41  ;;  %v2292_v41 = vmul.f32 %v7398_v59, %v2220_v24  ;;  %v7191_v24 = vadd.f32 %v7399_v63, %v2291_v3 }
 0x786   :  { %4316 = vperm.xlu2 %4515, %v6899_v58   ;;  %v7385_v58 = vld [vmem:[#allocation20_spill] sm:$0xff] }
 0x787   :  { %v2213_v17 = vsub.f32 %v7385_v58, %v7378_v15  ;;  %v2288_v15 = vmul.f32 %v7398_v59, %v2216_v21  ;;  %v2296_v58 = vmul.f32 %v7398_v59, %v2224_v60  ;;  %v7164_v34 = vadd.f32 %v7399_v63, %v2282_v55 }
 0x788   :  { %v7167_v21 = vadd.f32 %v7399_v63, %v2283_v36  ;;  %v7194_v40 = vadd.f32 %v7399_v63, %v2292_v41  ;;  %v4260_v60 = vsub.f32 %v6937_v7, %v7090_v13  ;;  %v4267_v7 = vsub.f32 %v6990_v56, %v7090_v13 }
 0x789   :  { %v2285_v53 = vmul.f32 %v7398_v59, %v2213_v17  ;;  %v2297_v17 = vmul.f32 %v7398_v59, %v2225_v28  ;;  %v7182_v12 = vadd.f32 %v7399_v63, %v2288_v15  ;;  %v7206_v8 = vadd.f32 %v7399_v63, %v2296_v58 }
 0x78a   :  { %v4262_v28 = vsub.f32 %v6943_v43, %v7090_v13  ;;  %v4263_v59 = vsub.f32 %v6958_v22, %v7090_v13  ;;  %v4269_v43 = vsub.f32 %v7006_v42, %v7090_v13  ;;  %v4270_v22 = vsub.f32 %v7014_v62, %v7090_v13 }
 0x78b   :  { %v7173_v47 = vadd.f32 %v7399_v63, %v2285_v53  ;;  %v7209_v2 = vadd.f32 %v7399_v63, %v2297_v17  ;;  %v4274_v56 = vsub.f32 %v7043_v19, %v7090_v13  ;;  %v4276_v42 = vsub.f32 %v7064_v57, %v7090_v13 }
 0x78c   :  { %v4277_v62 = vsub.f32 %v7067_v48, %v7090_v13 }
 0x7d7   :  { %v4294_v30 = vpop.permute.xlu2 %4293 }
 0x7d8   :  { %v4296_v55 = vmul.f32 %v4294_v30, %v4260_v60  ;;  %v4297_v5 = vmul.f32 %v4294_v30, %v4261_v27  ;;  %v4298_v36 = vmul.f32 %v4294_v30, %v4262_v28  ;;  %v4299_v39 = vmul.f32 %v4294_v30, %v4263_v59 }
 0x7d9   :  { %v4300_v37 = vmul.f32 %v4294_v30, %v4264_v0  ;;  %v4301_v53 = vmul.f32 %v4294_v30, %v4265_v45  ;;  %v4302_v20 = vmul.f32 %v4294_v30, %v4266_v10  ;;  %v4303_v19 = vmul.f32 %v4294_v30, %v4267_v7 }
 0x7da   :  { %v4304_v32 = vmul.f32 %v4294_v30, %v4268_v1  ;;  %v4305_v15 = vmul.f32 %v4294_v30, %v4269_v43  ;;  %v4306_v29 = vmul.f32 %v4294_v30, %v4270_v22  ;;  %v4307_v52 = vmul.f32 %v4294_v30, %v4271_v11 }
 0x7db   :  { %v4308_v33 = vmul.f32 %v4294_v30, %v4272_v6  ;;  %v4309_v57 = vmul.f32 %v4294_v30, %v4273_v4  ;;  %v4310_v3 = vmul.f32 %v4294_v30, %v4274_v56  ;;  %v4311_v41 = vmul.f32 %v4294_v30, %v4275_v14 }
 0x7dc   :  { %v4312_v48 = vmul.f32 %v4294_v30, %v4276_v42  ;;  %v4313_v50 = vmul.f32 %v4294_v30, %v4277_v62  ;;  %v4314_v16 = vmul.f32 %v4294_v30, %v4278_v46 }
 0x7e0   :  { %v4317_v25 = vpop.permute.xlu2 %4316 }
 0x7e1   :  { %v4319_v13 = vadd.f32 %v4317_v25, %v4296_v55  ;;  %v4320_v61 = vadd.f32 %v4317_v25, %v4297_v5  ;;  %v4321_v58 = vadd.f32 %v4317_v25, %v4298_v36  ;;  %v4322_v17 = vadd.f32 %v4317_v25, %v4299_v39 }
 0x7e2   :  { %v4323_v63 = vadd.f32 %v4317_v25, %v4300_v37  ;;  %v4324_v60 = vadd.f32 %v4317_v25, %v4301_v53  ;;  %v4325_v27 = vadd.f32 %v4317_v25, %v4302_v20  ;;  %v4326_v28 = vadd.f32 %v4317_v25, %v4303_v19 }
 0x7e3   :  { %v4327_v59 = vadd.f32 %v4317_v25, %v4304_v32  ;;  %v4328_v0 = vadd.f32 %v4317_v25, %v4305_v15  ;;  %v4329_v45 = vadd.f32 %v4317_v25, %v4306_v29  ;;  %v4330_v10 = vadd.f32 %v4317_v25, %v4307_v52 }
 0x7e4   :  { %v4331_v7 = vadd.f32 %v4317_v25, %v4308_v33  ;;  %v4332_v1 = vadd.f32 %v4317_v25, %v4309_v57  ;;  %v4333_v43 = vadd.f32 %v4317_v25, %v4310_v3  ;;  %v4334_v22 = vadd.f32 %v4317_v25, %v4311_v41 }
 0x7e5   :  { %v4335_v11 = vadd.f32 %v4317_v25, %v4312_v48  ;;  %v4336_v6 = vadd.f32 %v4317_v25, %v4313_v50  ;;  %v4337_v30 = vadd.f32 %v4317_v25, %v4314_v16  ;;  %v4338_v4 = vadd.f32 %v4319_v13, %v7155_v31 }
 0x7e6   :  { %v4339_v56 = vadd.f32 %v4320_v61, %v7158_v54  ;;  %v4340_v14 = vadd.f32 %v4321_v58, %v7161_v9  ;;  %v4341_v42 = vadd.f32 %v4322_v17, %v7164_v34  ;;  %v4342_v62 = vadd.f32 %v4323_v63, %v7167_v21 }
 0x7e7   :  { %v4343_v46 = vadd.f32 %v4324_v60, %v7170_v23  ;;  %v4344_v55 = vadd.f32 %v4325_v27, %v7173_v47  ;;  %v4345_v5 = vadd.f32 %v4326_v28, %v7176_v51  ;;  %v4346_v36 = vadd.f32 %v4327_v59, %v7179_v44 }
 0x7e8   :  { %v4347_v39 = vadd.f32 %v4328_v0, %v7182_v12  ;;  %v4348_v31 = vadd.f32 %v4329_v45, %v7185_v38  ;;  %v4349_v54 = vadd.f32 %v4330_v10, %v7188_v35  ;;  %v4350_v9 = vadd.f32 %v4331_v7, %v7191_v24 }
 0x7e9   :  { %v4351_v34 = vadd.f32 %v4332_v1, %v7194_v40  ;;  %v4352_v21 = vadd.f32 %v4333_v43, %v7197_v49  ;;  %v4353_v23 = vadd.f32 %v4334_v22, %v7200_v18  ;;  %v4354_v47 = vadd.f32 %v4335_v11, %v7203_v26 }
 0x7ea   :  { %v4355_v51 = vadd.f32 %v4336_v6, %v7206_v8  ;;  %v4356_v44 = vadd.f32 %v4337_v30, %v7209_v2  ;;  %v4357_v37 = vmax.f32 %v4338_v4, 0.0  ;;  %v4358_v12 = vmax.f32 %v4339_v56, 0.0 }
 0x7eb   :  { %v4359_v53 = vmax.f32 %v4340_v14, 0.0  ;;  %v4360_v38 = vmax.f32 %v4341_v42, 0.0  ;;  %v4361_v20 = vmax.f32 %v4342_v62, 0.0  ;;  %v4362_v35 = vmax.f32 %v4343_v46, 0.0 }
 0x7ec   :  { %4376 = vst [vmem:[#allocation10] sm:$0xff] %v4357_v37  ;;  %v4363_v24 = vmax.f32 %v4344_v55, 0.0  ;;  %v4364_v40 = vmax.f32 %v4345_v5, 0.0  ;;  %v4365_v49 = vmax.f32 %v4346_v36, 0.0  ;;  %v4366_v18 = vmax.f32 %v4347_v39, 0.0 }
 0x7ed   :  { %4377 = vst [vmem:[#allocation10 + $0x8] sm:$0xff] %v4358_v12  ;;  %v4367_v26 = vmax.f32 %v4348_v31, 0.0  ;;  %v4368_v8 = vmax.f32 %v4349_v54, 0.0  ;;  %v4369_v2 = vmax.f32 %v4350_v9, 0.0  ;;  %v4370_v19 = vmax.f32 %v4351_v34, 0.0 }
 0x7ee   :  { %4378 = vst [vmem:[#allocation10 + $0x10] sm:$0xff] %v4359_v53  ;;  %v4371_v32 = vmax.f32 %v4352_v21, 0.0  ;;  %v4372_v15 = vmax.f32 %v4353_v23, 0.0  ;;  %v4373_v29 = vmax.f32 %v4354_v47, 0.0  ;;  %v4374_v52 = vmax.f32 %v4355_v51, 0.0 }
 0x7ef   :  { %4379 = vst [vmem:[#allocation10 + $0x18] sm:$0xff] %v4360_v38  ;;  %v4375_v33 = vmax.f32 %v4356_v44, 0.0 }
 0x7f0   :  { %4380 = vst [vmem:[#allocation10 + $0x20] sm:$0xff] %v4361_v20 }
 0x7f1   :  { %4381 = vst [vmem:[#allocation10 + $0x28] sm:$0xff] %v4362_v35 }
 0x7f2   :  { %4382 = vst [vmem:[#allocation10 + $0x30] sm:$0xff] %v4363_v24 }
 0x7f3   :  { %4383 = vst [vmem:[#allocation10 + $0x38] sm:$0xff] %v4364_v40 }
 0x7f4   :  { %4384 = vst [vmem:[#allocation10 + $0x40] sm:$0xff] %v4365_v49 }
 0x7f5   :  { %4385 = vst [vmem:[#allocation10 + $0x48] sm:$0xff] %v4366_v18 }
 0x7f6   :  { %4386 = vst [vmem:[#allocation10 + $0x50] sm:$0xff] %v4367_v26 }
 0x7f7   :  { %4387 = vst [vmem:[#allocation10 + $0x58] sm:$0xff] %v4368_v8 }
 0x7f8   :  { %4388 = vst [vmem:[#allocation10 + $0x60] sm:$0xff] %v4369_v2 }
 0x7f9   :  { %4389 = vst [vmem:[#allocation10 + $0x68] sm:$0xff] %v4370_v19 }
 0x7fa   :  { %4390 = vst [vmem:[#allocation10 + $0x70] sm:$0xff] %v4371_v32 }
 0x7fb   :  { %4391 = vst [vmem:[#allocation10 + $0x78] sm:$0xff] %v4372_v15 }
 0x7fc   :  { %4392 = vst [vmem:[#allocation10 + $0x80] sm:$0xff] %v4373_v29 }
 0x7fd   :  { %4393 = vst [vmem:[#allocation10 + $0x88] sm:$0xff] %v4374_v52 }
 0x7fe   :  { %4394 = vst.msk [vmem:[#allocation10 + $0x90] sm:$0xff] %vm2036_vm12, %v4375_v33 }
 0x7ff   :  { %4405 = dma.vmem_to_hbm [thread:$0]  %s4401_s7, 2432, %s4403_s1, [#allocation7]  }
 0x800   :  { %4613 = dma.done.wait [#allocation7], 2432  }
 0x801   :  { %4614 = vsyncadd [#allocation7], 4294964864 }
 0x802   :  { %4410 = vsyncpa [#allocation6], 1 }
 0x803   :  { %4411 = vsyncpa [#allocation9], 1 }
 0x804   :  { %4412 = vsyncpa [#allocation7], 1 }

</bundles_post_ra>
